<compile_context>
chip_gen: v7x
topology: tpu7x:2x2x1
jax: 0.10.0
libtpu: 0.0.40
codegen_flags: <defaults>
</compile_context>

<pallas_src>
import numpy as np
import jax
import jax.numpy as jnp
from jax.experimental import pallas as pl
from jax.experimental.pallas import tpu as pltpu

EPS = 1e-5  # BatchNorm1d eps


def _round_up(n, m):
    return (n + m - 1) // m * m


# ----------------------------------------------------------------------------
# Pallas kernel: fused attention-gate + MLP forward (eval semantics)
# ----------------------------------------------------------------------------
def _attention_net_kernel(
    x_ref,                                       # [tb, D] bf16
    wa1_ref, ba1_ref, wa2_ref, ba2_ref,          # attention: Linear -> tanh -> Linear -> softmax
    w1_ref, b1_ref, w2_ref, b2_ref,              # main-net Linears (BN folded), ReLU between
    w3_ref, b3_ref, w4_ref, b4_ref,
    w5_ref, b5_ref,                              # final Linear(128 -> 1): [1,128] row + [1,1] bias
    out_ref,                                     # [1, tb] f32 (lane-dense scalars)
):
    x = x_ref[...]                                                    # bf16 [tb, D]

    # ---- attention branch (bf16 MXU inputs, f32 accumulate / elementwise) ----
    a = jnp.tanh(
        jnp.dot(x, wa1_ref[...], preferred_element_type=jnp.float32) + ba1_ref[...]
    )                                                                 # f32 [tb, H]
    s = jnp.dot(a.astype(jnp.bfloat16), wa2_ref[...],
                preferred_element_type=jnp.float32) + ba2_ref[...]    # f32 [tb, D]
    s = s - jnp.max(s, axis=-1, keepdims=True)                        # stable softmax (dim=1)
    e = jnp.exp(s)
    inv = pl.reciprocal(jnp.sum(e, axis=-1, keepdims=True), approx=True)  # EUP
    attn = e * inv                                                    # f32 [tb, D]

    # ---- attended features ----
    h = (x.astype(jnp.float32) * attn).astype(jnp.bfloat16)           # [tb, D]

    # ---- main net: 3 x (Linear[BN folded] -> ReLU -> Dropout=identity) ----
    for w_ref, b_ref in ((w1_ref, b1_ref), (w2_ref, b2_ref), (w3_ref, b3_ref)):
        h = jnp.maximum(
            jnp.dot(h, w_ref[...], preferred_element_type=jnp.float32) + b_ref[...],
            0.0,
        ).astype(jnp.bfloat16)

    # ---- layer 4 kept in f32 (only feeds the VPU reduce below) ----
    h4 = jnp.maximum(
        jnp.dot(h, w4_ref[...], preferred_element_type=jnp.float32) + b4_ref[...],
        0.0,
    )                                                                 # f32 [tb, 128]

    # ---- final Linear(128 -> 1) as VPU multiply + cross-lane reduce ----
    r = jnp.sum(h4 * w5_ref[...], axis=-1)                            # [tb]
    out_ref[...] = r[None, :] + b5_ref[...]                           # (1, tb) lane-dense store


# ----------------------------------------------------------------------------
# Wrapper: batch grid, resident weights, lane-dense scalar output
# ----------------------------------------------------------------------------
def attention_net_forward(x, kparams, *, tb=1024, vmem_limit_bytes=48 * 1024 * 1024):
    """x: [B, D] float (or bf16); kparams from make_kernel_params().
    Returns [B] f32 (the PyTorch .squeeze()).
    Per-generation guidance: sweep tb in {512, 1024, 2048}; keep tb <= B/2 on
    v7x so the parallel axis can shard across both TensorCores."""
    B, D = x.shape
    flat = list(kparams)

    # Lane-aligned batch tile; pad B so every tile is fully valid.
    tb = max(128, min(int(tb), _round_up(B, 128)))
    tb = _round_up(tb, 128)
    B_pad = _round_up(B, tb)

    x_bf = x.astype(jnp.bfloat16)
    if B_pad != B:
        x_bf = jnp.pad(x_bf, ((0, B_pad - B), (0, 0)))

    grid = (B_pad // tb,)

    in_specs = [pl.BlockSpec((tb, D), lambda i: (i, 0))]              # batch-tiled bf16 input
    # weights/biases: full-shape blocks, constant index_map -> VMEM-resident
    in_specs += [pl.BlockSpec(p.shape, lambda i: (0, 0)) for p in flat]
    out_specs = pl.BlockSpec((1, tb), lambda i: (0, i))               # lane-dense scalar row

    # advisory cost estimate (MXU matmuls; tanh + exp transcendentals)
    H = flat[0].shape[1]
    mm_dims = [(D, H), (H, D), (D, 512), (512, 384), (384, 256), (256, 128)]
    flops = 2 * B_pad * (sum(k * n for k, n in mm_dims) + 128)
    transcendentals = B_pad * (H + D)
    bytes_accessed = (x_bf.size * x_bf.dtype.itemsize
                      + sum(p.size * p.dtype.itemsize for p in flat)
                      + B_pad * 4)

    out = pl.pallas_call(
        _attention_net_kernel,
        grid=grid,
        in_specs=in_specs,
        out_specs=out_specs,
        out_shape=jax.ShapeDtypeStruct((1, B_pad), jnp.float32),
        compiler_params=pltpu.CompilerParams(
            dimension_semantics=("parallel",),        # megacore-shard batch
            vmem_limit_bytes=vmem_limit_bytes,
        ),
        cost_estimate=pl.CostEstimate(
            flops=flops,
            transcendentals=transcendentals,
            bytes_accessed=bytes_accessed,
        ),
    )(x_bf, *flat)
    return out[0, :B]                                  # squeeze -> [B]


# ----------------------------------------------------------------------------
# Deterministic parameter construction (PyTorch-default-style init + non-trivial
# BatchNorm running stats so the fold is exercised in its general form).
# ----------------------------------------------------------------------------
def _linear_init(key, fan_in, fan_out):
    kw, kb = jax.random.split(key)
    bound = 1.0 / np.sqrt(fan_in)
    w = jax.random.uniform(kw, (fan_in, fan_out), jnp.float32, -bound, bound)
    b = jax.random.uniform(kb, (fan_out,), jnp.float32, -bound, bound)
    return w, b


def _bn_init(key, n):
    kg, kb, km, kv = jax.random.split(key, 4)
    gamma = jax.random.uniform(kg, (n,), jnp.float32, 0.5, 1.5)
    beta = 0.1 * jax.random.normal(kb, (n,), jnp.float32)
    mean = 0.1 * jax.random.normal(km, (n,), jnp.float32)
    var = jax.random.uniform(kv, (n,), jnp.float32, 0.5, 1.5)
    return gamma, beta, mean, var


def make_raw_params(key, input_size, hidden_size=256):
    ks = jax.random.split(key, 16)
    wa1, ba1 = _linear_init(ks[0], input_size, hidden_size)
    wa2, ba2 = _linear_init(ks[1], hidden_size, input_size)
    dims = [input_size, 512, 384, 256, 128, 1]
    main = [_linear_init(ks[2 + i], dims[i], dims[i + 1]) for i in range(5)]
    bns = [_bn_init(ks[8 + i], dims[i + 1]) for i in range(4)]   # BN after first 4 Linears
    return dict(attn=((wa1, ba1), (wa2, ba2)), main=main, bns=bns)


def make_kernel_params(raw, weight_dtype=jnp.bfloat16):
    """Fold BatchNorm into the preceding Linear; cast MXU weights to
    `weight_dtype`; biases stay f32 as [1, N].  The final Linear(128 -> 1) is
    kept as an f32 [1, 128] row + [1, 1] bias for the in-kernel VPU reduce."""
    (wa1, ba1), (wa2, ba2) = raw["attn"]
    flat = [wa1.astype(weight_dtype), ba1.reshape(1, -1).astype(jnp.float32),
            wa2.astype(weight_dtype), ba2.reshape(1, -1).astype(jnp.float32)]
    for i in range(4):
        w, b = raw["main"][i]
        gamma, beta, mean, var = raw["bns"][i]
        scale = gamma / jnp.sqrt(var + EPS)
        w = w * scale[None, :]
        b = (b - mean) * scale + beta
        flat += [w.astype(weight_dtype), b.reshape(1, -1).astype(jnp.float32)]
    w5, b5 = raw["main"][4]                           # [128, 1], [1]
    flat += [w5.T.astype(jnp.float32),                # [1, 128] row for VPU reduce
             b5.reshape(1, 1).astype(jnp.float32)]
    return tuple(flat)


# ----------------------------------------------------------------------------
# Pure-JAX references for verification
# ----------------------------------------------------------------------------
def reference_explicit_f32(x, raw):
    """Full-f32 reference with explicit BatchNorm (eval) -- the PyTorch semantics."""
    (wa1, ba1), (wa2, ba2) = raw["attn"]
    a = jnp.tanh(x @ wa1 + ba1)
    s = a @ wa2 + ba2
    s = s - jnp.max(s, axis=-1, keepdims=True)
    e = jnp.exp(s)
    attn = e / jnp.sum(e, axis=-1, keepdims=True)
    h = x * attn
    for i, (w, b) in enumerate(raw["main"]):
        z = h @ w + b
        if i < 4:
            gamma, beta, mean, var = raw["bns"][i]
            z = (z - mean) / jnp.sqrt(var + EPS) * gamma + beta
            z = jnp.maximum(z, 0.0)        # ReLU; Dropout = identity in eval
        h = z
    return h[:, 0]


def reference_folded(x, kparams):
    """Same folded-weight math as the kernel (cast to the weights' dtype at the
    matmul input, f32 accumulation, VPU-style final reduce), in plain JAX."""
    (wa1, ba1, wa2, ba2,
     w1, b1, w2, b2, w3, b3, w4, b4, w5_row, b5) = kparams

    xw = x.astype(wa1.dtype)

    def mm(u, w):
        return jnp.dot(u.astype(w.dtype), w, preferred_element_type=jnp.float32)

    a = jnp.tanh(mm(xw, wa1) + ba1)
    s = mm(a, wa2) + ba2
    s = s - jnp.max(s, axis=-1, keepdims=True)
    e = jnp.exp(s)
    attn = e / jnp.sum(e, axis=-1, keepdims=True)
    h = xw.astype(jnp.float32) * attn
    for w, b in ((w1, b1), (w2, b2), (w3, b3)):
        h = jnp.maximum(mm(h, w) + b, 0.0)
    h4 = jnp.maximum(mm(h, w4) + b4, 0.0)
    return jnp.sum(h4 * w5_row, axis=-1) + b5[0, 0]


if __name__ == "__main__":
    B, D, H = 32, 128, 256     # small test shapes: batch 32, input_size 128, hidden 256
    key = jax.random.PRNGKey(0)
    kx, kp = jax.random.split(key)
    x = jax.random.normal(kx, (B, D), jnp.float32)

    raw = make_raw_params(kp, D, hidden_size=H)
    folded_f32 = make_kernel_params(raw, weight_dtype=jnp.float32)    # for fold validation
    folded_bf16 = make_kernel_params(raw, weight_dtype=jnp.bfloat16)  # kernel params

    y = attention_net_forward(x, folded_bf16, tb=1024)
    y = jax.block_until_ready(y)
    assert y.shape == (B,)

    y_explicit = reference_explicit_f32(x, raw)          # PyTorch eval semantics, f32
    y_folded_f32 = reference_folded(x, folded_f32)       # validates the BN fold exactly
    y_mirror = reference_folded(x, folded_bf16)          # mirrors kernel precision policy

    # 1) BN fold is algebraically exact (up to f32 reassociation)
    np.testing.assert_allclose(np.asarray(y_folded_f32), np.asarray(y_explicit),
                               rtol=1e-3, atol=1e-4)
    # 2) kernel matches the same bf16-matmul / f32-accumulate math
    #    (approx-reciprocal softmax => slightly looser tolerance)
    np.testing.assert_allclose(np.asarray(y), np.asarray(y_mirror),
                               rtol=5e-3, atol=5e-3)
    # 3) end-to-end sanity vs the full-f32 module semantics (bf16 weights => loose tol)
    np.testing.assert_allclose(np.asarray(y), np.asarray(y_explicit),
                               rtol=2e-1, atol=5e-2)

    print("KERNEL_OK")
</pallas_src>

<mosaic_0001>
module attributes {stable_mosaic.version = 11 : i64} {
  func.func @_attention_net_kernel(%arg0: i32, %arg1: memref<128x128xbf16, #tpu.memory_space<vmem>>, %arg2: memref<128x256xbf16, #tpu.memory_space<vmem>>, %arg3: memref<1x256xf32, #tpu.memory_space<vmem>>, %arg4: memref<256x128xbf16, #tpu.memory_space<vmem>>, %arg5: memref<1x128xf32, #tpu.memory_space<vmem>>, %arg6: memref<128x512xbf16, #tpu.memory_space<vmem>>, %arg7: memref<1x512xf32, #tpu.memory_space<vmem>>, %arg8: memref<512x384xbf16, #tpu.memory_space<vmem>>, %arg9: memref<1x384xf32, #tpu.memory_space<vmem>>, %arg10: memref<384x256xbf16, #tpu.memory_space<vmem>>, %arg11: memref<1x256xf32, #tpu.memory_space<vmem>>, %arg12: memref<256x128xbf16, #tpu.memory_space<vmem>>, %arg13: memref<1x128xf32, #tpu.memory_space<vmem>>, %arg14: memref<1x128xf32, #tpu.memory_space<vmem>>, %arg15: memref<1x1xf32, #tpu.memory_space<vmem>>, %arg16: memref<1x128xf32, #tpu.memory_space<vmem>>) attributes {dimension_semantics = [#tpu.dimension_semantics<parallel>], iteration_bounds = array<i64: 1>, scalar_prefetch = 0 : i64, scratch_operands = 0 : i64, tpu.core_type = #tpu.core_type<tc>, window_params = [{transform_indices = @transform_0, window_bounds = array<i64: 128, 128>}, {pipeline_mode = #tpu.pipeline_mode<synchronous>, transform_indices = @transform_1, window_bounds = array<i64: 128, 256>}, {pipeline_mode = #tpu.pipeline_mode<synchronous>, transform_indices = @transform_2, window_bounds = array<i64: 1, 256>}, {pipeline_mode = #tpu.pipeline_mode<synchronous>, transform_indices = @transform_3, window_bounds = array<i64: 256, 128>}, {pipeline_mode = #tpu.pipeline_mode<synchronous>, transform_indices = @transform_4, window_bounds = array<i64: 1, 128>}, {pipeline_mode = #tpu.pipeline_mode<synchronous>, transform_indices = @transform_5, window_bounds = array<i64: 128, 512>}, {pipeline_mode = #tpu.pipeline_mode<synchronous>, transform_indices = @transform_6, window_bounds = array<i64: 1, 512>}, {pipeline_mode = #tpu.pipeline_mode<synchronous>, transform_indices = @transform_7, window_bounds = array<i64: 512, 384>}, {pipeline_mode = #tpu.pipeline_mode<synchronous>, transform_indices = @transform_8, window_bounds = array<i64: 1, 384>}, {pipeline_mode = #tpu.pipeline_mode<synchronous>, transform_indices = @transform_9, window_bounds = array<i64: 384, 256>}, {pipeline_mode = #tpu.pipeline_mode<synchronous>, transform_indices = @transform_10, window_bounds = array<i64: 1, 256>}, {pipeline_mode = #tpu.pipeline_mode<synchronous>, transform_indices = @transform_11, window_bounds = array<i64: 256, 128>}, {pipeline_mode = #tpu.pipeline_mode<synchronous>, transform_indices = @transform_12, window_bounds = array<i64: 1, 128>}, {pipeline_mode = #tpu.pipeline_mode<synchronous>, transform_indices = @transform_13, window_bounds = array<i64: 1, 128>}, {pipeline_mode = #tpu.pipeline_mode<synchronous>, transform_indices = @transform_14, window_bounds = array<i64: 1, 1>}, {transform_indices = @transform_15, window_bounds = array<i64: 1, 128>}]} {
    %c0 = arith.constant 0 : index
    %c0_0 = arith.constant 0 : index
    %0 = vector.load %arg1[%c0, %c0_0] : memref<128x128xbf16, #tpu.memory_space<vmem>>, vector<128x128xbf16>
    %c0_1 = arith.constant 0 : index
    %c0_2 = arith.constant 0 : index
    %1 = vector.load %arg2[%c0_1, %c0_2] : memref<128x256xbf16, #tpu.memory_space<vmem>>, vector<128x256xbf16>
    %cst = arith.constant dense<0.000000e+00> : vector<128x256xf32>
    %2 = tpu.matmul %0, %1, %cst {dimension_numbers = #tpu.dot_dimension_numbers<[1], [0], [0], [1], [0, 0, 1, 1], [], []>} : vector<128x128xbf16>, vector<128x256xbf16>, vector<128x256xf32> -> vector<128x256xf32>
    %c0_3 = arith.constant 0 : index
    %c0_4 = arith.constant 0 : index
    %3 = vector.load %arg3[%c0_3, %c0_4] : memref<1x256xf32, #tpu.memory_space<vmem>>, vector<1x256xf32>
    %4 = vector.broadcast %3 : vector<1x256xf32> to vector<128x256xf32>
    %5 = arith.addf %2, %4 : vector<128x256xf32>
    %6 = math.tanh %5 : vector<128x256xf32>
    %7 = arith.truncf %6 : vector<128x256xf32> to vector<128x256xbf16>
    %c0_5 = arith.constant 0 : index
    %c0_6 = arith.constant 0 : index
    %8 = vector.load %arg4[%c0_5, %c0_6] : memref<256x128xbf16, #tpu.memory_space<vmem>>, vector<256x128xbf16>
    %cst_7 = arith.constant dense<0.000000e+00> : vector<128x128xf32>
    %9 = tpu.matmul %7, %8, %cst_7 {dimension_numbers = #tpu.dot_dimension_numbers<[1], [0], [0], [1], [0, 0, 1, 1], [], []>} : vector<128x256xbf16>, vector<256x128xbf16>, vector<128x128xf32> -> vector<128x128xf32>
    %c0_8 = arith.constant 0 : index
    %c0_9 = arith.constant 0 : index
    %10 = vector.load %arg5[%c0_8, %c0_9] : memref<1x128xf32, #tpu.memory_space<vmem>>, vector<1x128xf32>
    %11 = vector.broadcast %10 : vector<1x128xf32> to vector<128x128xf32>
    %12 = arith.addf %9, %11 : vector<128x128xf32>
    %cst_10 = arith.constant dense<0xFF800000> : vector<128xf32>
    %13 = vector.multi_reduction <maximumf>, %12, %cst_10 [1] : vector<128x128xf32> to vector<128xf32>
    %14 = vector.shape_cast %13 : vector<128xf32> to vector<128x1xf32>
    %15 = vector.broadcast %14 : vector<128x1xf32> to vector<128x128xf32>
    %16 = arith.subf %12, %15 : vector<128x128xf32>
    %17 = math.exp %16 : vector<128x128xf32>
    %cst_11 = arith.constant dense<0.000000e+00> : vector<128xf32>
    %18 = vector.multi_reduction <add>, %17, %cst_11 [1] : vector<128x128xf32> to vector<128xf32>
    %19 = vector.shape_cast %18 : vector<128xf32> to vector<128x1xf32>
    %20 = tpu.reciprocal %19 {approx = true} : vector<128x1xf32> -> vector<128x1xf32>
    %21 = vector.broadcast %20 : vector<128x1xf32> to vector<128x128xf32>
    %22 = arith.mulf %17, %21 : vector<128x128xf32>
    %23 = arith.extf %0 : vector<128x128xbf16> to vector<128x128xf32>
    %24 = arith.mulf %23, %22 : vector<128x128xf32>
    %25 = arith.truncf %24 : vector<128x128xf32> to vector<128x128xbf16>
    %c0_12 = arith.constant 0 : index
    %c0_13 = arith.constant 0 : index
    %26 = vector.load %arg6[%c0_12, %c0_13] : memref<128x512xbf16, #tpu.memory_space<vmem>>, vector<128x512xbf16>
    %cst_14 = arith.constant dense<0.000000e+00> : vector<128x512xf32>
    %27 = tpu.matmul %25, %26, %cst_14 {dimension_numbers = #tpu.dot_dimension_numbers<[1], [0], [0], [1], [0, 0, 1, 1], [], []>} : vector<128x128xbf16>, vector<128x512xbf16>, vector<128x512xf32> -> vector<128x512xf32>
    %c0_15 = arith.constant 0 : index
    %c0_16 = arith.constant 0 : index
    %28 = vector.load %arg7[%c0_15, %c0_16] : memref<1x512xf32, #tpu.memory_space<vmem>>, vector<1x512xf32>
    %29 = vector.broadcast %28 : vector<1x512xf32> to vector<128x512xf32>
    %30 = arith.addf %27, %29 : vector<128x512xf32>
    %cst_17 = arith.constant 0.000000e+00 : f32
    %31 = vector.broadcast %cst_17 : f32 to vector<128x512xf32>
    %32 = arith.maximumf %30, %31 : vector<128x512xf32>
    %33 = arith.truncf %32 : vector<128x512xf32> to vector<128x512xbf16>
    %c0_18 = arith.constant 0 : index
    %c0_19 = arith.constant 0 : index
    %34 = vector.load %arg8[%c0_18, %c0_19] : memref<512x384xbf16, #tpu.memory_space<vmem>>, vector<512x384xbf16>
    %cst_20 = arith.constant dense<0.000000e+00> : vector<128x384xf32>
    %35 = tpu.matmul %33, %34, %cst_20 {dimension_numbers = #tpu.dot_dimension_numbers<[1], [0], [0], [1], [0, 0, 1, 1], [], []>} : vector<128x512xbf16>, vector<512x384xbf16>, vector<128x384xf32> -> vector<128x384xf32>
    %c0_21 = arith.constant 0 : index
    %c0_22 = arith.constant 0 : index
    %36 = vector.load %arg9[%c0_21, %c0_22] : memref<1x384xf32, #tpu.memory_space<vmem>>, vector<1x384xf32>
    %37 = vector.broadcast %36 : vector<1x384xf32> to vector<128x384xf32>
    %38 = arith.addf %35, %37 : vector<128x384xf32>
    %cst_23 = arith.constant 0.000000e+00 : f32
    %39 = vector.broadcast %cst_23 : f32 to vector<128x384xf32>
    %40 = arith.maximumf %38, %39 : vector<128x384xf32>
    %41 = arith.truncf %40 : vector<128x384xf32> to vector<128x384xbf16>
    %c0_24 = arith.constant 0 : index
    %c0_25 = arith.constant 0 : index
    %42 = vector.load %arg10[%c0_24, %c0_25] : memref<384x256xbf16, #tpu.memory_space<vmem>>, vector<384x256xbf16>
    %cst_26 = arith.constant dense<0.000000e+00> : vector<128x256xf32>
    %43 = tpu.matmul %41, %42, %cst_26 {dimension_numbers = #tpu.dot_dimension_numbers<[1], [0], [0], [1], [0, 0, 1, 1], [], []>} : vector<128x384xbf16>, vector<384x256xbf16>, vector<128x256xf32> -> vector<128x256xf32>
    %c0_27 = arith.constant 0 : index
    %c0_28 = arith.constant 0 : index
    %44 = vector.load %arg11[%c0_27, %c0_28] : memref<1x256xf32, #tpu.memory_space<vmem>>, vector<1x256xf32>
    %45 = vector.broadcast %44 : vector<1x256xf32> to vector<128x256xf32>
    %46 = arith.addf %43, %45 : vector<128x256xf32>
    %cst_29 = arith.constant 0.000000e+00 : f32
    %47 = vector.broadcast %cst_29 : f32 to vector<128x256xf32>
    %48 = arith.maximumf %46, %47 : vector<128x256xf32>
    %49 = arith.truncf %48 : vector<128x256xf32> to vector<128x256xbf16>
    %c0_30 = arith.constant 0 : index
    %c0_31 = arith.constant 0 : index
    %50 = vector.load %arg12[%c0_30, %c0_31] : memref<256x128xbf16, #tpu.memory_space<vmem>>, vector<256x128xbf16>
    %cst_32 = arith.constant dense<0.000000e+00> : vector<128x128xf32>
    %51 = tpu.matmul %49, %50, %cst_32 {dimension_numbers = #tpu.dot_dimension_numbers<[1], [0], [0], [1], [0, 0, 1, 1], [], []>} : vector<128x256xbf16>, vector<256x128xbf16>, vector<128x128xf32> -> vector<128x128xf32>
    %c0_33 = arith.constant 0 : index
    %c0_34 = arith.constant 0 : index
    %52 = vector.load %arg13[%c0_33, %c0_34] : memref<1x128xf32, #tpu.memory_space<vmem>>, vector<1x128xf32>
    %53 = vector.broadcast %52 : vector<1x128xf32> to vector<128x128xf32>
    %54 = arith.addf %51, %53 : vector<128x128xf32>
    %cst_35 = arith.constant 0.000000e+00 : f32
    %55 = vector.broadcast %cst_35 : f32 to vector<128x128xf32>
    %56 = arith.maximumf %54, %55 : vector<128x128xf32>
    %c0_36 = arith.constant 0 : index
    %c0_37 = arith.constant 0 : index
    %57 = vector.load %arg14[%c0_36, %c0_37] : memref<1x128xf32, #tpu.memory_space<vmem>>, vector<1x128xf32>
    %58 = vector.broadcast %57 : vector<1x128xf32> to vector<128x128xf32>
    %59 = arith.mulf %56, %58 : vector<128x128xf32>
    %cst_38 = arith.constant dense<0.000000e+00> : vector<128xf32>
    %60 = vector.multi_reduction <add>, %59, %cst_38 [1] : vector<128x128xf32> to vector<128xf32>
    %61 = vector.shape_cast %60 : vector<128xf32> to vector<1x128xf32>
    %c0_39 = arith.constant 0 : index
    %c0_40 = arith.constant 0 : index
    %62 = vector.load %arg15[%c0_39, %c0_40] : memref<1x1xf32, #tpu.memory_space<vmem>>, vector<1x1xf32>
    %63 = vector.broadcast %62 : vector<1x1xf32> to vector<1x128xf32>
    %64 = arith.addf %61, %63 : vector<1x128xf32>
    %c0_41 = arith.constant 0 : index
    %c0_42 = arith.constant 0 : index
    %65 = vector.load %arg16[%c0_41, %c0_42] : memref<1x128xf32, #tpu.memory_space<vmem>>, vector<1x128xf32>
    tpu.vector_store %arg16[%c0_41, %c0_42], %64 {strides = array<i32>} : memref<1x128xf32, #tpu.memory_space<vmem>>, vector<1x128xf32>,
    return
  }
  func.func @transform_0(%arg0: i32) -> (i32, i32) {
    %c0_i32 = arith.constant 0 : i32
    %c0_i32_0 = arith.constant 0 : i32
    return %arg0, %c0_i32 : i32, i32
  }
  func.func @transform_1(%arg0: i32) -> (i32, i32) {
    %c0_i32 = arith.constant 0 : i32
    %c0_i32_0 = arith.constant 0 : i32
    %c0_i32_1 = arith.constant 0 : i32
    return %c0_i32, %c0_i32_0 : i32, i32
  }
  func.func @transform_2(%arg0: i32) -> (i32, i32) {
    %c0_i32 = arith.constant 0 : i32
    %c0_i32_0 = arith.constant 0 : i32
    %c0_i32_1 = arith.constant 0 : i32
    return %c0_i32, %c0_i32_0 : i32, i32
  }
  func.func @transform_3(%arg0: i32) -> (i32, i32) {
    %c0_i32 = arith.constant 0 : i32
    %c0_i32_0 = arith.constant 0 : i32
    %c0_i32_1 = arith.constant 0 : i32
    return %c0_i32, %c0_i32_0 : i32, i32
  }
  func.func @transform_4(%arg0: i32) -> (i32, i32) {
    %c0_i32 = arith.constant 0 : i32
    %c0_i32_0 = arith.constant 0 : i32
    %c0_i32_1 = arith.constant 0 : i32
    return %c0_i32, %c0_i32_0 : i32, i32
  }
  func.func @transform_5(%arg0: i32) -> (i32, i32) {
    %c0_i32 = arith.constant 0 : i32
    %c0_i32_0 = arith.constant 0 : i32
    %c0_i32_1 = arith.constant 0 : i32
    return %c0_i32, %c0_i32_0 : i32, i32
  }
  func.func @transform_6(%arg0: i32) -> (i32, i32) {
    %c0_i32 = arith.constant 0 : i32
    %c0_i32_0 = arith.constant 0 : i32
    %c0_i32_1 = arith.constant 0 : i32
    return %c0_i32, %c0_i32_0 : i32, i32
  }
  func.func @transform_7(%arg0: i32) -> (i32, i32) {
    %c0_i32 = arith.constant 0 : i32
    %c0_i32_0 = arith.constant 0 : i32
    %c0_i32_1 = arith.constant 0 : i32
    return %c0_i32, %c0_i32_0 : i32, i32
  }
  func.func @transform_8(%arg0: i32) -> (i32, i32) {
    %c0_i32 = arith.constant 0 : i32
    %c0_i32_0 = arith.constant 0 : i32
    %c0_i32_1 = arith.constant 0 : i32
    return %c0_i32, %c0_i32_0 : i32, i32
  }
  func.func @transform_9(%arg0: i32) -> (i32, i32) {
    %c0_i32 = arith.constant 0 : i32
    %c0_i32_0 = arith.constant 0 : i32
    %c0_i32_1 = arith.constant 0 : i32
    return %c0_i32, %c0_i32_0 : i32, i32
  }
  func.func @transform_10(%arg0: i32) -> (i32, i32) {
    %c0_i32 = arith.constant 0 : i32
    %c0_i32_0 = arith.constant 0 : i32
    %c0_i32_1 = arith.constant 0 : i32
    return %c0_i32, %c0_i32_0 : i32, i32
  }
  func.func @transform_11(%arg0: i32) -> (i32, i32) {
    %c0_i32 = arith.constant 0 : i32
    %c0_i32_0 = arith.constant 0 : i32
    %c0_i32_1 = arith.constant 0 : i32
    return %c0_i32, %c0_i32_0 : i32, i32
  }
  func.func @transform_12(%arg0: i32) -> (i32, i32) {
    %c0_i32 = arith.constant 0 : i32
    %c0_i32_0 = arith.constant 0 : i32
    %c0_i32_1 = arith.constant 0 : i32
    return %c0_i32, %c0_i32_0 : i32, i32
  }
  func.func @transform_13(%arg0: i32) -> (i32, i32) {
    %c0_i32 = arith.constant 0 : i32
    %c0_i32_0 = arith.constant 0 : i32
    %c0_i32_1 = arith.constant 0 : i32
    return %c0_i32, %c0_i32_0 : i32, i32
  }
  func.func @transform_14(%arg0: i32) -> (i32, i32) {
    %c0_i32 = arith.constant 0 : i32
    %c0_i32_0 = arith.constant 0 : i32
    %c0_i32_1 = arith.constant 0 : i32
    return %c0_i32, %c0_i32_0 : i32, i32
  }
  func.func @transform_15(%arg0: i32) -> (i32, i32) {
    %c0_i32 = arith.constant 0 : i32
    %c0_i32_0 = arith.constant 0 : i32
    return %c0_i32, %arg0 : i32, i32
  }
}

</mosaic_0001>

<bundles_post_ra>
// kernel: tpu_custom_call.1
= control target key start
LH: loop header
LB: loop body
LE: loop exit
PB: predicated region body
PF: predicated region fallthrough
CT: control target
= control target key end

     0   :  { %s5810_s0 = inlined_call_operand.hbm [shape: bf16[128,128], index: 0, kind: input, shape index: {}]   ;;  %s5811_s1 = inlined_call_operand.hbm [shape: bf16[128,256], index: 1, kind: input, shape index: {}]   ;;  %s5812_s2 = inlined_call_operand.vmem [shape: f32[1,256], index: 2, kind: input, shape index: {}]   ;;  %s5813_s3 = inlined_call_operand.hbm [shape: bf16[256,128], index: 3, kind: input, shape index: {}]   ;;  %s5814_s4 = inlined_call_operand.vmem [shape: f32[1,128], index: 4, kind: input, shape index: {}]   ;;  %s5815_s5 = inlined_call_operand.hbm [shape: bf16[128,512], index: 5, kind: input, shape index: {}]   ;;  %s5816_s6 = inlined_call_operand.vmem [shape: f32[1,512], index: 6, kind: input, shape index: {}]   ;;  %s5817_s7 = inlined_call_operand.hbm [shape: bf16[512,384], index: 7, kind: input, shape index: {}]   ;;  %s5818_s8 = inlined_call_operand.vmem [shape: f32[1,384], index: 8, kind: input, shape index: {}]   ;;  %s5819_s9 = inlined_call_operand.hbm [shape: bf16[384,256], index: 9, kind: input, shape index: {}]   ;;  %s5820_s10 = inlined_call_operand.vmem [shape: f32[1,256], index: 10, kind: input, shape index: {}]   ;;  %s5821_s11 = inlined_call_operand.hbm [shape: bf16[256,128], index: 11, kind: input, shape index: {}]   ;;  %s5822_s12 = inlined_call_operand.vmem [shape: f32[1,128], index: 12, kind: input, shape index: {}]   ;;  %s5823_s13 = inlined_call_operand.vmem [shape: f32[1,128], index: 13, kind: input, shape index: {}]   ;;  %s5824_s14 = inlined_call_operand.<no memory space> [shape: f32[1,1], index: 14, kind: input, shape index: {}]   ;;  %s5825_s15 = inlined_call_operand.hbm [shape: f32[1,128], index: 15, kind: output, shape index: {}]  }
   0x1   :  { %v20_v0 = vstv %s5824_s14 }
   0x2   :  { %21 = vst [vmem:[#allocation2] sm:$0x1] %v20_v0 }
   0x3   :  { %22 = vsyncpa [#allocation4], 0 }
   0x4   :  { %23 = vsyncpa [#allocation7], 0 }
   0x5   :  { %24 = vsyncpa [#allocation10], 0 }
   0x6   :  { %25 = vsyncpa [#allocation13], 0 }
   0x7   :  { %26 = vsyncpa [#allocation5], 0  ;;  %s4929_s20 = smov [#allocation6]   ;;  %s4743_s24 = scalar_lea.hbm %s5811_s1, 2048 }
   0x8   :  { %s44_s21 = sshll.u32 %s4929_s20, 4  ;;  %p4744_p0 = scmp.ne.s32.totalorder %s5811_s1, %s4743_s24  ;;  %s45_s21 = int_to_ptr.vmem [resolvable:$true] %s44_s21 }
   0x9   :  { %p4747_p1 = scmp.lt.u32.totalorder %s4743_s24, %s5811_s1 }
   0xb   :  { %p4749_p2 = pnand %p4747_p1, %p4744_p0 }
   0xd   :  { %4752 = shalt.err (!%p4749_p2)
}
   0xe   :  { %s4753_s14 = scalar_lea.vmem %s45_s21, 2048  ;;  %p4758_p4 = scmp.lt.s32.totalorder %s45_s21, %s45_s21 }
   0xf   :  { %p4754_p3 = scmp.ne.s32.totalorder %s45_s21, %s4753_s14  ;;  %p4759_p5 = scmp.lt.s32.totalorder %s4753_s14, %s4753_s14 }
  0x11   :  { %p4760_p6 = por %p4759_p5, %p4758_p4 }
  0x13   :  { %p4761_p7 = pnand %p4760_p6, %p4754_p3 }
  0x15   :  { %4764 = shalt.err (!%p4761_p7)
}
  0x16   :  { %s5826_s29 = smov 128   ;;  %s4931_s30 = smov 8  }
  0x17   :  { %50 = dma.hbm_to_vmem [thread:$0]  %s5811_s1, 2048, %s45_s21, [#allocation7], %s5826_s29, %s5826_s29, %s4931_s30  }
  0x18   :  { %s4932_s18 = smov [#allocation9]   ;;  %s4765_s23 = scalar_lea.hbm %s5815_s5, 4096 }
  0x19   :  { %s72_s19 = sshll.u32 %s4932_s18, 4  ;;  %p4766_p8 = scmp.ne.s32.totalorder %s5815_s5, %s4765_s23  ;;  %s73_s19 = int_to_ptr.vmem [resolvable:$true] %s72_s19 }
  0x1a   :  { %p4769_p9 = scmp.lt.u32.totalorder %s4765_s23, %s5815_s5 }
  0x1c   :  { %p4771_p10 = pnand %p4769_p9, %p4766_p8 }
  0x1e   :  { %4774 = shalt.err (!%p4771_p10)
}
  0x1f   :  { %s4775_s28 = scalar_lea.vmem %s73_s19, 4096  ;;  %p4780_p12 = scmp.lt.s32.totalorder %s73_s19, %s73_s19 }
  0x20   :  { %p4776_p11 = scmp.ne.s32.totalorder %s73_s19, %s4775_s28  ;;  %p4781_p13 = scmp.lt.s32.totalorder %s4775_s28, %s4775_s28 }
  0x22   :  { %p4782_p0 = por %p4781_p13, %p4780_p12 }
  0x24   :  { %p4783_p1 = pnand %p4782_p0, %p4776_p11 }
  0x26   :  { %4786 = shalt.err (!%p4783_p1)
}
  0x27   :  { %s4933_s1 = smov 256   ;;  %s4934_s21 = smov 16  }
  0x28   :  { %78 = dma.hbm_to_vmem [thread:$0]  %s5815_s5, 4096, %s73_s19, [#allocation10], %s4933_s1, %s4933_s1, %s4934_s21  }
  0x29   :  { %s4935_s17 = smov [#allocation12]   ;;  %s4936_s20 = smov [#allocation3]  }
  0x2a   :  { %s100_s18 = sshll.u32 %s4935_s17, 4  ;;  %s32_s22 = sshll.u32 %s4936_s20, 4  ;;  %s101_s18 = int_to_ptr.vmem [resolvable:$true] %s100_s18  ;;  %s5056_s22 = int_to_ptr.vmem [resolvable:$true] %s32_s22 }
  0x2b   :  { %s4787_s25 = scalar_lea.hbm %s5819_s9, 6144 }
  0x2c   :  { %p4788_p2 = scmp.ne.s32.totalorder %s5819_s9, %s4787_s25  ;;  %p4791_p3 = scmp.lt.u32.totalorder %s4787_s25, %s5819_s9 }
  0x2e   :  { %p4793_p4 = pnand %p4791_p3, %p4788_p2 }
  0x30   :  { %4796 = shalt.err (!%p4793_p4)
}
  0x31   :  { %s4797_s5 = scalar_lea.vmem %s101_s18, 6144  ;;  %p4802_p6 = scmp.lt.s32.totalorder %s101_s18, %s101_s18 }
  0x32   :  { %p4798_p5 = scmp.ne.s32.totalorder %s101_s18, %s4797_s5  ;;  %p4803_p7 = scmp.lt.s32.totalorder %s4797_s5, %s4797_s5 }
  0x34   :  { %p4804_p8 = por %p4803_p7, %p4802_p6 }
  0x36   :  { %p4805_p9 = pnand %p4804_p8, %p4798_p5 }
  0x38   :  { %4808 = shalt.err (!%p4805_p9)
}
  0x39   :  { %s5827_s19 = smov 128   ;;  %s4809_s29 = scalar_lea.hbm %s5810_s0, 1024 }
  0x3a   :  { %106 = dma.hbm_to_vmem [thread:$0]  %s5819_s9, 6144, %s101_s18, [#allocation13], %s5827_s19, %s5827_s19, %s4931_s30  }
  0x3b   :  { %p4810_p10 = scmp.ne.s32.totalorder %s5810_s0, %s4809_s29  ;;  %p4813_p11 = scmp.lt.u32.totalorder %s4809_s29, %s5810_s0 }
  0x3d   :  { %p4815_p12 = pnand %p4813_p11, %p4810_p10 }
  0x3f   :  { %4818 = shalt.err (!%p4815_p12)
}
  0x40   :  { %s4819_s25 = scalar_lea.vmem %s5056_s22, 1024  ;;  %p4824_p0 = scmp.lt.s32.totalorder %s5056_s22, %s5056_s22 }
  0x41   :  { %p4820_p13 = scmp.ne.s32.totalorder %s5056_s22, %s4819_s25  ;;  %p4825_p1 = scmp.lt.s32.totalorder %s4819_s25, %s4819_s25 }
  0x43   :  { %p4826_p2 = por %p4825_p1, %p4824_p0 }
  0x45   :  { %p4827_p3 = pnand %p4826_p2, %p4820_p13 }
  0x47   :  { %4830 = shalt.err (!%p4827_p3)
}
  0x48   :  { %s4937_s9 = smov 64   ;;  %s4938_s30 = smov 4  }
  0x49   :  { %38 = dma.hbm_to_vmem [thread:$0]  %s5810_s0, 1024, %s5056_s22, [#allocation4], %s4937_s9, %s4937_s9, %s4938_s30  }
  0x4a   :  { %s4939_s27 = smov [#allocation8]   ;;  %s4940_s5 = smov [#allocation11]  }
  0x4b   :  { %s58_s28 = sshll.u32 %s4939_s27, 4  ;;  %s86_s19 = sshll.u32 %s4940_s5, 4  ;;  %s59_s28 = int_to_ptr.vmem [resolvable:$true] %s58_s28  ;;  %s5093_s19 = int_to_ptr.vmem [resolvable:$true] %s86_s19 }
  0x4c   :  { %s4831_s14 = scalar_lea.hbm %s5813_s3, 2048 }
  0x4d   :  { %p4832_p4 = scmp.ne.s32.totalorder %s5813_s3, %s4831_s14  ;;  %p4835_p5 = scmp.lt.u32.totalorder %s4831_s14, %s5813_s3 }
  0x4f   :  { %p4837_p6 = pnand %p4835_p5, %p4832_p4 }
  0x51   :  { %4840 = shalt.err (!%p4837_p6)
}
  0x52   :  { %s4841_s0 = scalar_lea.vmem %s59_s28, 2048  ;;  %p4846_p8 = scmp.lt.s32.totalorder %s59_s28, %s59_s28 }
  0x53   :  { %p4842_p7 = scmp.ne.s32.totalorder %s59_s28, %s4841_s0  ;;  %p4847_p9 = scmp.lt.s32.totalorder %s4841_s0, %s4841_s0 }
  0x55   :  { %p4848_p10 = por %p4847_p9, %p4846_p8 }
  0x57   :  { %p4849_p11 = pnand %p4848_p10, %p4842_p7 }
  0x59   :  { %4852 = shalt.err (!%p4849_p11)
}
  0x5a   :  { %64 = dma.hbm_to_vmem [thread:$0]  %s5813_s3, 2048, %s59_s28, [#allocation7], %s4937_s9, %s4937_s9, %s4938_s30  }
  0x5b   :  { %s4853_s18 = scalar_lea.hbm %s5817_s7, 12288 }
  0x5c   :  { %p4854_p12 = scmp.ne.s32.totalorder %s5817_s7, %s4853_s18  ;;  %p4857_p13 = scmp.lt.u32.totalorder %s4853_s18, %s5817_s7 }
  0x5e   :  { %p4859_p0 = pnand %p4857_p13, %p4854_p12 }
  0x60   :  { %4862 = shalt.err (!%p4859_p0)
}
  0x61   :  { %s4863_s21 = scalar_lea.vmem %s5093_s19, 12288  ;;  %p4868_p2 = scmp.lt.s32.totalorder %s5093_s19, %s5093_s19 }
  0x62   :  { %p4864_p1 = scmp.ne.s32.totalorder %s5093_s19, %s4863_s21  ;;  %p4869_p3 = scmp.lt.s32.totalorder %s4863_s21, %s4863_s21 }
  0x64   :  { %p4870_p4 = por %p4869_p3, %p4868_p2 }
  0x66   :  { %p4871_p5 = pnand %p4870_p4, %p4864_p1 }
  0x68   :  { %4874 = shalt.err (!%p4871_p5)
}
  0x69   :  { %s4941_s3 = smov 192   ;;  %s4942_s28 = smov 12  }
  0x6a   :  { %92 = dma.hbm_to_vmem [thread:$0]  %s5817_s7, 12288, %s5093_s19, [#allocation10], %s4941_s3, %s4941_s3, %s4942_s28  }
  0x6b   :  { %s4943_s29 = smov [#allocation14]   ;;  %s4875_s22 = scalar_lea.hbm %s5821_s11, 2048 }
  0x6c   :  { %s114_s17 = sshll.u32 %s4943_s29, 4  ;;  %p4876_p6 = scmp.ne.s32.totalorder %s5821_s11, %s4875_s22  ;;  %s115_s17 = int_to_ptr.vmem [resolvable:$true] %s114_s17 }
  0x6d   :  { %p4879_p7 = scmp.lt.u32.totalorder %s4875_s22, %s5821_s11 }
  0x6f   :  { %p4881_p8 = pnand %p4879_p7, %p4876_p6 }
  0x71   :  { %4884 = shalt.err (!%p4881_p8)
}
  0x72   :  { %s4885_s26 = scalar_lea.vmem %s115_s17, 2048  ;;  %p4890_p10 = scmp.lt.s32.totalorder %s115_s17, %s115_s17 }
  0x73   :  { %p4886_p9 = scmp.ne.s32.totalorder %s115_s17, %s4885_s26  ;;  %p4891_p11 = scmp.lt.s32.totalorder %s4885_s26, %s4885_s26 }
  0x75   :  { %p4892_p12 = por %p4891_p11, %p4890_p10 }
  0x77   :  { %p4893_p13 = pnand %p4892_p12, %p4886_p9 }
  0x79   :  { %4896 = shalt.err (!%p4893_p13)
}
  0x7a   :  { %120 = dma.hbm_to_vmem [thread:$0]  %s5821_s11, 2048, %s115_s17, [#allocation13], %s4937_s9, %s4937_s9, %s4938_s30  }
  0x7b   :  { %4919 = dma.done.wait [#allocation4], 1024  }
  0x7c   :  { %4920 = vsyncadd [#allocation4], 4294966272 }
  0x7d   :  { %4921 = dma.done.wait [#allocation7], 4096  }
  0x7e   :  { %4922 = vsyncadd [#allocation7], 4294963200 }
  0x7f   :  { %4923 = dma.done.wait [#allocation10], 16384  }
  0x80   :  { %4924 = vsyncadd [#allocation10], 4294950912 }
  0x81   :  { %4925 = dma.done.wait [#allocation13], 8192  }
  0x82   :  { %4926 = vsyncadd [#allocation13], 4294959104  ;;  %v4944_v1 = vmov 0   ;;  %v4287_v2 = vld [vmem:[#allocation6 + $0x4] ss:$8 sps:$4 sm:$0xff]   ;;  %v4323_v26 = vld [vmem:[#allocation8 + $0x50] sm:$0xff]   ;;  %v183_v42 = vlaneseq }
  0x83   :  { %353 = vmatprep.mubr.bf16.mxu0 %v4944_v1  ;;  %393 = vmatprep.mubr.bf16.mxu1 %v4944_v1  ;;  %v4289_v3 = vld [vmem:[#allocation6] ss:$8 sps:$4 sm:$0xff]   ;;  %v4290_v4 = vld [vmem:[#allocation6 + $0x14] ss:$8 sps:$4 sm:$0xff]   ;;  %v4292_v5 = vld [vmem:[#allocation6 + $0x10] ss:$8 sps:$4 sm:$0xff]  }
  0x84   :  { %4285 = vset.pattern.permute.xlu1 %v4944_v1  ;;  %4286 = vset.pattern.permute.xlu0 %v4944_v1  ;;  %v4293_v6 = vld [vmem:[#allocation6 + $0x24] ss:$8 sps:$4 sm:$0xff]   ;;  %v4295_v7 = vld [vmem:[#allocation6 + $0x20] ss:$8 sps:$4 sm:$0xff]   ;;  %v4296_v8 = vld [vmem:[#allocation6 + $0x34] ss:$8 sps:$4 sm:$0xff]  }
  0x85   :  { %321 = vmatprep.subr.bf16.mxu0 %v4287_v2  ;;  %4124 = vmatprep.subr.bf16.mxu1 %v4287_v2  ;;  %v4298_v9 = vld [vmem:[#allocation6 + $0x30] ss:$8 sps:$4 sm:$0xff]   ;;  %v4299_v10 = vld [vmem:[#allocation6 + $0x44] ss:$8 sps:$4 sm:$0xff]   ;;  %v4301_v11 = vld [vmem:[#allocation6 + $0x40] ss:$8 sps:$4 sm:$0xff]  }
  0x86   :  { %322 = vmatpush1.bf16.msra.mxu0 %v4289_v3  ;;  %4132 = vmatpush1.bf16.msra.mxu1 %v4289_v3  ;;  %v4302_v12 = vld [vmem:[#allocation6 + $0x54] ss:$8 sps:$4 sm:$0xff]   ;;  %v4304_v13 = vld [vmem:[#allocation6 + $0x50] ss:$8 sps:$4 sm:$0xff]   ;;  %v4305_v14 = vld [vmem:[#allocation6 + $0x64] ss:$8 sps:$4 sm:$0xff]  }
  0x87   :  { %323 = vmatprep.subr.bf16.mxu0 %v4290_v4  ;;  %4125 = vmatprep.subr.bf16.mxu1 %v4290_v4  ;;  %v4307_v15 = vld [vmem:[#allocation6 + $0x60] ss:$8 sps:$4 sm:$0xff]   ;;  %v4308_v16 = vld [vmem:[#allocation6 + $0x74] ss:$8 sps:$4 sm:$0xff]   ;;  %v4310_v17 = vld [vmem:[#allocation6 + $0x70] ss:$8 sps:$4 sm:$0xff]  }
  0x88   :  { %v149_v18 = vld [vmem:[#allocation3] sm:$0xff]   ;;  %v4321_v22 = vld [vmem:[#allocation8 + $0x48] sm:$0xff]   ;;  %v4324_v27 = vld [vmem:[#allocation8 + $0x10] sm:$0xff]   ;;  %v5154_v43 = vshrl.u32 %v183_v42, 7  ;;  %vm3513_vm0 = vcmask 130112   ;;  %vm3520_vm1 = vcmask 195712  }
  0x89   :  { %v157_v19 = vld [vmem:[#allocation3 + $0x20] sm:$0xff]   ;;  %v151_v23 = vld [vmem:[#allocation3 + $0x8] sm:$0xff]   ;;  %v4325_v28 = vld [vmem:[#allocation8 + $0x58] sm:$0xff]   ;;  %vm3527_vm2 = vcmask 261312   ;;  %vm3534_vm3 = vcmask 326912   ;;  %vm3541_vm4 = vcmask 392512  }
  0x8a   :  { %324 = vmatpush1.bf16.msra.mxu0 %v4292_v5  ;;  %4133 = vmatpush1.bf16.msra.mxu1 %v4292_v5  ;;  %v4319_v20 = vld [vmem:[#allocation8 + $0x40] sm:$0xff]   ;;  %v159_v24 = vld [vmem:[#allocation3 + $0x28] sm:$0xff]   ;;  %v153_v29 = vld [vmem:[#allocation3 + $0x10] sm:$0xff]   ;;  %v5157_v44 = vsub.s32 0, %v5154_v43  ;;  %v5163_v46 = vsub.s32 1, %v5154_v43  ;;  %vm3548_vm5 = vcmask 458112  }
  0x8b   :  { %325 = vmatprep.subr.bf16.mxu0 %v4293_v6  ;;  %4126 = vmatprep.subr.bf16.mxu1 %v4293_v6  ;;  %v4320_v21 = vld [vmem:[#allocation8] sm:$0xff]   ;;  %v4322_v25 = vld [vmem:[#allocation8 + $0x8] sm:$0xff]   ;;  %v161_v30 = vld [vmem:[#allocation3 + $0x30] sm:$0xff]   ;;  %vm3555_vm6 = vcmask 523712   ;;  %vm3562_vm7 = vcmask 589312   ;;  %vm3569_vm8 = vcmask 654912  }
  0x8c   :  { %v155_v31 = vld [vmem:[#allocation3 + $0x18] sm:$0xff]   ;;  %v4327_v34 = vld [vmem:[#allocation8 + $0x60] sm:$0xff]   ;;  %v4329_v36 = vld [vmem:[#allocation8 + $0x68] sm:$0xff]   ;;  %vm3576_vm9 = vcmask 720512   ;;  %vm3583_vm10 = vcmask 786112   ;;  %vm3590_vm11 = vcmask 851712  }
  0x8d   :  { %v163_v32 = vld [vmem:[#allocation3 + $0x38] sm:$0xff]   ;;  %v4328_v35 = vld [vmem:[#allocation8 + $0x20] sm:$0xff]   ;;  %v4330_v37 = vld [vmem:[#allocation8 + $0x28] sm:$0xff]   ;;  %vm3597_vm12 = vcmask 917312   ;;  %vm3604_vm13 = vcmask 982912   ;;  %vm3611_vm14 = vcmask 1048512  }
  0x8e   :  { %326 = vmatpush1.bf16.msra.mxu0 %v4295_v7  ;;  %4134 = vmatpush1.bf16.msra.mxu1 %v4295_v7  ;;  %v4326_v33 = vld [vmem:[#allocation8 + $0x18] sm:$0xff]   ;;  %v4331_v38 = vld [vmem:[#allocation8 + $0x70] sm:$0xff]  }
  0x8f   :  { %327 = vmatprep.subr.bf16.mxu0 %v4296_v8  ;;  %4127 = vmatprep.subr.bf16.mxu1 %v4296_v8  ;;  %v4332_v39 = vld [vmem:[#allocation8 + $0x30] sm:$0xff]   ;;  %v4333_v40 = vld [vmem:[#allocation8 + $0x78] sm:$0xff]  }
  0x90   :  { %v4334_v41 = vld [vmem:[#allocation8 + $0x38] sm:$0xff]  }
  0x91   :  { %v181_v45 = vld [vmem:[%s5812_s2] sm:$0x3] }
  0x92   :  { %328 = vmatpush1.bf16.msra.mxu0 %v4298_v9  ;;  %4135 = vmatpush1.bf16.msra.mxu1 %v4298_v9  ;;  %v5166_v47 = vrot.slane %v181_v45, %v5157_v44  ;;  %v5169_v48 = vrot.slane %v181_v45, %v5163_v46 }
  0x93   :  { %329 = vmatprep.subr.bf16.mxu0 %v4299_v10  ;;  %4128 = vmatprep.subr.bf16.mxu1 %v4299_v10 }
  0x96   :  { %330 = vmatpush1.bf16.msra.mxu0 %v4301_v11  ;;  %4136 = vmatpush1.bf16.msra.mxu1 %v4301_v11 }
  0x97   :  { %331 = vmatprep.subr.bf16.mxu0 %v4302_v12  ;;  %4129 = vmatprep.subr.bf16.mxu1 %v4302_v12 }
  0x9a   :  { %332 = vmatpush1.bf16.msra.mxu0 %v4304_v13  ;;  %4137 = vmatpush1.bf16.msra.mxu1 %v4304_v13 }
  0x9b   :  { %333 = vmatprep.subr.bf16.mxu0 %v4305_v14  ;;  %4130 = vmatprep.subr.bf16.mxu1 %v4305_v14 }
  0x9e   :  { %334 = vmatpush1.bf16.msra.mxu0 %v4307_v15  ;;  %4138 = vmatpush1.bf16.msra.mxu1 %v4307_v15 }
  0x9f   :  { %335 = vmatprep.subr.bf16.mxu0 %v4308_v16  ;;  %4131 = vmatprep.subr.bf16.mxu1 %v4308_v16 }
  0xa2   :  { %336 = vmatpush1.bf16.msra.mxu0 %v4310_v17  ;;  %4139 = vmatpush1.bf16.msra.mxu1 %v4310_v17 }
  0xa3   :  { %3868 = vmatprep.subr.bf16.mxu1 %v4319_v20 }
  0xa5   :  { %354 = vmatmul.mubr.bf16.vlgmr.msra.gmra.mrb[0].mxu0 %v149_v18  ;;  %394 = vmatmul.mubr.bf16.vlgmr.msra.gmra.mrb[0].mxu1 %v157_v19 }
  0xa6   :  { %363 = vmatprep.mubr.bf16.mxu0 %v4944_v1  ;;  %403 = vmatprep.mubr.bf16.mxu1 %v4944_v1 }
  0xa7   :  { %3869 = vmatpush3.bf16.msra.mxu1 %v4320_v21 }
  0xa8   :  { %3870 = vmatprep.subr.bf16.mxu1 %v4321_v22 }
  0xab   :  { %3871 = vmatpush3.bf16.msra.mxu1 %v4322_v25 }
  0xac   :  { %3872 = vmatprep.subr.bf16.mxu1 %v4323_v26 }
  0xad   :  { %364 = vmatmul.mubr.bf16.gmra.mrb[4].mxu0 %v151_v23  ;;  %404 = vmatmul.mubr.bf16.gmra.mrb[4].mxu1 %v159_v24 }
  0xae   :  { %373 = vmatprep.mubr.bf16.mxu0 %v4944_v1  ;;  %413 = vmatprep.mubr.bf16.mxu1 %v4944_v1 }
  0xaf   :  { %3873 = vmatpush3.bf16.msra.mxu1 %v4324_v27 }
  0xb0   :  { %3874 = vmatprep.subr.bf16.mxu1 %v4325_v28 }
  0xb3   :  { %3875 = vmatpush3.bf16.msra.mxu1 %v4326_v33 }
  0xb4   :  { %3876 = vmatprep.subr.bf16.mxu1 %v4327_v34 }
  0xb5   :  { %374 = vmatmul.mubr.bf16.gmra.mrb[8].mxu0 %v153_v29  ;;  %414 = vmatmul.mubr.bf16.gmra.mrb[8].mxu1 %v161_v30 }
  0xb6   :  { %383 = vmatprep.mubr.bf16.mxu0 %v4944_v1  ;;  %423 = vmatprep.mubr.bf16.mxu1 %v4944_v1 }
  0xb7   :  { %3877 = vmatpush3.bf16.msra.mxu1 %v4328_v35 }
  0xb8   :  { %3878 = vmatprep.subr.bf16.mxu1 %v4329_v36 }
  0xbb   :  { %3879 = vmatpush3.bf16.msra.mxu1 %v4330_v37 }
  0xbc   :  { %3880 = vmatprep.subr.bf16.mxu1 %v4331_v38 }
  0xbd   :  { %384 = vmatmul.mubr.bf16.gmra.mrb[12].mxu0 %v155_v31  ;;  %424 = vmatmul.mubr.bf16.gmra.mrb[12].mxu1 %v163_v32 }
  0xbe   :  { %1144 = vmatprep.mubr.bf16.mxu0 %v4944_v1 }
  0xbf   :  { %3881 = vmatpush3.bf16.msra.mxu1 %v4332_v39 }
  0xc0   :  { %3882 = vmatprep.subr.bf16.mxu1 %v4333_v40 }
  0xc3   :  { %3883 = vmatpush3.bf16.msra.mxu1 %v4334_v41 }
 0x178   :  { %v355_v49 = vpop.f32.mrb[0].mxu0  ;;  %v395_v50 = vpop.f32.mrb[0].mxu1 }
 0x179   :  { %v356_v51 = vadd.f32 %v355_v49, %v5166_v47  ;;  %v357_v52 = vpop.f32.mrb[1].mxu0  ;;  %v397_v53 = vpop.f32.mrb[1].mxu1  ;;  %v396_v59 = vadd.f32 %v395_v50, %v5166_v47 }
 0x17a   :  { %v358_v54 = vadd.f32 %v357_v52, %v5169_v48  ;;  %v359_v55 = vpop.f32.mrb[2].mxu0  ;;  %v399_v56 = vpop.f32.mrb[2].mxu1  ;;  %v398_v62 = vadd.f32 %v397_v53, %v5169_v48 }
 0x17b   :  { %4607 = vtanh.f32 %v356_v51  ;;  %v360_v57 = vadd.f32 %v359_v55, %v5166_v47  ;;  %v361_v58 = vpop.f32.mrb[3].mxu0  ;;  %v401_v60 = vpop.f32.mrb[3].mxu1  ;;  %v400_v63 = vadd.f32 %v399_v56, %v5166_v47 }
 0x17c   :  { %4609 = vtanh.f32 %v358_v54  ;;  %v362_v61 = vadd.f32 %v361_v58, %v5169_v48  ;;  %v402_v0 = vadd.f32 %v401_v60, %v5169_v48 }
 0x17d   :  { %4611 = vtanh.f32 %v360_v57 }
 0x17e   :  { %4613 = vtanh.f32 %v362_v61 }
 0x17f   :  { %4615 = vtanh.f32 %v396_v59 }
 0x180   :  { %v365_v2 = vpop.f32.mrb[4].mxu0  ;;  %4617 = vtanh.f32 %v398_v62  ;;  %v405_v3 = vpop.f32.mrb[4].mxu1 }
 0x181   :  { %v366_v4 = vadd.f32 %v365_v2, %v5166_v47  ;;  %v367_v5 = vpop.f32.mrb[5].mxu0  ;;  %4619 = vtanh.f32 %v400_v63  ;;  %v407_v6 = vpop.f32.mrb[5].mxu1  ;;  %v406_v12 = vadd.f32 %v405_v3, %v5166_v47 }
 0x182   :  { %v368_v7 = vadd.f32 %v367_v5, %v5169_v48  ;;  %v369_v8 = vpop.f32.mrb[6].mxu0  ;;  %4621 = vtanh.f32 %v402_v0  ;;  %v409_v9 = vpop.f32.mrb[6].mxu1  ;;  %v408_v15 = vadd.f32 %v407_v6, %v5169_v48 }
 0x183   :  { %4623 = vtanh.f32 %v366_v4  ;;  %v370_v10 = vadd.f32 %v369_v8, %v5166_v47  ;;  %v371_v11 = vpop.f32.mrb[7].mxu0  ;;  %v411_v13 = vpop.f32.mrb[7].mxu1  ;;  %v410_v17 = vadd.f32 %v409_v9, %v5166_v47 }
 0x184   :  { %4625 = vtanh.f32 %v368_v7  ;;  %v372_v14 = vadd.f32 %v371_v11, %v5169_v48  ;;  %v412_v19 = vadd.f32 %v411_v13, %v5169_v48 }
 0x185   :  { %v4608_v16 = vpop.eup %4607  ;;  %4627 = vtanh.f32 %v370_v10 }
 0x186   :  { %v4610_v18 = vpop.eup %4609  ;;  %4629 = vtanh.f32 %v372_v14 }
 0x187   :  { %v4612_v20 = vpop.eup %4611  ;;  %4631 = vtanh.f32 %v406_v12 }
 0x188   :  { %v4614_v21 = vpop.eup %4613  ;;  %v375_v22 = vpop.f32.mrb[8].mxu0  ;;  %v466_v23 = vpack.c.bf16 %v4612_v20, %v4608_v16  ;;  %4633 = vtanh.f32 %v408_v15 }
 0x189   :  { %v415_v24 = vpop.f32.mrb[8].mxu1  ;;  %v5187_v25 = vpop.eup %4615  ;;  %v376_v26 = vadd.f32 %v375_v22, %v5166_v47  ;;  %v467_v28 = vpack.c.bf16 %v4614_v21, %v4610_v18  ;;  %4635 = vtanh.f32 %v410_v17 }
 0x18a   :  { %v377_v27 = vpop.f32.mrb[9].mxu0  ;;  %v417_v29 = vpop.f32.mrb[9].mxu1  ;;  %4637 = vtanh.f32 %v412_v19  ;;  %v416_v37 = vadd.f32 %v415_v24, %v5166_v47 }
 0x18b   :  { %v5190_v30 = vpop.eup %4617  ;;  %v378_v31 = vadd.f32 %v377_v27, %v5169_v48  ;;  %v379_v32 = vpop.f32.mrb[10].mxu0  ;;  %4639 = vtanh.f32 %v376_v26  ;;  %649 = vmatprep.mubr.bf16.mxu1 %v467_v28  ;;  %v418_v41 = vadd.f32 %v417_v29, %v5169_v48 }
 0x18c   :  { %v419_v33 = vpop.f32.mrb[10].mxu1  ;;  %v5193_v34 = vpop.eup %4619  ;;  %v380_v35 = vadd.f32 %v379_v32, %v5166_v47  ;;  %650 = vmatmul.mubr.bf16.vlgmr.msra.gmra.mrb[16].mxu1 %v466_v23 }
 0x18d   :  { %v381_v36 = vpop.f32.mrb[11].mxu0  ;;  %v421_v38 = vpop.f32.mrb[11].mxu1  ;;  %4641 = vtanh.f32 %v378_v31  ;;  %v474_v45 = vpack.c.bf16 %v5193_v34, %v5187_v25  ;;  %v420_v50 = vadd.f32 %v419_v33, %v5166_v47 }
 0x18e   :  { %v5197_v39 = vpop.eup %4621  ;;  %v382_v40 = vadd.f32 %v381_v36, %v5169_v48  ;;  %4643 = vtanh.f32 %v380_v35  ;;  %v422_v53 = vadd.f32 %v421_v38, %v5169_v48 }
 0x18f   :  { %v4624_v49 = vpop.eup %4623  ;;  %v475_v51 = vpack.c.bf16 %v5197_v39, %v5190_v30  ;;  %v5228_v30 = vld [vmem:[%s5814_s4] ss:$0 sm:$0xff] }
 0x190   :  { %v4626_v52 = vpop.eup %4625  ;;  %4645 = vtanh.f32 %v382_v40  ;;  %v385_v56 = vpop.f32.mrb[12].mxu0 }
 0x191   :  { %v4628_v54 = vpop.eup %4627  ;;  %4647 = vtanh.f32 %v416_v37  ;;  %v425_v58 = vpop.f32.mrb[12].mxu1  ;;  %v386_v60 = vadd.f32 %v385_v56, %v5166_v47 }
 0x192   :  { %v4630_v55 = vpop.eup %4629  ;;  %v468_v57 = vpack.c.bf16 %v4628_v54, %v4624_v49  ;;  %4649 = vtanh.f32 %v418_v41  ;;  %v387_v61 = vpop.f32.mrb[13].mxu0  ;;  %v426_v8 = vadd.f32 %v425_v58, %v5166_v47 }
 0x193   :  { %v5207_v59 = vpop.eup %4631  ;;  %v469_v62 = vpack.c.bf16 %v4630_v55, %v4626_v52  ;;  %4651 = vtanh.f32 %v420_v50  ;;  %v427_v63 = vpop.f32.mrb[13].mxu1  ;;  %v388_v2 = vadd.f32 %v387_v61, %v5169_v48 }
 0x194   :  { %v4634_v0 = vpop.eup %4633  ;;  %v389_v3 = vpop.f32.mrb[14].mxu0  ;;  %4653 = vtanh.f32 %v422_v53  ;;  %v428_v12 = vadd.f32 %v427_v63, %v5169_v48 }
 0x195   :  { %v429_v4 = vpop.f32.mrb[14].mxu1  ;;  %v4636_v5 = vpop.eup %4635  ;;  %4655 = vtanh.f32 %v386_v60  ;;  %v390_v6 = vadd.f32 %v389_v3, %v5166_v47  ;;  %657 = vmatprep.mubr.bf16.mxu1 %v469_v62 }
 0x196   :  { %v391_v7 = vpop.f32.mrb[15].mxu0  ;;  %v431_v9 = vpop.f32.mrb[15].mxu1  ;;  %4657 = vtanh.f32 %v388_v2  ;;  %658 = vmatmul.mubr.bf16.gmra.mrb[20].mxu1 %v468_v57  ;;  %v476_v13 = vpack.c.bf16 %v4636_v5, %v5207_v59  ;;  %v430_v15 = vadd.f32 %v429_v4, %v5166_v47 }
 0x197   :  { %v4638_v10 = vpop.eup %4637  ;;  %v392_v11 = vadd.f32 %v391_v7, %v5169_v48  ;;  %4659 = vtanh.f32 %v390_v6  ;;  %v432_v18 = vadd.f32 %v431_v9, %v5169_v48 }
 0x198   :  { %v4640_v14 = vpop.eup %4639  ;;  %v477_v16 = vpack.c.bf16 %v4638_v10, %v4634_v0 }
 0x199   :  { %v4642_v17 = vpop.eup %4641  ;;  %4661 = vtanh.f32 %v392_v11 }
 0x19a   :  { %v4644_v19 = vpop.eup %4643  ;;  %4663 = vtanh.f32 %v426_v8 }
 0x19b   :  { %v4646_v20 = vpop.eup %4645  ;;  %v470_v21 = vpack.c.bf16 %v4644_v19, %v4640_v14  ;;  %4665 = vtanh.f32 %v428_v12 }
 0x19c   :  { %v4648_v22 = vpop.eup %4647  ;;  %v471_v23 = vpack.c.bf16 %v4646_v20, %v4642_v17  ;;  %4667 = vtanh.f32 %v430_v15 }
 0x19d   :  { %v4650_v24 = vpop.eup %4649  ;;  %4669 = vtanh.f32 %v432_v18 }
 0x19e   :  { %v4652_v26 = vpop.eup %4651  ;;  %665 = vmatprep.mubr.bf16.mxu1 %v471_v23 }
 0x19f   :  { %v4654_v27 = vpop.eup %4653  ;;  %666 = vmatmul.mubr.bf16.gmra.mrb[24].mxu1 %v470_v21  ;;  %v478_v47 = vpack.c.bf16 %v4652_v26, %v4648_v22 }
 0x1a0   :  { %v4656_v28 = vpop.eup %4655  ;;  %v479_v29 = vpack.c.bf16 %v4654_v27, %v4650_v24 }
 0x1a1   :  { %v4658_v31 = vpop.eup %4657 }
 0x1a2   :  { %v4660_v32 = vpop.eup %4659 }
 0x1a3   :  { %v4662_v48 = vpop.eup %4661  ;;  %v472_v33 = vpack.c.bf16 %v4660_v32, %v4656_v28 }
 0x1a4   :  { %v4664_v35 = vpop.eup %4663  ;;  %v473_v36 = vpack.c.bf16 %v4662_v48, %v4658_v31 }
 0x1a5   :  { %v4666_v37 = vpop.eup %4665 }
 0x1a6   :  { %v4668_v38 = vpop.eup %4667  ;;  %673 = vmatprep.mubr.bf16.mxu1 %v473_v36 }
 0x1a7   :  { %v4670_v40 = vpop.eup %4669  ;;  %674 = vmatmul.mubr.bf16.gmra.mrb[28].mxu1 %v472_v33  ;;  %v480_v41 = vpack.c.bf16 %v4668_v38, %v4664_v35 }
 0x1a8   :  { %681 = vmatprep.mubr.bf16.mxu1 %v475_v51  ;;  %v481_v49 = vpack.c.bf16 %v4670_v40, %v4666_v37 }
 0x1af   :  { %682 = vmatmul.mubr.bf16.gmra.mrb[32].mxu1 %v474_v45 }
 0x1b0   :  { %689 = vmatprep.mubr.bf16.mxu1 %v477_v16 }
 0x1b7   :  { %690 = vmatmul.mubr.bf16.gmra.mrb[36].mxu1 %v476_v13 }
 0x1b8   :  { %697 = vmatprep.mubr.bf16.mxu1 %v479_v29 }
 0x1bf   :  { %698 = vmatmul.mubr.bf16.gmra.mrb[40].mxu1 %v478_v47 }
 0x1c0   :  { %705 = vmatprep.mubr.bf16.mxu1 %v481_v49 }
 0x1c7   :  { %706 = vmatmul.mubr.bf16.gmra.mrb[44].mxu1 %v480_v41 }
 0x1c8   :  { %1257 = vmatprep.mubr.bf16.mxu1 %v4944_v1 }
 0x25f   :  { %v3884_v50 = vpop.f32.mrb[16].mxu1 }
 0x260   :  { %v3885_v52 = vpop.f32.mrb[17].mxu1 }
 0x261   :  { %v3886_v39 = vadd.f32 %v3885_v52, %v3884_v50  ;;  %v3887_v51 = vpop.f32.mrb[18].mxu1 }
 0x262   :  { %v3888_v53 = vpop.f32.mrb[19].mxu1 }
 0x263   :  { %v3889_v25 = vadd.f32 %v3888_v53, %v3887_v51  ;;  %v5231_v34 = vadd.f32 %v3886_v39, %v5228_v30 }
 0x265   :  { %714 = vmax.xlane.f32.xlu0 %v5231_v34  ;;  %v5235_v54 = vadd.f32 %v3889_v25, %v5228_v30 }
 0x269   :  { %v3890_v45 = vpop.f32.mrb[20].mxu1  ;;  %716 = vmax.xlane.f32.xlu0 %v5235_v54 }
 0x26a   :  { %v3891_v55 = vpop.f32.mrb[21].mxu1 }
 0x26b   :  { %v3892_v56 = vadd.f32 %v3891_v55, %v3890_v45  ;;  %v3893_v57 = vpop.f32.mrb[22].mxu1  ;;  %v4335_v45 = vld [vmem:[#allocation9] ss:$16 sps:$4 sm:$0xff]   ;;  %v4337_v55 = vld [vmem:[#allocation9 + $0x4] ss:$16 sps:$4 sm:$0xff]  }
 0x26c   :  { %v3894_v58 = vpop.f32.mrb[23].mxu1  ;;  %1112 = vmatprep.subr.bf16.mxu0 %v4337_v55  ;;  %v4362_v55 = vld [vmem:[#allocation9 + $0x88] ss:$16 sps:$4 sm:$0xff]  }
 0x26d   :  { %v3895_v59 = vadd.f32 %v3894_v58, %v3893_v57  ;;  %v5239_v60 = vadd.f32 %v3892_v56, %v5228_v30  ;;  %v4338_v56 = vld [vmem:[#allocation9 + $0x8] ss:$16 sps:$4 sm:$0xff]   ;;  %v4340_v57 = vld [vmem:[#allocation9 + $0xc] ss:$16 sps:$4 sm:$0xff]   ;;  %v4343_v58 = vld [vmem:[#allocation9 + $0x24] ss:$16 sps:$4 sm:$0xff]   ;;  %1113 = vmatpush1.bf16.msra.mxu0 %v4335_v45 }
 0x26e   :  { %1225 = vmatprep.subr.bf16.mxu1 %v4340_v57  ;;  %1114 = vmatprep.subr.bf16.mxu0 %v4343_v58  ;;  %v4359_v45 = vld [vmem:[#allocation9 + $0x80] ss:$16 sps:$4 sm:$0xff]  }
 0x26f   :  { %718 = vmax.xlane.f32.xlu1 %v5239_v60  ;;  %v5243_v62 = vadd.f32 %v3895_v59, %v5228_v30  ;;  %v4346_v59 = vld [vmem:[#allocation9 + $0x2c] ss:$16 sps:$4 sm:$0xff]   ;;  %1226 = vmatpush1.bf16.msra.mxu1 %v4338_v56 }
 0x270   :  { %1227 = vmatprep.subr.bf16.mxu1 %v4346_v59  ;;  %v4367_v59 = vld [vmem:[#allocation9 + $0xa4] ss:$16 sps:$4 sm:$0xff]  }
 0x272   :  { %v3896_v61 = vpop.f32.mrb[24].mxu1 }
 0x273   :  { %v3897_v63 = vpop.f32.mrb[25].mxu1  ;;  %720 = vmax.xlane.f32.xlu1 %v5243_v62 }
 0x274   :  { %v3898_v0 = vadd.f32 %v3897_v63, %v3896_v61  ;;  %v3899_v2 = vpop.f32.mrb[26].mxu1  ;;  %v4341_v61 = vld [vmem:[#allocation9 + $0x20] ss:$16 sps:$4 sm:$0xff]   ;;  %v4344_v63 = vld [vmem:[#allocation9 + $0x28] ss:$16 sps:$4 sm:$0xff]  }
 0x275   :  { %v3900_v3 = vpop.f32.mrb[27].mxu1  ;;  %1115 = vmatpush1.bf16.msra.mxu0 %v4341_v61  ;;  %1228 = vmatpush1.bf16.msra.mxu1 %v4344_v63  ;;  %v4370_v61 = vld [vmem:[#allocation9 + $0xac] ss:$16 sps:$4 sm:$0xff]   ;;  %v4368_v63 = vld [vmem:[#allocation9 + $0xa8] ss:$16 sps:$4 sm:$0xff]  }
 0x276   :  { %v3901_v4 = vadd.f32 %v3900_v3, %v3899_v2  ;;  %v5247_v5 = vadd.f32 %v3898_v0, %v5228_v30  ;;  %v4349_v0 = vld [vmem:[#allocation9 + $0x44] ss:$16 sps:$4 sm:$0xff]   ;;  %v4352_v2 = vld [vmem:[#allocation9 + $0x4c] ss:$16 sps:$4 sm:$0xff]   ;;  %v4350_v3 = vld [vmem:[#allocation9 + $0x48] ss:$16 sps:$4 sm:$0xff]  }
 0x277   :  { %1116 = vmatprep.subr.bf16.mxu0 %v4349_v0  ;;  %1229 = vmatprep.subr.bf16.mxu1 %v4352_v2 }
 0x278   :  { %722 = vmax.xlane.f32.xlu0 %v5247_v5  ;;  %v5251_v6 = vadd.f32 %v3901_v4, %v5228_v30 }
 0x279   :  { %1230 = vmatpush1.bf16.msra.mxu1 %v4350_v3  ;;  %v4373_v3 = vld [vmem:[#allocation9 + $0xc4] ss:$16 sps:$4 sm:$0xff]  }
 0x27a   :  { %v3902_v7 = vpop.f32.mrb[28].mxu1  ;;  %724 = vmax.xlane.f32.xlu1 %v5251_v6 }
 0x27b   :  { %v3903_v8 = vpop.f32.mrb[29].mxu1 }
 0x27c   :  { %v3904_v9 = vadd.f32 %v3903_v8, %v3902_v7  ;;  %v3905_v10 = vpop.f32.mrb[30].mxu1 }
 0x27d   :  { %v3906_v11 = vpop.f32.mrb[31].mxu1 }
 0x27e   :  { %v3907_v12 = vadd.f32 %v3906_v11, %v3905_v10  ;;  %v5255_v13 = vadd.f32 %v3904_v9, %v5228_v30 }
 0x280   :  { %726 = vmax.xlane.f32.xlu0 %v5255_v13  ;;  %v5259_v14 = vadd.f32 %v3907_v12, %v5228_v30 }
 0x282   :  { %v3908_v15 = vpop.f32.mrb[32].mxu1  ;;  %728 = vmax.xlane.f32.xlu1 %v5259_v14 }
 0x283   :  { %v3909_v16 = vpop.f32.mrb[33].mxu1 }
 0x284   :  { %v3910_v17 = vadd.f32 %v3909_v16, %v3908_v15  ;;  %v3911_v18 = vpop.f32.mrb[34].mxu1 }
 0x285   :  { %v3912_v19 = vpop.f32.mrb[35].mxu1 }
 0x286   :  { %v3913_v20 = vadd.f32 %v3912_v19, %v3911_v18  ;;  %v5263_v21 = vadd.f32 %v3910_v17, %v5228_v30 }
 0x288   :  { %730 = vmax.xlane.f32.xlu0 %v5263_v21  ;;  %v5267_v22 = vadd.f32 %v3913_v20, %v5228_v30 }
 0x28a   :  { %v3914_v23 = vpop.f32.mrb[36].mxu1  ;;  %732 = vmax.xlane.f32.xlu1 %v5267_v22 }
 0x28b   :  { %v3915_v24 = vpop.f32.mrb[37].mxu1 }
 0x28c   :  { %v3916_v26 = vadd.f32 %v3915_v24, %v3914_v23  ;;  %v3917_v27 = vpop.f32.mrb[38].mxu1 }
 0x28d   :  { %v3918_v47 = vpop.f32.mrb[39].mxu1 }
 0x28e   :  { %v3919_v28 = vadd.f32 %v3918_v47, %v3917_v27  ;;  %v5271_v29 = vadd.f32 %v3916_v26, %v5228_v30 }
 0x290   :  { %734 = vmax.xlane.f32.xlu0 %v5271_v29  ;;  %v5275_v31 = vadd.f32 %v3919_v28, %v5228_v30 }
 0x292   :  { %v3920_v32 = vpop.f32.mrb[40].mxu1  ;;  %736 = vmax.xlane.f32.xlu1 %v5275_v31 }
 0x293   :  { %v3921_v48 = vpop.f32.mrb[41].mxu1 }
 0x294   :  { %v3922_v33 = vadd.f32 %v3921_v48, %v3920_v32  ;;  %v3923_v35 = vpop.f32.mrb[42].mxu1 }
 0x295   :  { %v3924_v36 = vpop.f32.mrb[43].mxu1 }
 0x296   :  { %v3925_v37 = vadd.f32 %v3924_v36, %v3923_v35  ;;  %v5279_v38 = vadd.f32 %v3922_v33, %v5228_v30  ;;  %v4355_v35 = vld [vmem:[#allocation9 + $0x64] ss:$16 sps:$4 sm:$0xff]   ;;  %v4358_v36 = vld [vmem:[#allocation9 + $0x6c] ss:$16 sps:$4 sm:$0xff]  }
 0x297   :  { %1231 = vmatprep.subr.bf16.mxu1 %v4358_v36 }
 0x298   :  { %738 = vmax.xlane.f32.xlu0 %v5279_v38  ;;  %v5283_v40 = vadd.f32 %v3925_v37, %v5228_v30  ;;  %v4353_v37 = vld [vmem:[#allocation9 + $0x60] ss:$16 sps:$4 sm:$0xff]  }
 0x29a   :  { %v3926_v41 = vpop.f32.mrb[44].mxu1  ;;  %740 = vmax.xlane.f32.xlu1 %v5283_v40 }
 0x29b   :  { %v3927_v49 = vpop.f32.mrb[45].mxu1 }
 0x29c   :  { %v3928_v50 = vadd.f32 %v3927_v49, %v3926_v41  ;;  %v3929_v52 = vpop.f32.mrb[46].mxu1  ;;  %v4356_v41 = vld [vmem:[#allocation9 + $0x68] ss:$16 sps:$4 sm:$0xff]  }
 0x29d   :  { %v3930_v39 = vpop.f32.mrb[47].mxu1  ;;  %1232 = vmatpush1.bf16.msra.mxu1 %v4356_v41 }
 0x29e   :  { %v3931_v51 = vadd.f32 %v3930_v39, %v3929_v52  ;;  %v5287_v53 = vadd.f32 %v3928_v50, %v5228_v30  ;;  %v4361_v52 = vld [vmem:[#allocation9 + $0x84] ss:$16 sps:$4 sm:$0xff]   ;;  %v4364_v39 = vld [vmem:[#allocation9 + $0x8c] ss:$16 sps:$4 sm:$0xff]  }
 0x29f   :  { %1233 = vmatprep.subr.bf16.mxu1 %v4364_v39 }
 0x2a0   :  { %742 = vmax.xlane.f32.xlu0 %v5287_v53  ;;  %v5291_v25 = vadd.f32 %v3931_v51, %v5228_v30  ;;  %v4347_v30 = vld [vmem:[#allocation9 + $0x40] ss:$16 sps:$4 sm:$0xff]  }
 0x2a1   :  { %1117 = vmatpush1.bf16.msra.mxu0 %v4347_v30  ;;  %1234 = vmatpush1.bf16.msra.mxu1 %v4362_v55 }
 0x2a2   :  { %744 = vmax.xlane.f32.xlu1 %v5291_v25  ;;  %1118 = vmatprep.subr.bf16.mxu0 %v4355_v35 }
 0x2a3   :  { %1235 = vmatprep.subr.bf16.mxu1 %v4370_v61 }
 0x2a5   :  { %1119 = vmatpush1.bf16.msra.mxu0 %v4353_v37  ;;  %1236 = vmatpush1.bf16.msra.mxu1 %v4368_v63  ;;  %v4410_v37 = vld [vmem:[#allocation11 + $0xc8] ss:$12 sps:$4 sm:$0xff]  }
 0x2a6   :  { %1120 = vmatprep.subr.bf16.mxu0 %v4361_v52 }
 0x2a9   :  { %1121 = vmatpush1.bf16.msra.mxu0 %v4359_v45 }
 0x2aa   :  { %1122 = vmatprep.subr.bf16.mxu0 %v4367_v59 }
 0x2f2   :  { %v715_v4 = vpop.xlane.xlu0 %714 }
 0x2f3   :  { %v746_v7 = vsub.f32 %v5231_v34, %v715_v4  ;;  %v4376_v4 = vld [vmem:[#allocation9 + $0xcc] ss:$16 sps:$4 sm:$0xff]  }
 0x2f4   :  { %1237 = vmatprep.subr.bf16.mxu1 %v4376_v4  ;;  %v4411_v4 = vld [vmem:[#allocation11 + $0x8] ss:$12 sps:$4 sm:$0xff]  }
 0x2f5   :  { %v762_v8 = vmul.f32 1.442695, %v746_v7 }
 0x2f6   :  { %v717_v9 = vpop.xlane.xlu0 %716 }
 0x2f7   :  { %4671 = vpow2.f32 %v762_v8  ;;  %v747_v10 = vsub.f32 %v5235_v54, %v717_v9  ;;  %v4371_v8 = vld [vmem:[#allocation9 + $0xc0] ss:$16 sps:$4 sm:$0xff]   ;;  %v4374_v9 = vld [vmem:[#allocation9 + $0xc8] ss:$16 sps:$4 sm:$0xff]  }
 0x2f8   :  { %1238 = vmatpush1.bf16.msra.mxu1 %v4374_v9  ;;  %v4736_v9 = vld [vmem:[#allocation3 + $0x8] sm:$0xff]  }
 0x2f9   :  { %v764_v11 = vmul.f32 1.442695, %v747_v10 }
 0x2fb   :  { %4673 = vpow2.f32 %v764_v11 }
 0x2fc   :  { %v719_v12 = vpop.xlane.xlu1 %718 }
 0x2fd   :  { %v748_v15 = vsub.f32 %v5239_v60, %v719_v12 }
 0x2ff   :  { %v766_v16 = vmul.f32 1.442695, %v748_v15  ;;  %v4379_v15 = vld [vmem:[#allocation9 + $0xe4] ss:$16 sps:$4 sm:$0xff]  }
 0x300   :  { %v721_v17 = vpop.xlane.xlu1 %720 }
 0x301   :  { %4675 = vpow2.f32 %v766_v16  ;;  %v749_v18 = vsub.f32 %v5243_v62, %v721_v17  ;;  %v5298_v19 = vpop.eup %4671  ;;  %v4382_v16 = vld [vmem:[#allocation9 + $0xec] ss:$16 sps:$4 sm:$0xff]   ;;  %v4380_v17 = vld [vmem:[#allocation9 + $0xe8] ss:$16 sps:$4 sm:$0xff]  }
 0x302   :  { %794 = vadd.xlane.f32.xlu0 %v5298_v19  ;;  %1239 = vmatprep.subr.bf16.mxu1 %v4382_v16  ;;  %v4386_v16 = vld [vmem:[#allocation11 + $0x18] ss:$12 sps:$4 sm:$0xff]  }
 0x303   :  { %v768_v20 = vmul.f32 1.442695, %v749_v18  ;;  %1240 = vmatpush1.bf16.msra.mxu1 %v4380_v17  ;;  %v4391_v17 = vld [vmem:[#allocation11 + $0x34] ss:$12 sps:$4 sm:$0xff]  }
 0x304   :  { %3932 = vmatprep.subr.bf16.mxu1 %v4410_v37 }
 0x305   :  { %v723_v34 = vpop.xlane.xlu0 %722  ;;  %4677 = vpow2.f32 %v768_v20  ;;  %v5302_v24 = vpop.eup %4673 }
 0x306   :  { %v750_v23 = vsub.f32 %v5247_v5, %v723_v34  ;;  %796 = vadd.xlane.f32.xlu1 %v5302_v24 }
 0x307   :  { %v725_v54 = vpop.xlane.xlu1 %724 }
 0x308   :  { %v770_v26 = vmul.f32 1.442695, %v750_v23  ;;  %v751_v60 = vsub.f32 %v5251_v6, %v725_v54 }
 0x30a   :  { %4679 = vpow2.f32 %v770_v26  ;;  %v772_v27 = vmul.f32 1.442695, %v751_v60 }
 0x30b   :  { %v5306_v62 = vpop.eup %4675 }
 0x30c   :  { %4681 = vpow2.f32 %v772_v27  ;;  %798 = vadd.xlane.f32.xlu0 %v5306_v62 }
 0x30d   :  { %v727_v47 = vpop.xlane.xlu0 %726 }
 0x30e   :  { %v752_v28 = vsub.f32 %v5255_v13, %v727_v47 }
 0x30f   :  { %v729_v32 = vpop.xlane.xlu1 %728  ;;  %v5310_v5 = vpop.eup %4677 }
 0x310   :  { %v774_v48 = vmul.f32 1.442695, %v752_v28  ;;  %v753_v33 = vsub.f32 %v5259_v14, %v729_v32  ;;  %800 = vadd.xlane.f32.xlu1 %v5310_v5 }
 0x312   :  { %4683 = vpow2.f32 %v774_v48  ;;  %v776_v6 = vmul.f32 1.442695, %v753_v33 }
 0x314   :  { %v5314_v49 = vpop.eup %4679  ;;  %4685 = vpow2.f32 %v776_v6 }
 0x315   :  { %802 = vadd.xlane.f32.xlu0 %v5314_v49  ;;  %v731_v13 = vpop.xlane.xlu0 %730 }
 0x316   :  { %v5317_v50 = vpop.eup %4681  ;;  %v754_v14 = vsub.f32 %v5263_v21, %v731_v13  ;;  %v4365_v21 = vld [vmem:[#allocation9 + $0xa0] ss:$16 sps:$4 sm:$0xff]  }
 0x317   :  { %v733_v51 = vpop.xlane.xlu1 %732  ;;  %804 = vadd.xlane.f32.xlu1 %v5317_v50  ;;  %1123 = vmatpush1.bf16.msra.mxu0 %v4365_v21 }
 0x318   :  { %v778_v56 = vmul.f32 1.442695, %v754_v14  ;;  %v755_v57 = vsub.f32 %v5267_v22, %v733_v51  ;;  %1124 = vmatprep.subr.bf16.mxu0 %v4373_v3  ;;  %v4735_v51 = vld [vmem:[#allocation3] sm:$0xff]  }
 0x319   :  { %v858_v45 = vunpack.c.l.bf16 %v4735_v51  ;;  %v859_v55 = vunpack.c.h.bf16 %v4735_v51  ;;  %v4383_v3 = vld [vmem:[#allocation11] ss:$12 sps:$4 sm:$0xff]   ;;  %v4430_v51 = vld [vmem:[#allocation11 + $0x128] ss:$12 sps:$4 sm:$0xff]  }
 0x31a   :  { %4687 = vpow2.f32 %v778_v56  ;;  %v780_v58 = vmul.f32 1.442695, %v755_v57 }
 0x31b   :  { %1125 = vmatpush1.bf16.msra.mxu0 %v4371_v8  ;;  %v4415_v8 = vld [vmem:[#allocation11 + $0xe0] ss:$12 sps:$4 sm:$0xff]  }
 0x31c   :  { %v5322_v0 = vpop.eup %4683  ;;  %4689 = vpow2.f32 %v780_v58  ;;  %1126 = vmatprep.subr.bf16.mxu0 %v4379_v15 }
 0x31d   :  { %806 = vadd.xlane.f32.xlu0 %v5322_v0  ;;  %v735_v2 = vpop.xlane.xlu0 %734 }
 0x31e   :  { %v5325_v22 = vpop.eup %4685  ;;  %v756_v30 = vsub.f32 %v5271_v29, %v735_v2  ;;  %v4377_v29 = vld [vmem:[#allocation9 + $0xe0] ss:$16 sps:$4 sm:$0xff]  }
 0x31f   :  { %v737_v7 = vpop.xlane.xlu1 %736  ;;  %808 = vadd.xlane.f32.xlu1 %v5325_v22  ;;  %1127 = vmatpush1.bf16.msra.mxu0 %v4377_v29  ;;  %v4416_v29 = vld [vmem:[#allocation11 + $0x20] ss:$12 sps:$4 sm:$0xff]  }
 0x320   :  { %v782_v10 = vmul.f32 1.442695, %v756_v30  ;;  %v757_v11 = vsub.f32 %v5275_v31, %v737_v7  ;;  %v4388_v7 = vld [vmem:[#allocation11 + $0x1c] ss:$12 sps:$4 sm:$0xff]  }
 0x322   :  { %4691 = vpow2.f32 %v782_v10  ;;  %v784_v12 = vmul.f32 1.442695, %v757_v11  ;;  %v860_v10 = vunpack.c.l.bf16 %v4736_v9  ;;  %v861_v11 = vunpack.c.h.bf16 %v4736_v9  ;;  %v4403_v9 = vld [vmem:[#allocation11 + $0x94] ss:$12 sps:$4 sm:$0xff]  }
 0x324   :  { %v5330_v18 = vpop.eup %4687  ;;  %4693 = vpow2.f32 %v784_v12 }
 0x325   :  { %810 = vadd.xlane.f32.xlu0 %v5330_v18  ;;  %v739_v20 = vpop.xlane.xlu0 %738 }
 0x326   :  { %v5333_v31 = vpop.eup %4689  ;;  %v758_v34 = vsub.f32 %v5279_v38, %v739_v20  ;;  %v4420_v20 = vld [vmem:[#allocation11 + $0xf8] ss:$12 sps:$4 sm:$0xff]  }
 0x327   :  { %v741_v23 = vpop.xlane.xlu1 %740  ;;  %812 = vadd.xlane.f32.xlu1 %v5333_v31 }
 0x328   :  { %v786_v54 = vmul.f32 1.442695, %v758_v34  ;;  %v759_v26 = vsub.f32 %v5283_v40, %v741_v23 }
 0x32a   :  { %4695 = vpow2.f32 %v786_v54  ;;  %v788_v60 = vmul.f32 1.442695, %v759_v26  ;;  %v4737_v26 = vld [vmem:[#allocation3 + $0x10] sm:$0xff]  }
 0x32c   :  { %v5338_v27 = vpop.eup %4691  ;;  %4697 = vpow2.f32 %v788_v60  ;;  %v863_v60 = vunpack.c.h.bf16 %v4737_v26 }
 0x32d   :  { %814 = vadd.xlane.f32.xlu0 %v5338_v27  ;;  %v743_v47 = vpop.xlane.xlu0 %742 }
 0x32e   :  { %v5341_v28 = vpop.eup %4693  ;;  %v760_v32 = vsub.f32 %v5287_v53, %v743_v47 }
 0x32f   :  { %v745_v38 = vpop.xlane.xlu1 %744  ;;  %816 = vadd.xlane.f32.xlu1 %v5341_v28 }
 0x330   :  { %v790_v48 = vmul.f32 1.442695, %v760_v32  ;;  %v761_v33 = vsub.f32 %v5291_v25, %v745_v38  ;;  %v4385_v25 = vld [vmem:[#allocation11 + $0x4] ss:$12 sps:$4 sm:$0xff]  }
 0x331   :  { %2091 = vmatprep.subr.bf16.mxu0 %v4385_v25  ;;  %v4389_v32 = vld [vmem:[#allocation11 + $0x30] ss:$12 sps:$4 sm:$0xff]  }
 0x332   :  { %4699 = vpow2.f32 %v790_v48  ;;  %v792_v40 = vmul.f32 1.442695, %v761_v33  ;;  %v4394_v48 = vld [vmem:[#allocation11 + $0x4c] ss:$12 sps:$4 sm:$0xff]   ;;  %v4425_v33 = vld [vmem:[#allocation11 + $0x110] ss:$12 sps:$4 sm:$0xff]  }
 0x334   :  { %v5346_v6 = vpop.eup %4695  ;;  %4701 = vpow2.f32 %v792_v40  ;;  %v862_v40 = vunpack.c.l.bf16 %v4737_v26 }
 0x335   :  { %818 = vadd.xlane.f32.xlu0 %v5346_v6 }
 0x336   :  { %v5349_v35 = vpop.eup %4697 }
 0x337   :  { %820 = vadd.xlane.f32.xlu1 %v5349_v35 }
 0x33c   :  { %v5352_v36 = vpop.eup %4699 }
 0x33d   :  { %822 = vadd.xlane.f32.xlu0 %v5352_v36 }
 0x33e   :  { %v5355_v53 = vpop.eup %4701 }
 0x33f   :  { %824 = vadd.xlane.f32.xlu1 %v5355_v53 }
 0x38f   :  { %v795_v41 = vpop.xlane.xlu0 %794 }
 0x390   :  { %4703 = vrcp.f32 %v795_v41 }
 0x393   :  { %v797_v13 = vpop.xlane.xlu1 %796 }
 0x394   :  { %4705 = vrcp.f32 %v797_v13 }
 0x399   :  { %v799_v14 = vpop.xlane.xlu0 %798 }
 0x39a   :  { %4707 = vrcp.f32 %v799_v14  ;;  %v4704_v52 = vpop.eup %4703  ;;  %v4392_v14 = vld [vmem:[#allocation11 + $0x48] ss:$12 sps:$4 sm:$0xff]  }
 0x39b   :  { %v842_v56 = vmul.f32 %v4704_v52, %v5298_v19  ;;  %v4426_v52 = vld [vmem:[#allocation11 + $0x50] ss:$12 sps:$4 sm:$0xff]  }
 0x39d   :  { %v801_v39 = vpop.xlane.xlu1 %800  ;;  %v874_v61 = vmul.f32 %v858_v45, %v842_v56 }
 0x39e   :  { %4709 = vrcp.f32 %v801_v39  ;;  %v4706_v57 = vpop.eup %4705  ;;  %v4397_v39 = vld [vmem:[#allocation11 + $0x64] ss:$12 sps:$4 sm:$0xff]  }
 0x39f   :  { %v843_v58 = vmul.f32 %v4706_v57, %v5302_v24 }
 0x3a1   :  { %v875_v21 = vmul.f32 %v859_v55, %v843_v58  ;;  %v4395_v58 = vld [vmem:[#allocation11 + $0x60] ss:$12 sps:$4 sm:$0xff]  }
 0x3a2   :  { %v803_v59 = vpop.xlane.xlu0 %802 }
 0x3a3   :  { %4711 = vrcp.f32 %v803_v59  ;;  %v890_v30 = vpack.c.bf16 %v875_v21, %v874_v61  ;;  %v4431_v59 = vld [vmem:[#allocation11 + $0x68] ss:$12 sps:$4 sm:$0xff]  }
 0x3a4   :  { %v805_v63 = vpop.xlane.xlu1 %804  ;;  %v4708_v2 = vpop.eup %4707  ;;  %v4400_v21 = vld [vmem:[#allocation11 + $0x7c] ss:$12 sps:$4 sm:$0xff]  }
 0x3a5   :  { %4713 = vrcp.f32 %v805_v63  ;;  %1145 = vmatmul.mubr.bf16.vlgmr.msra.gmra.mrb[16].mxu0 %v890_v30  ;;  %1258 = vmatmul.mubr.bf16.vlgmr.msra.gmra.mrb[48].mxu1 %v890_v30  ;;  %v844_v19 = vmul.f32 %v4708_v2, %v5306_v62  ;;  %v4435_v63 = vld [vmem:[#allocation11 + $0x140] ss:$12 sps:$4 sm:$0xff]  }
 0x3a6   :  { %1154 = vmatprep.mubr.bf16.mxu0 %v4944_v1  ;;  %1267 = vmatprep.mubr.bf16.mxu1 %v4944_v1 }
 0x3a7   :  { %2092 = vmatpush1.bf16.msra.mxu0 %v4383_v3  ;;  %3933 = vmatpush3.bf16.msra.mxu1 %v4411_v4  ;;  %v876_v23 = vmul.f32 %v860_v10, %v844_v19 }
 0x3a8   :  { %v4710_v24 = vpop.eup %4709  ;;  %2093 = vmatprep.subr.bf16.mxu0 %v4388_v7  ;;  %3934 = vmatprep.subr.bf16.mxu1 %v4415_v8  ;;  %v4398_v8 = vld [vmem:[#allocation11 + $0x78] ss:$12 sps:$4 sm:$0xff]  }
 0x3a9   :  { %v845_v15 = vmul.f32 %v4710_v24, %v5310_v5  ;;  %v4421_v5 = vld [vmem:[#allocation11 + $0x38] ss:$12 sps:$4 sm:$0xff]  }
 0x3aa   :  { %v807_v12 = vpop.xlane.xlu0 %806 }
 0x3ab   :  { %4715 = vrcp.f32 %v807_v12  ;;  %v877_v62 = vmul.f32 %v861_v11, %v845_v15  ;;  %2094 = vmatpush1.bf16.msra.mxu0 %v4386_v16  ;;  %3935 = vmatpush3.bf16.msra.mxu1 %v4416_v29  ;;  %v4401_v12 = vld [vmem:[#allocation11 + $0x90] ss:$12 sps:$4 sm:$0xff]   ;;  %v4406_v16 = vld [vmem:[#allocation11 + $0xac] ss:$12 sps:$4 sm:$0xff]  }
 0x3ac   :  { %v809_v34 = vpop.xlane.xlu1 %808  ;;  %2095 = vmatprep.subr.bf16.mxu0 %v4391_v17  ;;  %3936 = vmatprep.subr.bf16.mxu1 %v4420_v20 }
 0x3ad   :  { %v4712_v54 = vpop.eup %4711  ;;  %4717 = vrcp.f32 %v809_v34  ;;  %v891_v47 = vpack.c.bf16 %v877_v62, %v876_v23  ;;  %v4404_v62 = vld [vmem:[#allocation11 + $0xa8] ss:$12 sps:$4 sm:$0xff]  }
 0x3ae   :  { %v846_v25 = vmul.f32 %v4712_v54, %v5314_v49  ;;  %v4409_v54 = vld [vmem:[#allocation11 + $0xc4] ss:$12 sps:$4 sm:$0xff]  }
 0x3af   :  { %v4714_v38 = vpop.eup %4713  ;;  %1155 = vmatmul.mubr.bf16.gmra.mrb[20].mxu0 %v891_v47  ;;  %1268 = vmatmul.mubr.bf16.gmra.mrb[52].mxu1 %v891_v47 }
 0x3b0   :  { %v847_v37 = vmul.f32 %v4714_v38, %v5317_v50  ;;  %1164 = vmatprep.mubr.bf16.mxu0 %v4944_v1  ;;  %1277 = vmatprep.mubr.bf16.mxu1 %v4944_v1  ;;  %v878_v55 = vmul.f32 %v862_v40, %v846_v25  ;;  %v4738_v50 = vld [vmem:[#allocation3 + $0x18] sm:$0xff]  }
 0x3b1   :  { %2096 = vmatpush1.bf16.msra.mxu0 %v4389_v32  ;;  %3937 = vmatpush3.bf16.msra.mxu1 %v4421_v5  ;;  %v865_v56 = vunpack.c.h.bf16 %v4738_v50  ;;  %v864_v2 = vunpack.c.l.bf16 %v4738_v50  ;;  %v4740_v32 = vld [vmem:[#allocation3 + $0x28] sm:$0xff]  }
 0x3b2   :  { %v811_v41 = vpop.xlane.xlu0 %810  ;;  %v879_v13 = vmul.f32 %v863_v60, %v847_v37  ;;  %2097 = vmatprep.subr.bf16.mxu0 %v4394_v48  ;;  %3938 = vmatprep.subr.bf16.mxu1 %v4425_v33  ;;  %v869_v5 = vunpack.c.h.bf16 %v4740_v32  ;;  %v4414_v48 = vld [vmem:[#allocation11 + $0xdc] ss:$12 sps:$4 sm:$0xff]   ;;  %v868_v33 = vunpack.c.l.bf16 %v4740_v32  ;;  %v4424_v50 = vld [vmem:[#allocation11 + $0x10c] ss:$12 sps:$4 sm:$0xff]  }
 0x3b3   :  { %4719 = vrcp.f32 %v811_v41 }
 0x3b4   :  { %v813_v45 = vpop.xlane.xlu1 %812  ;;  %v892_v57 = vpack.c.bf16 %v879_v13, %v878_v55  ;;  %v4412_v13 = vld [vmem:[#allocation11 + $0xd8] ss:$12 sps:$4 sm:$0xff]  }
 0x3b5   :  { %v4716_v49 = vpop.eup %4715  ;;  %4721 = vrcp.f32 %v813_v45  ;;  %2098 = vmatpush1.bf16.msra.mxu0 %v4392_v14  ;;  %3939 = vmatpush3.bf16.msra.mxu1 %v4426_v52  ;;  %v4419_v14 = vld [vmem:[#allocation11 + $0xf4] ss:$12 sps:$4 sm:$0xff]  }
 0x3b6   :  { %2099 = vmatprep.subr.bf16.mxu0 %v4397_v39  ;;  %3940 = vmatprep.subr.bf16.mxu1 %v4430_v51  ;;  %v848_v30 = vmul.f32 %v4716_v49, %v5322_v0  ;;  %v4739_v0 = vld [vmem:[#allocation3 + $0x20] sm:$0xff]   ;;  %v4741_v45 = vld [vmem:[#allocation3 + $0x30] sm:$0xff]  }
 0x3b7   :  { %v4718_v61 = vpop.eup %4717  ;;  %1165 = vmatmul.mubr.bf16.gmra.mrb[24].mxu0 %v892_v57  ;;  %1278 = vmatmul.mubr.bf16.gmra.mrb[56].mxu1 %v892_v57  ;;  %v867_v24 = vunpack.c.h.bf16 %v4739_v0  ;;  %v866_v29 = vunpack.c.l.bf16 %v4739_v0  ;;  %v871_v55 = vunpack.c.h.bf16 %v4741_v45 }
 0x3b8   :  { %v849_v3 = vmul.f32 %v4718_v61, %v5325_v22  ;;  %1174 = vmatprep.mubr.bf16.mxu0 %v4944_v1  ;;  %1287 = vmatprep.mubr.bf16.mxu1 %v4944_v1  ;;  %v880_v11 = vmul.f32 %v864_v2, %v848_v30  ;;  %v4422_v61 = vld [vmem:[#allocation11 + $0x108] ss:$12 sps:$4 sm:$0xff]   ;;  %v4742_v30 = vld [vmem:[#allocation3 + $0x38] sm:$0xff]  }
 0x3b9   :  { %2100 = vmatpush1.bf16.msra.mxu0 %v4395_v58  ;;  %3941 = vmatpush3.bf16.msra.mxu1 %v4431_v59 }
 0x3ba   :  { %v815_v4 = vpop.xlane.xlu0 %814  ;;  %v881_v7 = vmul.f32 %v865_v56, %v849_v3  ;;  %2101 = vmatprep.subr.bf16.mxu0 %v4400_v21  ;;  %3942 = vmatprep.subr.bf16.mxu1 %v4435_v63  ;;  %v870_v56 = vunpack.c.l.bf16 %v4741_v45  ;;  %v4429_v21 = vld [vmem:[#allocation11 + $0x124] ss:$12 sps:$4 sm:$0xff]   ;;  %v873_v3 = vunpack.c.h.bf16 %v4742_v30 }
 0x3bb   :  { %4723 = vrcp.f32 %v815_v4 }
 0x3bc   :  { %v817_v10 = vpop.xlane.xlu1 %816  ;;  %v893_v22 = vpack.c.bf16 %v881_v7, %v880_v11  ;;  %v4427_v7 = vld [vmem:[#allocation11 + $0x120] ss:$12 sps:$4 sm:$0xff]  }
 0x3bd   :  { %v4720_v19 = vpop.eup %4719  ;;  %4725 = vrcp.f32 %v817_v10  ;;  %2102 = vmatpush1.bf16.msra.mxu0 %v4398_v8 }
 0x3be   :  { %2103 = vmatprep.subr.bf16.mxu0 %v4403_v9  ;;  %v850_v17 = vmul.f32 %v4720_v19, %v5330_v18  ;;  %v4432_v19 = vld [vmem:[#allocation11 + $0x138] ss:$12 sps:$4 sm:$0xff]  }
 0x3bf   :  { %v4722_v15 = vpop.eup %4721  ;;  %1175 = vmatmul.mubr.bf16.gmra.mrb[28].mxu0 %v893_v22  ;;  %1288 = vmatmul.mubr.bf16.gmra.mrb[60].mxu1 %v893_v22  ;;  %v4436_v22 = vld [vmem:[#allocation11 + $0x80] ss:$12 sps:$4 sm:$0xff]  }
 0x3c0   :  { %v851_v20 = vmul.f32 %v4722_v15, %v5333_v31  ;;  %1184 = vmatprep.mubr.bf16.mxu0 %v4944_v1  ;;  %1297 = vmatprep.mubr.bf16.mxu1 %v4944_v1  ;;  %v882_v60 = vmul.f32 %v866_v29, %v850_v17  ;;  %v4407_v31 = vld [vmem:[#allocation11 + $0xc0] ss:$12 sps:$4 sm:$0xff]   ;;  %v4440_v15 = vld [vmem:[#allocation11 + $0x158] ss:$12 sps:$4 sm:$0xff]   ;;  %v4445_v29 = vld [vmem:[#allocation11 + $0x170] ss:$12 sps:$4 sm:$0xff]  }
 0x3c1   :  { %2104 = vmatpush1.bf16.msra.mxu0 %v4401_v12  ;;  %3943 = vmatpush3.bf16.msra.mxu1 %v4436_v22  ;;  %v4439_v12 = vld [vmem:[#allocation11 + $0x154] ss:$12 sps:$4 sm:$0xff]  }
 0x3c2   :  { %v819_v34 = vpop.xlane.xlu0 %818  ;;  %v883_v23 = vmul.f32 %v867_v24, %v851_v20  ;;  %2105 = vmatprep.subr.bf16.mxu0 %v4406_v16  ;;  %v4441_v16 = vld [vmem:[#allocation11 + $0x98] ss:$12 sps:$4 sm:$0xff]   ;;  %3944 = vmatprep.subr.bf16.mxu1 %v4440_v15  ;;  %v4442_v17 = vld [vmem:[#allocation11 + $0x168] ss:$12 sps:$4 sm:$0xff]   ;;  %v4446_v20 = vld [vmem:[#allocation11 + $0xb0] ss:$12 sps:$4 sm:$0xff]  }
 0x3c3   :  { %4727 = vrcp.f32 %v819_v34  ;;  %v4449_v34 = vld [vmem:[#allocation11 + $0x184] ss:$12 sps:$4 sm:$0xff]  }
 0x3c4   :  { %v821_v26 = vpop.xlane.xlu1 %820  ;;  %v894_v18 = vpack.c.bf16 %v883_v23, %v882_v60  ;;  %v4474_v23 = vld [vmem:[#allocation11 + $0x248] ss:$12 sps:$4 sm:$0xff]  }
 0x3c5   :  { %v4724_v47 = vpop.eup %4723  ;;  %4729 = vrcp.f32 %v821_v26  ;;  %2106 = vmatpush1.bf16.msra.mxu0 %v4404_v62  ;;  %3945 = vmatpush3.bf16.msra.mxu1 %v4441_v16  ;;  %v942_v62 = vsub.s32 2, %v5154_v43  ;;  %v946_v26 = vsub.s32 3, %v5154_v43 }
 0x3c6   :  { %2107 = vmatprep.subr.bf16.mxu0 %v4409_v54  ;;  %v852_v40 = vmul.f32 %v4724_v47, %v5338_v27  ;;  %3946 = vmatprep.subr.bf16.mxu1 %v4445_v29  ;;  %v930_v54 = vld [vmem:[%s5816_s6] sm:$0xf] }
 0x3c7   :  { %v4726_v38 = vpop.eup %4725  ;;  %1185 = vmatmul.mubr.bf16.gmra.mrb[32].mxu0 %v894_v18  ;;  %1298 = vmatmul.mubr.bf16.gmra.mrb[64].mxu1 %v894_v18  ;;  %v5394_v60 = vrot.slane %v930_v54, %v5157_v44  ;;  %v5398_v47 = vrot.slane %v930_v54, %v942_v62  ;;  %v5401_v32 = vrot.slane %v930_v54, %v5163_v46 }
 0x3c8   :  { %v853_v25 = vmul.f32 %v4726_v38, %v5341_v28  ;;  %1194 = vmatprep.mubr.bf16.mxu0 %v4944_v1  ;;  %1307 = vmatprep.mubr.bf16.mxu1 %v4944_v1  ;;  %v884_v39 = vmul.f32 %v868_v33, %v852_v40  ;;  %v4417_v28 = vld [vmem:[#allocation11 + $0xf0] ss:$12 sps:$4 sm:$0xff]  }
 0x3c9   :  { %2108 = vmatpush1.bf16.msra.mxu0 %v4407_v31  ;;  %3947 = vmatpush3.bf16.msra.mxu1 %v4446_v20  ;;  %v4455_v20 = vld [vmem:[#allocation11 + $0x1b4] ss:$12 sps:$4 sm:$0xff]  }
 0x3ca   :  { %v823_v37 = vpop.xlane.xlu0 %822  ;;  %v885_v41 = vmul.f32 %v869_v5, %v853_v25  ;;  %2109 = vmatprep.subr.bf16.mxu0 %v4414_v48  ;;  %3996 = vmatprep.subr.bf16.mxu1 %v4474_v23  ;;  %v5403_v5 = vrot.slane %v930_v54, %v946_v26 }
 0x3cb   :  { %4731 = vrcp.f32 %v823_v37 }
 0x3cc   :  { %v825_v52 = vpop.xlane.xlu1 %824  ;;  %v895_v27 = vpack.c.bf16 %v885_v41, %v884_v39 }
 0x3cd   :  { %v4728_v51 = vpop.eup %4727  ;;  %4733 = vrcp.f32 %v825_v52  ;;  %2110 = vmatpush1.bf16.msra.mxu0 %v4412_v13 }
 0x3ce   :  { %2111 = vmatprep.subr.bf16.mxu0 %v4419_v14  ;;  %v854_v57 = vmul.f32 %v4728_v51, %v5346_v6  ;;  %v4434_v6 = vld [vmem:[#allocation11 + $0x13c] ss:$12 sps:$4 sm:$0xff]  }
 0x3cf   :  { %v4730_v49 = vpop.eup %4729  ;;  %1195 = vmatmul.mubr.bf16.gmra.mrb[36].mxu0 %v895_v27  ;;  %1308 = vmatmul.mubr.bf16.gmra.mrb[68].mxu1 %v895_v27 }
 0x3d0   :  { %v855_v58 = vmul.f32 %v4730_v49, %v5349_v35  ;;  %1204 = vmatprep.mubr.bf16.mxu0 %v4944_v1  ;;  %1317 = vmatprep.mubr.bf16.mxu1 %v4944_v1  ;;  %v886_v63 = vmul.f32 %v870_v56, %v854_v57  ;;  %v872_v35 = vunpack.c.l.bf16 %v4742_v30 }
 0x3d1   :  { %2112 = vmatpush1.bf16.msra.mxu0 %v4417_v28 }
 0x3d2   :  { %v887_v59 = vmul.f32 %v871_v55, %v855_v58  ;;  %2113 = vmatprep.subr.bf16.mxu0 %v4424_v50 }
 0x3d4   :  { %v896_v4 = vpack.c.bf16 %v887_v59, %v886_v63 }
 0x3d5   :  { %v4732_v2 = vpop.eup %4731  ;;  %2114 = vmatpush1.bf16.msra.mxu0 %v4422_v61 }
 0x3d6   :  { %2115 = vmatprep.subr.bf16.mxu0 %v4429_v21  ;;  %v856_v9 = vmul.f32 %v4732_v2, %v5352_v36  ;;  %v4437_v36 = vld [vmem:[#allocation11 + $0x150] ss:$12 sps:$4 sm:$0xff]  }
 0x3d7   :  { %v4734_v8 = vpop.eup %4733  ;;  %1205 = vmatmul.mubr.bf16.gmra.mrb[40].mxu0 %v896_v4  ;;  %1318 = vmatmul.mubr.bf16.gmra.mrb[72].mxu1 %v896_v4  ;;  %v4447_v4 = vld [vmem:[#allocation11 + $0x180] ss:$12 sps:$4 sm:$0xff]  }
 0x3d8   :  { %v857_v10 = vmul.f32 %v4734_v8, %v5355_v53  ;;  %1214 = vmatprep.mubr.bf16.mxu0 %v4944_v1  ;;  %1327 = vmatprep.mubr.bf16.mxu1 %v4944_v1  ;;  %v888_v0 = vmul.f32 %v872_v35, %v856_v9  ;;  %v4444_v53 = vld [vmem:[#allocation11 + $0x16c] ss:$12 sps:$4 sm:$0xff]  }
 0x3d9   :  { %2116 = vmatpush1.bf16.msra.mxu0 %v4427_v7  ;;  %v4475_v7 = vld [vmem:[#allocation11 + $0x188] ss:$12 sps:$4 sm:$0xff]  }
 0x3da   :  { %v889_v11 = vmul.f32 %v873_v3, %v857_v10  ;;  %2117 = vmatprep.subr.bf16.mxu0 %v4434_v6  ;;  %v4452_v10 = vld [vmem:[#allocation11 + $0x19c] ss:$12 sps:$4 sm:$0xff]  }
 0x3dc   :  { %v897_v24 = vpack.c.bf16 %v889_v11, %v888_v0  ;;  %v4479_v11 = vld [vmem:[#allocation11 + $0x260] ss:$12 sps:$4 sm:$0xff]  }
 0x3dd   :  { %2118 = vmatpush1.bf16.msra.mxu0 %v4432_v19 }
 0x3de   :  { %2119 = vmatprep.subr.bf16.mxu0 %v4439_v12 }
 0x3df   :  { %1215 = vmatmul.mubr.bf16.gmra.mrb[44].mxu0 %v897_v24  ;;  %1328 = vmatmul.mubr.bf16.gmra.mrb[76].mxu1 %v897_v24 }
 0x3e1   :  { %2120 = vmatpush1.bf16.msra.mxu0 %v4437_v36 }
 0x3e2   :  { %2121 = vmatprep.subr.bf16.mxu0 %v4444_v53 }
 0x3e5   :  { %2122 = vmatpush1.bf16.msra.mxu0 %v4442_v17  ;;  %v4450_v17 = vld [vmem:[#allocation11 + $0x198] ss:$12 sps:$4 sm:$0xff]  }
 0x3e6   :  { %2204 = vmatprep.subr.bf16.mxu0 %v4449_v34  ;;  %v4480_v34 = vld [vmem:[#allocation11 + $0x1a0] ss:$12 sps:$4 sm:$0xff]  }
 0x478   :  { %v1146_v18 = vpop.f32.mrb[16].mxu0  ;;  %v1259_v31 = vpop.f32.mrb[48].mxu1 }
 0x479   :  { %v1147_v38 = vadd.f32 %v1146_v18, %v5394_v60  ;;  %v1260_v48 = vadd.f32 %v1259_v31, %v5398_v47  ;;  %v1148_v33 = vpop.f32.mrb[17].mxu0  ;;  %v1261_v40 = vpop.f32.mrb[49].mxu1  ;;  %v4484_v31 = vld [vmem:[#allocation11 + $0x278] ss:$12 sps:$4 sm:$0xff]  }
 0x47a   :  { %v1149_v25 = vadd.f32 %v1148_v33, %v5401_v32  ;;  %v1262_v37 = vadd.f32 %v1261_v40, %v5403_v5  ;;  %v1150_v41 = vpop.f32.mrb[18].mxu0  ;;  %v1263_v13 = vpop.f32.mrb[50].mxu1 }
 0x47b   :  { %v1151_v14 = vadd.f32 %v1150_v41, %v5394_v60  ;;  %v1264_v52 = vadd.f32 %v1263_v13, %v5398_v47  ;;  %v1152_v39 = vpop.f32.mrb[19].mxu0  ;;  %v1265_v51 = vpop.f32.mrb[51].mxu1  ;;  %v1338_v27 = vmax.f32 %v1147_v38, 0.0  ;;  %v1340_v28 = vmax.f32 %v1260_v48, 0.0 }
 0x47c   :  { %v1153_v45 = vadd.f32 %v1152_v39, %v5401_v32  ;;  %v1266_v55 = vadd.f32 %v1265_v51, %v5403_v5  ;;  %v1339_v56 = vmax.f32 %v1149_v25, 0.0  ;;  %v1341_v57 = vmax.f32 %v1262_v37, 0.0  ;;  %v4453_v39 = vld [vmem:[#allocation11 + $0x1b0] ss:$12 sps:$4 sm:$0xff]   ;;  %v4485_v51 = vld [vmem:[#allocation11 + $0x1b8] ss:$12 sps:$4 sm:$0xff]  }
 0x47d   :  { %v1342_v49 = vmax.f32 %v1151_v14, 0.0  ;;  %v1344_v50 = vmax.f32 %v1264_v52, 0.0 }
 0x47e   :  { %v1343_v58 = vmax.f32 %v1153_v45, 0.0  ;;  %v1345_v59 = vmax.f32 %v1266_v55, 0.0 }
 0x47f   :  { %v1402_v61 = vpack.c.bf16 %v1342_v49, %v1338_v27  ;;  %v5413_v21 = vpack.c.bf16 %v1344_v50, %v1340_v28  ;;  %v4458_v49 = vld [vmem:[#allocation11 + $0x1cc] ss:$12 sps:$4 sm:$0xff]   ;;  %v4489_v50 = vld [vmem:[#allocation11 + $0x290] ss:$12 sps:$4 sm:$0xff]  }
 0x480   :  { %v1403_v63 = vpack.c.bf16 %v1343_v58, %v1339_v56  ;;  %v5415_v2 = vpack.c.bf16 %v1345_v59, %v1341_v57 }
 0x482   :  { %v1156_v30 = vpop.f32.mrb[20].mxu0  ;;  %v1269_v3 = vpop.f32.mrb[52].mxu1  ;;  %2123 = vmatprep.mubr.bf16.mxu0 %v1403_v63  ;;  %2349 = vmatprep.mubr.bf16.mxu1 %v1403_v63 }
 0x483   :  { %v1157_v8 = vadd.f32 %v1156_v30, %v5394_v60  ;;  %v1270_v6 = vadd.f32 %v1269_v3, %v5398_v47  ;;  %v1158_v35 = vpop.f32.mrb[21].mxu0  ;;  %v1271_v9 = vpop.f32.mrb[53].mxu1  ;;  %2124 = vmatmul.mubr.bf16.vlgmr.msra.gmra.mrb[48].mxu0 %v1402_v61  ;;  %2350 = vmatmul.mubr.bf16.vlgmr.msra.gmra.mrb[80].mxu1 %v1402_v61 }
 0x484   :  { %v1159_v19 = vadd.f32 %v1158_v35, %v5401_v32  ;;  %v1272_v0 = vadd.f32 %v1271_v9, %v5403_v5  ;;  %v1160_v24 = vpop.f32.mrb[22].mxu0  ;;  %v1273_v22 = vpop.f32.mrb[54].mxu1  ;;  %2205 = vmatpush1.bf16.msra.mxu0 %v4447_v4  ;;  %3997 = vmatpush3.bf16.msra.mxu1 %v4475_v7  ;;  %v4490_v35 = vld [vmem:[#allocation11 + $0x1d0] ss:$12 sps:$4 sm:$0xff]  }
 0x485   :  { %v1161_v12 = vadd.f32 %v1160_v24, %v5394_v60  ;;  %v1274_v15 = vadd.f32 %v1273_v22, %v5398_v47  ;;  %v1162_v36 = vpop.f32.mrb[23].mxu0  ;;  %v1275_v16 = vpop.f32.mrb[55].mxu1  ;;  %v1346_v23 = vmax.f32 %v1157_v8, 0.0  ;;  %v1348_v54 = vmax.f32 %v1270_v6, 0.0  ;;  %2206 = vmatprep.subr.bf16.mxu0 %v4452_v10  ;;  %3998 = vmatprep.subr.bf16.mxu1 %v4479_v11  ;;  %v4456_v8 = vld [vmem:[#allocation11 + $0x1c8] ss:$12 sps:$4 sm:$0xff]  }
 0x486   :  { %v1163_v53 = vadd.f32 %v1162_v36, %v5401_v32  ;;  %v1276_v29 = vadd.f32 %v1275_v16, %v5403_v5  ;;  %v1347_v38 = vmax.f32 %v1159_v19, 0.0  ;;  %v1349_v48 = vmax.f32 %v1272_v0, 0.0  ;;  %v4461_v6 = vld [vmem:[#allocation11 + $0x1e4] ss:$12 sps:$4 sm:$0xff]   ;;  %v4494_v0 = vld [vmem:[#allocation11 + $0x2a8] ss:$12 sps:$4 sm:$0xff]  }
 0x487   :  { %v1350_v26 = vmax.f32 %v1161_v12, 0.0  ;;  %v1352_v18 = vmax.f32 %v1274_v15, 0.0 }
 0x488   :  { %v1351_v33 = vmax.f32 %v1163_v53, 0.0  ;;  %v1353_v40 = vmax.f32 %v1276_v29, 0.0  ;;  %2207 = vmatpush1.bf16.msra.mxu0 %v4450_v17  ;;  %3999 = vmatpush3.bf16.msra.mxu1 %v4480_v34  ;;  %v4459_v34 = vld [vmem:[#allocation11 + $0x1e0] ss:$12 sps:$4 sm:$0xff]  }
 0x489   :  { %v1406_v25 = vpack.c.bf16 %v1350_v26, %v1346_v23  ;;  %v5425_v37 = vpack.c.bf16 %v1352_v18, %v1348_v54  ;;  %2208 = vmatprep.subr.bf16.mxu0 %v4455_v20  ;;  %4000 = vmatprep.subr.bf16.mxu1 %v4484_v31  ;;  %v4495_v23 = vld [vmem:[#allocation11 + $0x1e8] ss:$12 sps:$4 sm:$0xff]  }
 0x48a   :  { %v1407_v41 = vpack.c.bf16 %v1351_v33, %v1347_v38  ;;  %v5427_v13 = vpack.c.bf16 %v1353_v40, %v1349_v48  ;;  %v1166_v14 = vpop.f32.mrb[24].mxu0  ;;  %v1279_v52 = vpop.f32.mrb[56].mxu1  ;;  %v4464_v38 = vld [vmem:[#allocation11 + $0x1fc] ss:$12 sps:$4 sm:$0xff]   ;;  %v4499_v48 = vld [vmem:[#allocation11 + $0x2c0] ss:$12 sps:$4 sm:$0xff]  }
 0x48b   :  { %v1167_v45 = vadd.f32 %v1166_v14, %v5394_v60  ;;  %v1280_v55 = vadd.f32 %v1279_v52, %v5398_v47  ;;  %v1168_v27 = vpop.f32.mrb[25].mxu0  ;;  %v1281_v28 = vpop.f32.mrb[57].mxu1 }
 0x48c   :  { %v1169_v56 = vadd.f32 %v1168_v27, %v5401_v32  ;;  %v1282_v57 = vadd.f32 %v1281_v28, %v5403_v5  ;;  %v1170_v58 = vpop.f32.mrb[26].mxu0  ;;  %v1283_v59 = vpop.f32.mrb[58].mxu1  ;;  %2133 = vmatprep.mubr.bf16.mxu0 %v1407_v41  ;;  %2357 = vmatprep.mubr.bf16.mxu1 %v1407_v41  ;;  %v4462_v27 = vld [vmem:[#allocation11 + $0x1f8] ss:$12 sps:$4 sm:$0xff]   ;;  %v4467_v28 = vld [vmem:[#allocation11 + $0x214] ss:$12 sps:$4 sm:$0xff]  }
 0x48d   :  { %v1171_v61 = vadd.f32 %v1170_v58, %v5394_v60  ;;  %v1284_v63 = vadd.f32 %v1283_v59, %v5398_v47  ;;  %v1172_v30 = vpop.f32.mrb[27].mxu0  ;;  %v1285_v3 = vpop.f32.mrb[59].mxu1  ;;  %2134 = vmatmul.mubr.bf16.gmra.mrb[52].mxu0 %v1406_v25  ;;  %2358 = vmatmul.mubr.bf16.gmra.mrb[84].mxu1 %v1406_v25  ;;  %v1354_v9 = vmax.f32 %v1167_v45, 0.0  ;;  %v1356_v10 = vmax.f32 %v1280_v55, 0.0  ;;  %v4504_v59 = vld [vmem:[#allocation11 + $0x2d8] ss:$12 sps:$4 sm:$0xff]  }
 0x48e   :  { %v1173_v4 = vadd.f32 %v1172_v30, %v5401_v32  ;;  %v1286_v7 = vadd.f32 %v1285_v3, %v5403_v5  ;;  %2209 = vmatpush1.bf16.msra.mxu0 %v4453_v39  ;;  %4001 = vmatpush3.bf16.msra.mxu1 %v4485_v51  ;;  %v1355_v24 = vmax.f32 %v1169_v56, 0.0  ;;  %v1357_v22 = vmax.f32 %v1282_v57, 0.0 }
 0x48f   :  { %v1358_v11 = vmax.f32 %v1171_v61, 0.0  ;;  %v1360_v19 = vmax.f32 %v1284_v63, 0.0  ;;  %2210 = vmatprep.subr.bf16.mxu0 %v4458_v49  ;;  %4002 = vmatprep.subr.bf16.mxu1 %v4489_v50  ;;  %v4500_v49 = vld [vmem:[#allocation11 + $0x200] ss:$12 sps:$4 sm:$0xff]  }
 0x490   :  { %v1359_v12 = vmax.f32 %v1173_v4, 0.0  ;;  %v1361_v15 = vmax.f32 %v1286_v7, 0.0 }
 0x491   :  { %v1410_v36 = vpack.c.bf16 %v1358_v11, %v1354_v9  ;;  %v5437_v16 = vpack.c.bf16 %v1360_v19, %v1356_v10  ;;  %v4465_v10 = vld [vmem:[#allocation11 + $0x210] ss:$12 sps:$4 sm:$0xff]   ;;  %v4505_v11 = vld [vmem:[#allocation11 + $0x218] ss:$12 sps:$4 sm:$0xff]  }
 0x492   :  { %v1411_v53 = vpack.c.bf16 %v1359_v12, %v1355_v24  ;;  %v5439_v29 = vpack.c.bf16 %v1361_v15, %v1357_v22  ;;  %2211 = vmatpush1.bf16.msra.mxu0 %v4456_v8  ;;  %v1176_v17 = vpop.f32.mrb[28].mxu0  ;;  %v1289_v20 = vpop.f32.mrb[60].mxu1  ;;  %4003 = vmatpush3.bf16.msra.mxu1 %v4490_v35  ;;  %v4470_v12 = vld [vmem:[#allocation11 + $0x22c] ss:$12 sps:$4 sm:$0xff]   ;;  %v4509_v15 = vld [vmem:[#allocation11 + $0x2f0] ss:$12 sps:$4 sm:$0xff]  }
 0x493   :  { %v1177_v54 = vadd.f32 %v1176_v17, %v5394_v60  ;;  %v1290_v26 = vadd.f32 %v1289_v20, %v5398_v47  ;;  %v1178_v18 = vpop.f32.mrb[29].mxu0  ;;  %v1291_v31 = vpop.f32.mrb[61].mxu1  ;;  %2212 = vmatprep.subr.bf16.mxu0 %v4461_v6  ;;  %4004 = vmatprep.subr.bf16.mxu1 %v4494_v0 }
 0x494   :  { %v1179_v33 = vadd.f32 %v1178_v18, %v5401_v32  ;;  %v1292_v40 = vadd.f32 %v1291_v31, %v5403_v5  ;;  %v1180_v25 = vpop.f32.mrb[30].mxu0  ;;  %v1293_v41 = vpop.f32.mrb[62].mxu1  ;;  %2143 = vmatprep.mubr.bf16.mxu0 %v1411_v53  ;;  %2365 = vmatprep.mubr.bf16.mxu1 %v1411_v53 }
 0x495   :  { %v1181_v14 = vadd.f32 %v1180_v25, %v5394_v60  ;;  %v1294_v52 = vadd.f32 %v1293_v41, %v5398_v47  ;;  %v1182_v39 = vpop.f32.mrb[31].mxu0  ;;  %v1295_v51 = vpop.f32.mrb[63].mxu1  ;;  %2144 = vmatmul.mubr.bf16.gmra.mrb[56].mxu0 %v1410_v36  ;;  %2366 = vmatmul.mubr.bf16.gmra.mrb[88].mxu1 %v1410_v36  ;;  %v1362_v50 = vmax.f32 %v1177_v54, 0.0  ;;  %v1364_v56 = vmax.f32 %v1290_v26, 0.0 }
 0x496   :  { %v1183_v45 = vadd.f32 %v1182_v39, %v5401_v32  ;;  %v1296_v55 = vadd.f32 %v1295_v51, %v5403_v5  ;;  %2213 = vmatpush1.bf16.msra.mxu0 %v4459_v34  ;;  %4005 = vmatpush3.bf16.msra.mxu1 %v4495_v23  ;;  %v1363_v61 = vmax.f32 %v1179_v33, 0.0  ;;  %v1365_v63 = vmax.f32 %v1292_v40, 0.0 }
 0x497   :  { %v1366_v57 = vmax.f32 %v1181_v14, 0.0  ;;  %v1368_v58 = vmax.f32 %v1294_v52, 0.0  ;;  %2214 = vmatprep.subr.bf16.mxu0 %v4464_v38  ;;  %4006 = vmatprep.subr.bf16.mxu1 %v4499_v48  ;;  %v4468_v38 = vld [vmem:[#allocation11 + $0x228] ss:$12 sps:$4 sm:$0xff]   ;;  %v4510_v48 = vld [vmem:[#allocation11 + $0x230] ss:$12 sps:$4 sm:$0xff]  }
 0x498   :  { %v1367_v30 = vmax.f32 %v1183_v45, 0.0  ;;  %v1369_v3 = vmax.f32 %v1296_v55, 0.0  ;;  %v4473_v14 = vld [vmem:[#allocation11 + $0x244] ss:$12 sps:$4 sm:$0xff]  }
 0x499   :  { %v1414_v4 = vpack.c.bf16 %v1366_v57, %v1362_v50  ;;  %v5449_v7 = vpack.c.bf16 %v1368_v58, %v1364_v56  ;;  %v4471_v57 = vld [vmem:[#allocation11 + $0x240] ss:$12 sps:$4 sm:$0xff]  }
 0x49a   :  { %v1415_v8 = vpack.c.bf16 %v1367_v30, %v1363_v61  ;;  %v5451_v6 = vpack.c.bf16 %v1369_v3, %v1365_v63  ;;  %2215 = vmatpush1.bf16.msra.mxu0 %v4462_v27  ;;  %v1186_v35 = vpop.f32.mrb[32].mxu0  ;;  %v1299_v9 = vpop.f32.mrb[64].mxu1  ;;  %4007 = vmatpush3.bf16.msra.mxu1 %v4500_v49  ;;  %v4478_v30 = vld [vmem:[#allocation11 + $0x25c] ss:$12 sps:$4 sm:$0xff]  }
 0x49b   :  { %v1187_v19 = vadd.f32 %v1186_v35, %v5394_v60  ;;  %v1300_v0 = vadd.f32 %v1299_v9, %v5398_v47  ;;  %v1188_v24 = vpop.f32.mrb[33].mxu0  ;;  %v1301_v22 = vpop.f32.mrb[65].mxu1  ;;  %2216 = vmatprep.subr.bf16.mxu0 %v4467_v28  ;;  %4008 = vmatprep.subr.bf16.mxu1 %v4504_v59 }
 0x49c   :  { %v1189_v36 = vadd.f32 %v1188_v24, %v5401_v32  ;;  %v1302_v53 = vadd.f32 %v1301_v22, %v5403_v5  ;;  %v1190_v17 = vpop.f32.mrb[34].mxu0  ;;  %v1303_v20 = vpop.f32.mrb[66].mxu1  ;;  %2153 = vmatprep.mubr.bf16.mxu0 %v1415_v8  ;;  %2373 = vmatprep.mubr.bf16.mxu1 %v1415_v8  ;;  %v4476_v22 = vld [vmem:[#allocation11 + $0x258] ss:$12 sps:$4 sm:$0xff]  }
 0x49d   :  { %v1191_v34 = vadd.f32 %v1190_v17, %v5394_v60  ;;  %v1304_v23 = vadd.f32 %v1303_v20, %v5398_v47  ;;  %v1192_v54 = vpop.f32.mrb[35].mxu0  ;;  %v1305_v26 = vpop.f32.mrb[67].mxu1  ;;  %2154 = vmatmul.mubr.bf16.gmra.mrb[60].mxu0 %v1414_v4  ;;  %2374 = vmatmul.mubr.bf16.gmra.mrb[92].mxu1 %v1414_v4  ;;  %v1370_v33 = vmax.f32 %v1187_v19, 0.0  ;;  %v1372_v40 = vmax.f32 %v1300_v0, 0.0  ;;  %v4483_v17 = vld [vmem:[#allocation11 + $0x274] ss:$12 sps:$4 sm:$0xff]  }
 0x49e   :  { %v1193_v18 = vadd.f32 %v1192_v54, %v5401_v32  ;;  %v1306_v31 = vadd.f32 %v1305_v26, %v5403_v5  ;;  %2217 = vmatpush1.bf16.msra.mxu0 %v4465_v10  ;;  %4009 = vmatpush3.bf16.msra.mxu1 %v4505_v11  ;;  %v1371_v52 = vmax.f32 %v1189_v36, 0.0  ;;  %v1373_v39 = vmax.f32 %v1302_v53, 0.0 }
 0x49f   :  { %v1374_v25 = vmax.f32 %v1191_v34, 0.0  ;;  %v1376_v41 = vmax.f32 %v1304_v23, 0.0  ;;  %2218 = vmatprep.subr.bf16.mxu0 %v4470_v12  ;;  %4010 = vmatprep.subr.bf16.mxu1 %v4509_v15 }
 0x4a0   :  { %v1375_v51 = vmax.f32 %v1193_v18, 0.0  ;;  %v1377_v45 = vmax.f32 %v1306_v31, 0.0 }
 0x4a1   :  { %v1418_v55 = vpack.c.bf16 %v1374_v25, %v1370_v33  ;;  %v5461_v27 = vpack.c.bf16 %v1376_v41, %v1372_v40  ;;  %v4481_v40 = vld [vmem:[#allocation11 + $0x270] ss:$12 sps:$4 sm:$0xff]  }
 0x4a2   :  { %v1419_v28 = vpack.c.bf16 %v1375_v51, %v1371_v52  ;;  %v5463_v49 = vpack.c.bf16 %v1377_v45, %v1373_v39  ;;  %2219 = vmatpush1.bf16.msra.mxu0 %v4468_v38  ;;  %v1196_v50 = vpop.f32.mrb[36].mxu0  ;;  %v1309_v56 = vpop.f32.mrb[68].mxu1  ;;  %4011 = vmatpush3.bf16.msra.mxu1 %v4510_v48  ;;  %v4488_v39 = vld [vmem:[#allocation11 + $0x28c] ss:$12 sps:$4 sm:$0xff]  }
 0x4a3   :  { %v1197_v58 = vadd.f32 %v1196_v50, %v5394_v60  ;;  %v1310_v59 = vadd.f32 %v1309_v56, %v5398_v47  ;;  %v1198_v61 = vpop.f32.mrb[37].mxu0  ;;  %v1311_v63 = vpop.f32.mrb[69].mxu1  ;;  %2220 = vmatprep.subr.bf16.mxu0 %v4473_v14 }
 0x4a4   :  { %v1199_v3 = vadd.f32 %v1198_v61, %v5401_v32  ;;  %v1312_v4 = vadd.f32 %v1311_v63, %v5403_v5  ;;  %v1200_v8 = vpop.f32.mrb[38].mxu0  ;;  %v1313_v35 = vpop.f32.mrb[70].mxu1  ;;  %2163 = vmatprep.mubr.bf16.mxu0 %v1419_v28  ;;  %2381 = vmatprep.mubr.bf16.mxu1 %v1419_v28  ;;  %v4486_v63 = vld [vmem:[#allocation11 + $0x288] ss:$12 sps:$4 sm:$0xff]  }
 0x4a5   :  { %v1201_v9 = vadd.f32 %v1200_v8, %v5394_v60  ;;  %v1314_v10 = vadd.f32 %v1313_v35, %v5398_v47  ;;  %v1202_v11 = vpop.f32.mrb[39].mxu0  ;;  %v1315_v19 = vpop.f32.mrb[71].mxu1  ;;  %2164 = vmatmul.mubr.bf16.gmra.mrb[64].mxu0 %v1418_v55  ;;  %2382 = vmatmul.mubr.bf16.gmra.mrb[96].mxu1 %v1418_v55  ;;  %v1378_v12 = vmax.f32 %v1197_v58, 0.0  ;;  %v1380_v15 = vmax.f32 %v1310_v59, 0.0  ;;  %v4493_v35 = vld [vmem:[#allocation11 + $0x2a4] ss:$12 sps:$4 sm:$0xff]  }
 0x4a6   :  { %v1203_v0 = vadd.f32 %v1202_v11, %v5401_v32  ;;  %v1316_v24 = vadd.f32 %v1315_v19, %v5403_v5  ;;  %2221 = vmatpush1.bf16.msra.mxu0 %v4471_v57  ;;  %v1379_v20 = vmax.f32 %v1199_v3, 0.0  ;;  %v1381_v34 = vmax.f32 %v1312_v4, 0.0 }
 0x4a7   :  { %v1382_v36 = vmax.f32 %v1201_v9, 0.0  ;;  %v1384_v53 = vmax.f32 %v1314_v10, 0.0  ;;  %2222 = vmatprep.subr.bf16.mxu0 %v4478_v30 }
 0x4a8   :  { %v1383_v23 = vmax.f32 %v1203_v0, 0.0  ;;  %v1385_v54 = vmax.f32 %v1316_v24, 0.0 }
 0x4a9   :  { %v1422_v26 = vpack.c.bf16 %v1382_v36, %v1378_v12  ;;  %v5473_v18 = vpack.c.bf16 %v1384_v53, %v1380_v15  ;;  %v4491_v53 = vld [vmem:[#allocation11 + $0x2a0] ss:$12 sps:$4 sm:$0xff]  }
 0x4aa   :  { %v1423_v31 = vpack.c.bf16 %v1383_v23, %v1379_v20  ;;  %v5475_v38 = vpack.c.bf16 %v1385_v54, %v1381_v34  ;;  %2223 = vmatpush1.bf16.msra.mxu0 %v4476_v22  ;;  %v1206_v48 = vpop.f32.mrb[40].mxu0  ;;  %v1319_v33 = vpop.f32.mrb[72].mxu1  ;;  %v4498_v54 = vld [vmem:[#allocation11 + $0x2bc] ss:$12 sps:$4 sm:$0xff]  }
 0x4ab   :  { %v1207_v25 = vadd.f32 %v1206_v48, %v5394_v60  ;;  %v1320_v41 = vadd.f32 %v1319_v33, %v5398_v47  ;;  %v1208_v14 = vpop.f32.mrb[41].mxu0  ;;  %v1321_v52 = vpop.f32.mrb[73].mxu1  ;;  %2224 = vmatprep.subr.bf16.mxu0 %v4483_v17 }
 0x4ac   :  { %v1209_v51 = vadd.f32 %v1208_v14, %v5401_v32  ;;  %v1322_v45 = vadd.f32 %v1321_v52, %v5403_v5  ;;  %v1210_v55 = vpop.f32.mrb[42].mxu0  ;;  %v1323_v28 = vpop.f32.mrb[74].mxu1  ;;  %2173 = vmatprep.mubr.bf16.mxu0 %v1423_v31  ;;  %2389 = vmatprep.mubr.bf16.mxu1 %v1423_v31 }
 0x4ad   :  { %v1211_v50 = vadd.f32 %v1210_v55, %v5394_v60  ;;  %v1324_v56 = vadd.f32 %v1323_v28, %v5398_v47  ;;  %v1212_v57 = vpop.f32.mrb[43].mxu0  ;;  %v1325_v58 = vpop.f32.mrb[75].mxu1  ;;  %2174 = vmatmul.mubr.bf16.gmra.mrb[68].mxu0 %v1422_v26  ;;  %2390 = vmatmul.mubr.bf16.gmra.mrb[100].mxu1 %v1422_v26  ;;  %v1386_v30 = vmax.f32 %v1207_v25, 0.0  ;;  %v1388_v3 = vmax.f32 %v1320_v41, 0.0 }
 0x4ae   :  { %v1213_v59 = vadd.f32 %v1212_v57, %v5401_v32  ;;  %v1326_v61 = vadd.f32 %v1325_v58, %v5403_v5  ;;  %2225 = vmatpush1.bf16.msra.mxu0 %v4481_v40  ;;  %v1387_v9 = vmax.f32 %v1209_v51, 0.0  ;;  %v1389_v10 = vmax.f32 %v1322_v45, 0.0  ;;  %v4496_v51 = vld [vmem:[#allocation11 + $0x2b8] ss:$12 sps:$4 sm:$0xff]  }
 0x4af   :  { %v1390_v4 = vmax.f32 %v1211_v50, 0.0  ;;  %v1392_v8 = vmax.f32 %v1324_v56, 0.0  ;;  %2226 = vmatprep.subr.bf16.mxu0 %v4488_v39  ;;  %v4503_v56 = vld [vmem:[#allocation11 + $0x2d4] ss:$12 sps:$4 sm:$0xff]  }
 0x4b0   :  { %v1391_v11 = vmax.f32 %v1213_v59, 0.0  ;;  %v1393_v19 = vmax.f32 %v1326_v61, 0.0 }
 0x4b1   :  { %v1426_v0 = vpack.c.bf16 %v1390_v4, %v1386_v30  ;;  %v5485_v24 = vpack.c.bf16 %v1392_v8, %v1388_v3  ;;  %v4506_v3 = vld [vmem:[#allocation11 + $0x2e8] ss:$12 sps:$4 sm:$0xff]   ;;  %v4531_v4 = vld [vmem:[#allocation12 + $0x64] ss:$8 sps:$4 sm:$0xff]  }
 0x4b2   :  { %v1427_v22 = vpack.c.bf16 %v1391_v11, %v1387_v9  ;;  %v5487_v12 = vpack.c.bf16 %v1393_v19, %v1389_v10  ;;  %2227 = vmatpush1.bf16.msra.mxu0 %v4486_v63  ;;  %v1216_v15 = vpop.f32.mrb[44].mxu0  ;;  %v1329_v36 = vpop.f32.mrb[76].mxu1  ;;  %v4529_v8 = vld [vmem:[#allocation12 + $0x60] ss:$8 sps:$4 sm:$0xff]   ;;  %v4532_v9 = vld [vmem:[#allocation12 + $0x70] ss:$8 sps:$4 sm:$0xff]  }
 0x4b3   :  { %v1217_v17 = vadd.f32 %v1216_v15, %v5394_v60  ;;  %v1330_v20 = vadd.f32 %v1329_v36, %v5398_v47  ;;  %v1218_v34 = vpop.f32.mrb[45].mxu0  ;;  %v1331_v23 = vpop.f32.mrb[77].mxu1  ;;  %2228 = vmatprep.subr.bf16.mxu0 %v4493_v35  ;;  %v4534_v35 = vld [vmem:[#allocation12 + $0x74] ss:$8 sps:$4 sm:$0xff]   ;;  %v4537_v10 = vld [vmem:[#allocation12 + $0x84] ss:$8 sps:$4 sm:$0xff]  }
 0x4b4   :  { %v1219_v26 = vadd.f32 %v1218_v34, %v5401_v32  ;;  %v1332_v31 = vadd.f32 %v1331_v23, %v5403_v5  ;;  %v1220_v48 = vpop.f32.mrb[46].mxu0  ;;  %v1333_v33 = vpop.f32.mrb[78].mxu1  ;;  %2183 = vmatprep.mubr.bf16.mxu0 %v1427_v22  ;;  %2397 = vmatprep.mubr.bf16.mxu1 %v1427_v22  ;;  %v4535_v11 = vld [vmem:[#allocation12 + $0x80] ss:$8 sps:$4 sm:$0xff]   ;;  %v4540_v19 = vld [vmem:[#allocation12 + $0x94] ss:$8 sps:$4 sm:$0xff]  }
 0x4b5   :  { %v1221_v40 = vadd.f32 %v1220_v48, %v5394_v60  ;;  %v1334_v25 = vadd.f32 %v1333_v33, %v5398_v47  ;;  %v1222_v41 = vpop.f32.mrb[47].mxu0  ;;  %v1335_v14 = vpop.f32.mrb[79].mxu1  ;;  %2184 = vmatmul.mubr.bf16.gmra.mrb[72].mxu0 %v1426_v0  ;;  %2398 = vmatmul.mubr.bf16.gmra.mrb[104].mxu1 %v1426_v0  ;;  %v1394_v45 = vmax.f32 %v1217_v17, 0.0  ;;  %v1396_v55 = vmax.f32 %v1330_v20, 0.0  ;;  %v4538_v0 = vld [vmem:[#allocation12 + $0x90] ss:$8 sps:$4 sm:$0xff]  }
 0x4b6   :  { %v1223_v52 = vadd.f32 %v1222_v41, %v5401_v32  ;;  %v1336_v39 = vadd.f32 %v1335_v14, %v5403_v5  ;;  %2229 = vmatpush1.bf16.msra.mxu0 %v4491_v53  ;;  %v1395_v57 = vmax.f32 %v1219_v26, 0.0  ;;  %v1397_v60 = vmax.f32 %v1332_v31, 0.0  ;;  %v4501_v32 = vld [vmem:[#allocation11 + $0x2d0] ss:$12 sps:$4 sm:$0xff]   ;;  %v4508_v5 = vld [vmem:[#allocation11 + $0x2ec] ss:$12 sps:$4 sm:$0xff]  }
 0x4b7   :  { %v1398_v28 = vmax.f32 %v1221_v40, 0.0  ;;  %v1400_v50 = vmax.f32 %v1334_v25, 0.0  ;;  %2230 = vmatprep.subr.bf16.mxu0 %v4498_v54  ;;  %v4541_v22 = vld [vmem:[#allocation12 + $0xa0] ss:$8 sps:$4 sm:$0xff]   ;;  %v4544_v15 = vld [vmem:[#allocation12 + $0xb0] ss:$8 sps:$4 sm:$0xff]  }
 0x4b8   :  { %v1399_v58 = vmax.f32 %v1223_v52, 0.0  ;;  %v1401_v47 = vmax.f32 %v1336_v39, 0.0  ;;  %v4549_v36 = vld [vmem:[#allocation12 + $0xc4] ss:$8 sps:$4 sm:$0xff]   ;;  %v4547_v53 = vld [vmem:[#allocation12 + $0xc0] ss:$8 sps:$4 sm:$0xff]  }
 0x4b9   :  { %v1430_v59 = vpack.c.bf16 %v1398_v28, %v1394_v45  ;;  %v5497_v61 = vpack.c.bf16 %v1400_v50, %v1396_v55  ;;  %v4552_v17 = vld [vmem:[#allocation12 + $0xd4] ss:$8 sps:$4 sm:$0xff]   ;;  %v4550_v20 = vld [vmem:[#allocation12 + $0xd0] ss:$8 sps:$4 sm:$0xff]   ;;  %v4555_v34 = vld [vmem:[#allocation12 + $0xe4] ss:$8 sps:$4 sm:$0xff]  }
 0x4ba   :  { %v1431_v63 = vpack.c.bf16 %v1399_v58, %v1395_v57  ;;  %v1433_v30 = vpack.c.bf16 %v1401_v47, %v1397_v60  ;;  %2231 = vmatpush1.bf16.msra.mxu0 %v4496_v51  ;;  %v4553_v23 = vld [vmem:[#allocation12 + $0xe0] ss:$8 sps:$4 sm:$0xff]   ;;  %v4558_v54 = vld [vmem:[#allocation12 + $0xf4] ss:$8 sps:$4 sm:$0xff]   ;;  %v4556_v26 = vld [vmem:[#allocation12 + $0xf0] ss:$8 sps:$4 sm:$0xff]  }
 0x4bb   :  { %2232 = vmatprep.subr.bf16.mxu0 %v4503_v56  ;;  %v4561_v31 = vld [vmem:[#allocation12 + $0x104] ss:$8 sps:$4 sm:$0xff]  }
 0x4bc   :  { %2193 = vmatprep.mubr.bf16.mxu0 %v1431_v63  ;;  %2405 = vmatprep.mubr.bf16.mxu1 %v1431_v63 }
 0x4bd   :  { %2194 = vmatmul.mubr.bf16.gmra.mrb[76].mxu0 %v1430_v59  ;;  %2406 = vmatmul.mubr.bf16.gmra.mrb[108].mxu1 %v1430_v59 }
 0x4be   :  { %2233 = vmatpush1.bf16.msra.mxu0 %v4501_v32  ;;  %2236 = vmatprep.mubr.bf16.mxu0 %v5415_v2 }
 0x4bf   :  { %2446 = vmatprep.mubr.bf16.mxu1 %v5415_v2  ;;  %2234 = vmatprep.subr.bf16.mxu0 %v4508_v5  ;;  %v4511_v2 = vld [vmem:[#allocation12] ss:$8 sps:$4 sm:$0xff]  }
 0x4c2   :  { %2235 = vmatpush1.bf16.msra.mxu0 %v4506_v3 }
 0x4c5   :  { %2237 = vmatmul.mubr.bf16.vlgmr.msra.gmra.mrb[48].mxu0 %v5413_v21  ;;  %2447 = vmatmul.mubr.bf16.vlgmr.msra.gmra.mrb[112].mxu1 %v5413_v21  ;;  %v4513_v21 = vld [vmem:[#allocation12 + $0x4] ss:$8 sps:$4 sm:$0xff]  }
 0x4c6   :  { %2246 = vmatprep.mubr.bf16.mxu0 %v5427_v13  ;;  %2454 = vmatprep.mubr.bf16.mxu1 %v5427_v13  ;;  %v4514_v13 = vld [vmem:[#allocation12 + $0x10] ss:$8 sps:$4 sm:$0xff]  }
 0x4c7   :  { %2883 = vmatprep.subr.bf16.mxu0 %v4513_v21 }
 0x4c8   :  { %2884 = vmatpush1.bf16.msra.mxu0 %v4511_v2 }
 0x4cd   :  { %2247 = vmatmul.mubr.bf16.gmra.mrb[52].mxu0 %v5425_v37  ;;  %2455 = vmatmul.mubr.bf16.gmra.mrb[116].mxu1 %v5425_v37  ;;  %v4516_v37 = vld [vmem:[#allocation12 + $0x14] ss:$8 sps:$4 sm:$0xff]  }
 0x4ce   :  { %2256 = vmatprep.mubr.bf16.mxu0 %v5439_v29  ;;  %2462 = vmatprep.mubr.bf16.mxu1 %v5439_v29  ;;  %v4517_v29 = vld [vmem:[#allocation12 + $0x20] ss:$8 sps:$4 sm:$0xff]  }
 0x4cf   :  { %2885 = vmatprep.subr.bf16.mxu0 %v4516_v37 }
 0x4d0   :  { %2886 = vmatpush1.bf16.msra.mxu0 %v4514_v13 }
 0x4d5   :  { %2257 = vmatmul.mubr.bf16.gmra.mrb[56].mxu0 %v5437_v16  ;;  %2463 = vmatmul.mubr.bf16.gmra.mrb[120].mxu1 %v5437_v16  ;;  %v4519_v16 = vld [vmem:[#allocation12 + $0x24] ss:$8 sps:$4 sm:$0xff]  }
 0x4d6   :  { %2266 = vmatprep.mubr.bf16.mxu0 %v5451_v6  ;;  %2470 = vmatprep.mubr.bf16.mxu1 %v5451_v6  ;;  %v4520_v6 = vld [vmem:[#allocation12 + $0x30] ss:$8 sps:$4 sm:$0xff]  }
 0x4d7   :  { %2887 = vmatprep.subr.bf16.mxu0 %v4519_v16 }
 0x4d8   :  { %2888 = vmatpush1.bf16.msra.mxu0 %v4517_v29 }
 0x4dd   :  { %2267 = vmatmul.mubr.bf16.gmra.mrb[60].mxu0 %v5449_v7  ;;  %2471 = vmatmul.mubr.bf16.gmra.mrb[124].mxu1 %v5449_v7  ;;  %v4522_v7 = vld [vmem:[#allocation12 + $0x34] ss:$8 sps:$4 sm:$0xff]  }
 0x4de   :  { %2276 = vmatprep.mubr.bf16.mxu0 %v5463_v49  ;;  %2478 = vmatprep.mubr.bf16.mxu1 %v5463_v49  ;;  %v4523_v49 = vld [vmem:[#allocation12 + $0x40] ss:$8 sps:$4 sm:$0xff]  }
 0x4df   :  { %2889 = vmatprep.subr.bf16.mxu0 %v4522_v7 }
 0x4e0   :  { %2890 = vmatpush1.bf16.msra.mxu0 %v4520_v6 }
 0x4e5   :  { %2277 = vmatmul.mubr.bf16.gmra.mrb[64].mxu0 %v5461_v27  ;;  %2479 = vmatmul.mubr.bf16.gmra.mrb[128].mxu1 %v5461_v27  ;;  %v4525_v27 = vld [vmem:[#allocation12 + $0x44] ss:$8 sps:$4 sm:$0xff]  }
 0x4e6   :  { %2286 = vmatprep.mubr.bf16.mxu0 %v5475_v38  ;;  %2486 = vmatprep.mubr.bf16.mxu1 %v5475_v38  ;;  %v4528_v38 = vld [vmem:[#allocation12 + $0x54] ss:$8 sps:$4 sm:$0xff]  }
 0x4e7   :  { %2891 = vmatprep.subr.bf16.mxu0 %v4525_v27 }
 0x4e8   :  { %2892 = vmatpush1.bf16.msra.mxu0 %v4523_v49 }
 0x4e9   :  { %2893 = vmatprep.subr.bf16.mxu0 %v4528_v38 }
 0x4ed   :  { %2287 = vmatmul.mubr.bf16.gmra.mrb[68].mxu0 %v5473_v18  ;;  %2487 = vmatmul.mubr.bf16.gmra.mrb[132].mxu1 %v5473_v18  ;;  %v4526_v18 = vld [vmem:[#allocation12 + $0x50] ss:$8 sps:$4 sm:$0xff]  }
 0x4ee   :  { %2296 = vmatprep.mubr.bf16.mxu0 %v5487_v12  ;;  %2494 = vmatprep.mubr.bf16.mxu1 %v5487_v12  ;;  %v4546_v12 = vld [vmem:[#allocation12 + $0xb4] ss:$8 sps:$4 sm:$0xff]  }
 0x4ef   :  { %2894 = vmatpush1.bf16.msra.mxu0 %v4526_v18 }
 0x4f0   :  { %2895 = vmatprep.subr.bf16.mxu0 %v4531_v4 }
 0x4f3   :  { %2896 = vmatpush1.bf16.msra.mxu0 %v4529_v8 }
 0x4f4   :  { %2897 = vmatprep.subr.bf16.mxu0 %v4534_v35 }
 0x4f5   :  { %2297 = vmatmul.mubr.bf16.gmra.mrb[72].mxu0 %v5485_v24  ;;  %2495 = vmatmul.mubr.bf16.gmra.mrb[136].mxu1 %v5485_v24  ;;  %v4543_v24 = vld [vmem:[#allocation12 + $0xa4] ss:$8 sps:$4 sm:$0xff]  }
 0x4f6   :  { %2306 = vmatprep.mubr.bf16.mxu0 %v1433_v30  ;;  %2502 = vmatprep.mubr.bf16.mxu1 %v1433_v30 }
 0x4f7   :  { %2898 = vmatpush1.bf16.msra.mxu0 %v4532_v9 }
 0x4f8   :  { %2899 = vmatprep.subr.bf16.mxu0 %v4537_v10 }
 0x4fb   :  { %2900 = vmatpush1.bf16.msra.mxu0 %v4535_v11 }
 0x4fc   :  { %2901 = vmatprep.subr.bf16.mxu0 %v4540_v19 }
 0x4fd   :  { %2307 = vmatmul.mubr.bf16.gmra.mrb[76].mxu0 %v5497_v61  ;;  %2503 = vmatmul.mubr.bf16.gmra.mrb[140].mxu1 %v5497_v61 }
 0x4ff   :  { %2902 = vmatpush1.bf16.msra.mxu0 %v4538_v0 }
 0x500   :  { %2903 = vmatprep.subr.bf16.mxu0 %v4543_v24 }
 0x503   :  { %2904 = vmatpush1.bf16.msra.mxu0 %v4541_v22  ;;  %v1562_v22 = vld [vmem:[%s5818_s8] sm:$0x7] }
 0x504   :  { %2905 = vmatprep.subr.bf16.mxu0 %v4546_v12 }
 0x507   :  { %2906 = vmatpush1.bf16.msra.mxu0 %v4544_v15 }
 0x508   :  { %2907 = vmatprep.subr.bf16.mxu0 %v4549_v36  ;;  %v5563_v36 = vrot.slane %v1562_v22, %v5157_v44 }
 0x50b   :  { %2908 = vmatpush1.bf16.msra.mxu0 %v4547_v53  ;;  %v5567_v53 = vrot.slane %v1562_v22, %v942_v62 }
 0x50c   :  { %2909 = vmatprep.subr.bf16.mxu0 %v4552_v17  ;;  %v5570_v17 = vrot.slane %v1562_v22, %v5163_v46 }
 0x50f   :  { %2910 = vmatpush1.bf16.msra.mxu0 %v4550_v20 }
 0x510   :  { %2911 = vmatprep.subr.bf16.mxu0 %v4555_v34 }
 0x513   :  { %2912 = vmatpush1.bf16.msra.mxu0 %v4553_v23 }
 0x514   :  { %2913 = vmatprep.subr.bf16.mxu0 %v4558_v54 }
 0x517   :  { %2914 = vmatpush1.bf16.msra.mxu0 %v4556_v26 }
 0x518   :  { %2996 = vmatprep.subr.bf16.mxu0 %v4561_v31 }
 0x556   :  { %v3948_v48 = vpop.f32.mrb[80].mxu1 }
 0x557   :  { %v3949_v33 = vpop.f32.mrb[81].mxu1 }
 0x558   :  { %v3950_v40 = vadd.f32 %v3949_v33, %v3948_v48  ;;  %v3951_v25 = vpop.f32.mrb[82].mxu1 }
 0x559   :  { %v3952_v41 = vpop.f32.mrb[83].mxu1 }
 0x55a   :  { %v5529_v14 = vadd.f32 %v3952_v41, %v3951_v25  ;;  %v2352_v31 = vadd.f32 %v3950_v40, %v5567_v53 }
 0x560   :  { %v3954_v52 = vpop.f32.mrb[84].mxu1 }
 0x561   :  { %v3955_v39 = vpop.f32.mrb[85].mxu1 }
 0x562   :  { %v5531_v51 = vadd.f32 %v3955_v39, %v3954_v52  ;;  %v3957_v45 = vpop.f32.mrb[86].mxu1 }
 0x563   :  { %v3958_v55 = vpop.f32.mrb[87].mxu1 }
 0x564   :  { %v5533_v28 = vadd.f32 %v3958_v55, %v3957_v45  ;;  %v4583_v45 = vld [vmem:[#allocation14 + $0x40] sm:$0xff]  }
 0x565   :  { %v4584_v55 = vld [vmem:[#allocation14] sm:$0xff]   ;;  %4060 = vmatprep.subr.bf16.mxu1 %v4583_v45 }
 0x566   :  { %4061 = vmatpush3.bf16.msra.mxu1 %v4584_v55  ;;  %v4567_v45 = vld [vmem:[#allocation12 + $0x124] ss:$8 sps:$4 sm:$0xff]  }
 0x568   :  { %v3960_v50 = vpop.f32.mrb[88].mxu1 }
 0x569   :  { %v3961_v56 = vpop.f32.mrb[89].mxu1 }
 0x56a   :  { %v5535_v57 = vadd.f32 %v3961_v56, %v3960_v50  ;;  %v3963_v60 = vpop.f32.mrb[90].mxu1  ;;  %v4585_v50 = vld [vmem:[#allocation14 + $0x48] sm:$0xff]   ;;  %v2355_v56 = vadd.f32 %v5529_v14, %v5567_v53 }
 0x56b   :  { %v3964_v58 = vpop.f32.mrb[91].mxu1  ;;  %4062 = vmatprep.subr.bf16.mxu1 %v4585_v50 }
 0x56c   :  { %v5537_v47 = vadd.f32 %v3964_v58, %v3963_v60 }
 0x570   :  { %v3966_v59 = vpop.f32.mrb[92].mxu1 }
 0x571   :  { %v3967_v61 = vpop.f32.mrb[93].mxu1 }
 0x572   :  { %v5539_v63 = vadd.f32 %v3967_v61, %v3966_v59  ;;  %v3969_v30 = vpop.f32.mrb[94].mxu1 }
 0x573   :  { %v3970_v32 = vpop.f32.mrb[95].mxu1 }
 0x574   :  { %v5541_v5 = vadd.f32 %v3970_v32, %v3969_v30 }
 0x578   :  { %v3972_v3 = vpop.f32.mrb[96].mxu1 }
 0x579   :  { %v3973_v21 = vpop.f32.mrb[97].mxu1 }
 0x57a   :  { %v5543_v2 = vadd.f32 %v3973_v21, %v3972_v3  ;;  %v3975_v37 = vpop.f32.mrb[98].mxu1  ;;  %v4586_v21 = vld [vmem:[#allocation14 + $0x8] sm:$0xff]  }
 0x57b   :  { %v3976_v13 = vpop.f32.mrb[99].mxu1  ;;  %4063 = vmatpush3.bf16.msra.mxu1 %v4586_v21  ;;  %v2368_v21 = vadd.f32 %v5535_v57, %v5567_v53 }
 0x57c   :  { %v5545_v16 = vadd.f32 %v3976_v13, %v3975_v37  ;;  %v4587_v13 = vld [vmem:[#allocation14 + $0x50] sm:$0xff]  }
 0x57d   :  { %4064 = vmatprep.subr.bf16.mxu1 %v4587_v13 }
 0x580   :  { %v3978_v29 = vpop.f32.mrb[100].mxu1 }
 0x581   :  { %v3979_v7 = vpop.f32.mrb[101].mxu1 }
 0x582   :  { %v5547_v6 = vadd.f32 %v3979_v7, %v3978_v29  ;;  %v3981_v27 = vpop.f32.mrb[102].mxu1 }
 0x583   :  { %v3982_v49 = vpop.f32.mrb[103].mxu1 }
 0x584   :  { %v5549_v38 = vadd.f32 %v3982_v49, %v3981_v27 }
 0x588   :  { %v3984_v18 = vpop.f32.mrb[104].mxu1 }
 0x589   :  { %v3985_v4 = vpop.f32.mrb[105].mxu1 }
 0x58a   :  { %v5551_v8 = vadd.f32 %v3985_v4, %v3984_v18  ;;  %v3987_v35 = vpop.f32.mrb[106].mxu1  ;;  %v4559_v18 = vld [vmem:[#allocation12 + $0x100] ss:$8 sps:$4 sm:$0xff]   ;;  %v2360_v4 = vadd.f32 %v5531_v51, %v5567_v53  ;;  %v4589_v51 = vld [vmem:[#allocation14 + $0x58] sm:$0xff]  }
 0x58b   :  { %v3988_v9 = vpop.f32.mrb[107].mxu1 }
 0x58c   :  { %v5553_v10 = vadd.f32 %v3988_v9, %v3987_v35 }
 0x590   :  { %v3990_v11 = vpop.f32.mrb[108].mxu1 }
 0x591   :  { %v3991_v19 = vpop.f32.mrb[109].mxu1 }
 0x592   :  { %v5555_v0 = vadd.f32 %v3991_v19, %v3990_v11  ;;  %v3993_v24 = vpop.f32.mrb[110].mxu1  ;;  %v4564_v19 = vld [vmem:[#allocation12 + $0x114] ss:$8 sps:$4 sm:$0xff]  }
 0x593   :  { %v3994_v12 = vpop.f32.mrb[111].mxu1 }
 0x594   :  { %v5560_v15 = vadd.f32 %v3994_v12, %v3993_v24 }
 0x598   :  { %v2238_v20 = vpop.f32.mrb[48].mxu0  ;;  %v4012_v34 = vpop.f32.mrb[112].mxu1 }
 0x599   :  { %v4140_v23 = vadd.f32 %v2238_v20, %v5563_v36  ;;  %v2240_v54 = vpop.f32.mrb[49].mxu0  ;;  %v4013_v26 = vpop.f32.mrb[113].mxu1 }
 0x59a   :  { %v4141_v48 = vadd.f32 %v2240_v54, %v5570_v17  ;;  %v4014_v33 = vadd.f32 %v4013_v26, %v4012_v34  ;;  %v2242_v25 = vpop.f32.mrb[50].mxu0  ;;  %v4015_v41 = vpop.f32.mrb[114].mxu1 }
 0x59b   :  { %v4142_v52 = vadd.f32 %v2242_v25, %v5563_v36  ;;  %v2244_v62 = vpop.f32.mrb[51].mxu0  ;;  %v4016_v39 = vpop.f32.mrb[115].mxu1  ;;  %v2511_v40 = vmax.f32 %v4140_v23, 0.0  ;;  %v4588_v23 = vld [vmem:[#allocation14 + $0x10] sm:$0xff]  }
 0x59c   :  { %v2449_v60 = vadd.f32 %v4014_v33, %v2352_v31  ;;  %v4143_v58 = vadd.f32 %v2244_v62, %v5570_v17  ;;  %v4017_v59 = vadd.f32 %v4016_v39, %v4015_v41  ;;  %v2512_v30 = vmax.f32 %v4141_v48, 0.0  ;;  %4065 = vmatpush3.bf16.msra.mxu1 %v4588_v23  ;;  %v4568_v23 = vld [vmem:[#allocation12 + $0x130] ss:$8 sps:$4 sm:$0xff]  }
 0x59d   :  { %v2514_v61 = vmax.f32 %v4142_v52, 0.0  ;;  %v2363_v48 = vadd.f32 %v5533_v28, %v5567_v53  ;;  %v4562_v52 = vld [vmem:[#allocation12 + $0x110] ss:$8 sps:$4 sm:$0xff]   ;;  %4066 = vmatprep.subr.bf16.mxu1 %v4589_v51 }
 0x59e   :  { %v2515_v32 = vmax.f32 %v4143_v58, 0.0  ;;  %v2452_v3 = vadd.f32 %v4017_v59, %v2355_v56  ;;  %v2513_v29 = vmax.f32 %v2449_v60, 0.0  ;;  %v4590_v60 = vld [vmem:[#allocation14 + $0x18] sm:$0xff]   ;;  %v4591_v59 = vld [vmem:[#allocation14 + $0x60] sm:$0xff]  }
 0x59f   :  { %v2559_v37 = vpack.c.bf16 %v2514_v61, %v2511_v40 }
 0x5a0   :  { %v2560_v7 = vpack.c.bf16 %v2515_v32, %v2512_v30  ;;  %v2516_v27 = vmax.f32 %v2452_v3, 0.0  ;;  %v2248_v49 = vpop.f32.mrb[52].mxu0  ;;  %v4018_v14 = vpop.f32.mrb[116].mxu1  ;;  %v4565_v3 = vld [vmem:[#allocation12 + $0x120] ss:$8 sps:$4 sm:$0xff]   ;;  %4067 = vmatpush3.bf16.msra.mxu1 %v4590_v60 }
 0x5a1   :  { %v4144_v35 = vadd.f32 %v2248_v49, %v5563_v36  ;;  %v2250_v9 = vpop.f32.mrb[53].mxu0  ;;  %v4019_v11 = vpop.f32.mrb[117].mxu1  ;;  %4068 = vmatprep.subr.bf16.mxu1 %v4591_v59 }
 0x5a2   :  { %v5582_v24 = vpack.c.bf16 %v2516_v27, %v2513_v29  ;;  %v4145_v22 = vadd.f32 %v2250_v9, %v5570_v17  ;;  %v4020_v12 = vadd.f32 %v4019_v11, %v4018_v14  ;;  %v2252_v20 = vpop.f32.mrb[54].mxu0  ;;  %v4021_v34 = vpop.f32.mrb[118].mxu1  ;;  %2915 = vmatprep.mubr.bf16.mxu0 %v2560_v7  ;;  %v4570_v7 = vld [vmem:[#allocation12 + $0x134] ss:$8 sps:$4 sm:$0xff]  }
 0x5a3   :  { %v4146_v54 = vadd.f32 %v2252_v20, %v5563_v36  ;;  %v2254_v26 = vpop.f32.mrb[55].mxu0  ;;  %v4022_v31 = vpop.f32.mrb[119].mxu1  ;;  %2916 = vmatmul.mubr.bf16.vlgmr.msra.gmra.mrb[80].mxu0 %v2559_v37  ;;  %v2517_v62 = vmax.f32 %v4144_v35, 0.0  ;;  %v4592_v35 = vld [vmem:[#allocation14 + $0x20] sm:$0xff]  }
 0x5a4   :  { %v2457_v33 = vadd.f32 %v4020_v12, %v2360_v4  ;;  %v4147_v25 = vadd.f32 %v2254_v26, %v5570_v17  ;;  %v4023_v41 = vadd.f32 %v4022_v31, %v4021_v34  ;;  %2997 = vmatpush1.bf16.msra.mxu0 %v4559_v18  ;;  %v2518_v55 = vmax.f32 %v4145_v22, 0.0  ;;  %v4573_v31 = vld [vmem:[#allocation12 + $0x144] ss:$8 sps:$4 sm:$0xff]   ;;  %4069 = vmatpush3.bf16.msra.mxu1 %v4592_v35 }
 0x5a5   :  { %v2520_v39 = vmax.f32 %v4146_v54, 0.0  ;;  %2998 = vmatprep.subr.bf16.mxu0 %v4564_v19  ;;  %v4593_v19 = vld [vmem:[#allocation14 + $0x68] sm:$0xff]   ;;  %v2371_v22 = vadd.f32 %v5537_v47, %v5567_v53 }
 0x5a6   :  { %v2521_v50 = vmax.f32 %v4147_v25, 0.0  ;;  %v2460_v56 = vadd.f32 %v4023_v41, %v2363_v48  ;;  %v2519_v40 = vmax.f32 %v2457_v33, 0.0  ;;  %v4594_v25 = vld [vmem:[#allocation14 + $0x28] sm:$0xff]   ;;  %4070 = vmatprep.subr.bf16.mxu1 %v4593_v19 }
 0x5a7   :  { %v2562_v58 = vpack.c.bf16 %v2520_v39, %v2517_v62 }
 0x5a8   :  { %v2563_v28 = vpack.c.bf16 %v2521_v50, %v2518_v55  ;;  %v2522_v61 = vmax.f32 %v2460_v56, 0.0  ;;  %v2258_v30 = vpop.f32.mrb[56].mxu0  ;;  %v4024_v32 = vpop.f32.mrb[120].mxu1  ;;  %2999 = vmatpush1.bf16.msra.mxu0 %v4562_v52  ;;  %v4595_v52 = vld [vmem:[#allocation14 + $0x70] sm:$0xff]   ;;  %v4571_v50 = vld [vmem:[#allocation12 + $0x140] ss:$8 sps:$4 sm:$0xff]   ;;  %v2376_v56 = vadd.f32 %v5539_v63, %v5567_v53  ;;  %4071 = vmatpush3.bf16.msra.mxu1 %v4594_v25 }
 0x5a9   :  { %v4148_v37 = vadd.f32 %v2258_v30, %v5563_v36  ;;  %v2260_v13 = vpop.f32.mrb[57].mxu0  ;;  %v4025_v29 = vpop.f32.mrb[121].mxu1  ;;  %3000 = vmatprep.subr.bf16.mxu0 %v4567_v45  ;;  %4072 = vmatprep.subr.bf16.mxu1 %v4595_v52 }
 0x5aa   :  { %v4149_v27 = vadd.f32 %v2260_v13, %v5570_v17  ;;  %v4026_v49 = vadd.f32 %v4025_v29, %v4024_v32  ;;  %v2262_v14 = vpop.f32.mrb[58].mxu0  ;;  %v4027_v18 = vpop.f32.mrb[122].mxu1  ;;  %2925 = vmatprep.mubr.bf16.mxu0 %v2563_v28  ;;  %v5593_v4 = vpack.c.bf16 %v2522_v61, %v2519_v40  ;;  %v4576_v40 = vld [vmem:[#allocation12 + $0x154] ss:$8 sps:$4 sm:$0xff]   ;;  %v2379_v29 = vadd.f32 %v5541_v5, %v5567_v53 }
 0x5ab   :  { %v4150_v9 = vadd.f32 %v2262_v14, %v5563_v36  ;;  %v2264_v11 = vpop.f32.mrb[59].mxu0  ;;  %v4028_v57 = vpop.f32.mrb[123].mxu1  ;;  %2926 = vmatmul.mubr.bf16.gmra.mrb[84].mxu0 %v2562_v58  ;;  %v2523_v54 = vmax.f32 %v4148_v37, 0.0  ;;  %v4574_v14 = vld [vmem:[#allocation12 + $0x150] ss:$8 sps:$4 sm:$0xff]  }
 0x5ac   :  { %v2465_v12 = vadd.f32 %v4026_v49, %v2368_v21  ;;  %v4151_v20 = vadd.f32 %v2264_v11, %v5570_v17  ;;  %v4029_v34 = vadd.f32 %v4028_v57, %v4027_v18  ;;  %3001 = vmatpush1.bf16.msra.mxu0 %v4565_v3  ;;  %v2524_v51 = vmax.f32 %v4149_v27, 0.0  ;;  %v4596_v21 = vld [vmem:[#allocation14 + $0x30] sm:$0xff]  }
 0x5ad   :  { %v2526_v26 = vmax.f32 %v4150_v9, 0.0  ;;  %3002 = vmatprep.subr.bf16.mxu0 %v4570_v7  ;;  %v4579_v9 = vld [vmem:[#allocation12 + $0x164] ss:$8 sps:$4 sm:$0xff]   ;;  %4073 = vmatpush3.bf16.msra.mxu1 %v4596_v21 }
 0x5ae   :  { %v2527_v48 = vmax.f32 %v4151_v20, 0.0  ;;  %v2468_v33 = vadd.f32 %v4029_v34, %v2371_v22  ;;  %v2525_v62 = vmax.f32 %v2465_v12, 0.0 }
 0x5af   :  { %v2565_v41 = vpack.c.bf16 %v2526_v26, %v2523_v54  ;;  %v4577_v54 = vld [vmem:[#allocation12 + $0x160] ss:$8 sps:$4 sm:$0xff]  }
 0x5b0   :  { %v2566_v47 = vpack.c.bf16 %v2527_v48, %v2524_v51  ;;  %v2528_v39 = vmax.f32 %v2468_v33, 0.0  ;;  %v2268_v45 = vpop.f32.mrb[60].mxu0  ;;  %v4030_v55 = vpop.f32.mrb[124].mxu1  ;;  %3003 = vmatpush1.bf16.msra.mxu0 %v4568_v23  ;;  %v4582_v48 = vld [vmem:[#allocation12 + $0x174] ss:$8 sps:$4 sm:$0xff]   ;;  %v2384_v33 = vadd.f32 %v5543_v2, %v5567_v53 }
 0x5b1   :  { %v4152_v60 = vadd.f32 %v2268_v45, %v5563_v36  ;;  %v2270_v58 = vpop.f32.mrb[61].mxu0  ;;  %v4031_v59 = vpop.f32.mrb[125].mxu1  ;;  %3004 = vmatprep.subr.bf16.mxu0 %v4573_v31 }
 0x5b2   :  { %v4153_v28 = vadd.f32 %v2270_v58, %v5570_v17  ;;  %v4032_v61 = vadd.f32 %v4031_v59, %v4030_v55  ;;  %v2272_v30 = vpop.f32.mrb[62].mxu0  ;;  %v4033_v32 = vpop.f32.mrb[126].mxu1  ;;  %2935 = vmatprep.mubr.bf16.mxu0 %v2566_v47  ;;  %v5603_v3 = vpack.c.bf16 %v2528_v39, %v2525_v62  ;;  %v4580_v58 = vld [vmem:[#allocation12 + $0x170] ss:$8 sps:$4 sm:$0xff]  }
 0x5b3   :  { %v4154_v37 = vadd.f32 %v2272_v30, %v5563_v36  ;;  %v2274_v13 = vpop.f32.mrb[63].mxu0  ;;  %v4034_v63 = vpop.f32.mrb[127].mxu1  ;;  %2936 = vmatmul.mubr.bf16.gmra.mrb[88].mxu0 %v2565_v41  ;;  %v2529_v18 = vmax.f32 %v4152_v60, 0.0 }
 0x5b4   :  { %v2473_v7 = vadd.f32 %v4032_v61, %v2376_v56  ;;  %v4155_v27 = vadd.f32 %v2274_v13, %v5570_v17  ;;  %v4035_v49 = vadd.f32 %v4034_v63, %v4033_v32  ;;  %3005 = vmatpush1.bf16.msra.mxu0 %v4571_v50  ;;  %v2530_v11 = vmax.f32 %v4153_v28, 0.0 }
 0x5b5   :  { %v2532_v35 = vmax.f32 %v4154_v37, 0.0  ;;  %3006 = vmatprep.subr.bf16.mxu0 %v4576_v40  ;;  %v2387_v50 = vadd.f32 %v5545_v16, %v5567_v53 }
 0x5b6   :  { %v2533_v57 = vmax.f32 %v4155_v27, 0.0  ;;  %v2476_v19 = vadd.f32 %v4035_v49, %v2379_v29  ;;  %v2531_v12 = vmax.f32 %v2473_v7, 0.0  ;;  %v2392_v49 = vadd.f32 %v5547_v6, %v5567_v53 }
 0x5b7   :  { %v2568_v22 = vpack.c.bf16 %v2532_v35, %v2529_v18 }
 0x5b8   :  { %v2569_v20 = vpack.c.bf16 %v2533_v57, %v2530_v11  ;;  %v2534_v34 = vmax.f32 %v2476_v19, 0.0  ;;  %v2278_v23 = vpop.f32.mrb[64].mxu0  ;;  %v4036_v5 = vpop.f32.mrb[128].mxu1  ;;  %3007 = vmatpush1.bf16.msra.mxu0 %v4574_v14 }
 0x5b9   :  { %v4156_v26 = vadd.f32 %v2278_v23, %v5563_v36  ;;  %v2280_v31 = vpop.f32.mrb[65].mxu0  ;;  %v4037_v51 = vpop.f32.mrb[129].mxu1  ;;  %3008 = vmatprep.subr.bf16.mxu0 %v4579_v9 }
 0x5ba   :  { %v4157_v25 = vadd.f32 %v2280_v31, %v5570_v17  ;;  %v4038_v41 = vadd.f32 %v4037_v51, %v4036_v5  ;;  %v2282_v52 = vpop.f32.mrb[66].mxu0  ;;  %v4039_v62 = vpop.f32.mrb[130].mxu1  ;;  %2945 = vmatprep.mubr.bf16.mxu0 %v2569_v20  ;;  %v5613_v47 = vpack.c.bf16 %v2534_v34, %v2531_v12  ;;  %v2395_v12 = vadd.f32 %v5549_v38, %v5567_v53 }
 0x5bb   :  { %v4158_v39 = vadd.f32 %v2282_v52, %v5563_v36  ;;  %v2284_v45 = vpop.f32.mrb[67].mxu0  ;;  %v4040_v55 = vpop.f32.mrb[131].mxu1  ;;  %2946 = vmatmul.mubr.bf16.gmra.mrb[92].mxu0 %v2568_v22  ;;  %v2535_v59 = vmax.f32 %v4156_v26, 0.0  ;;  %v2400_v38 = vadd.f32 %v5551_v8, %v5567_v53 }
 0x5bc   :  { %v2481_v56 = vadd.f32 %v4038_v41, %v2384_v33  ;;  %v4159_v60 = vadd.f32 %v2284_v45, %v5570_v17  ;;  %v4041_v2 = vadd.f32 %v4040_v55, %v4039_v62  ;;  %3009 = vmatpush1.bf16.msra.mxu0 %v4577_v54  ;;  %v2536_v28 = vmax.f32 %v4157_v25, 0.0 }
 0x5bd   :  { %v2538_v40 = vmax.f32 %v4158_v39, 0.0  ;;  %3010 = vmatprep.subr.bf16.mxu0 %v4582_v48 }
 0x5be   :  { %v2539_v61 = vmax.f32 %v4159_v60, 0.0  ;;  %v2484_v30 = vadd.f32 %v4041_v2, %v2387_v50  ;;  %v2537_v21 = vmax.f32 %v2481_v56, 0.0 }
 0x5bf   :  { %v2571_v32 = vpack.c.bf16 %v2538_v40, %v2535_v59 }
 0x5c0   :  { %v2572_v37 = vpack.c.bf16 %v2539_v61, %v2536_v28  ;;  %v2540_v13 = vmax.f32 %v2484_v30, 0.0  ;;  %v2288_v63 = vpop.f32.mrb[68].mxu0  ;;  %v4042_v29 = vpop.f32.mrb[132].mxu1  ;;  %3011 = vmatpush1.bf16.msra.mxu0 %v4580_v58  ;;  %v2403_v28 = vadd.f32 %v5553_v10, %v5567_v53  ;;  %v2408_v10 = vadd.f32 %v5555_v0, %v5567_v53 }
 0x5c1   :  { %v4160_v16 = vadd.f32 %v2288_v63, %v5563_v36  ;;  %v2290_v7 = vpop.f32.mrb[69].mxu0  ;;  %v4043_v27 = vpop.f32.mrb[133].mxu1 }
 0x5c2   :  { %v4161_v14 = vadd.f32 %v2290_v7, %v5570_v17  ;;  %v4044_v18 = vadd.f32 %v4043_v27, %v4042_v29  ;;  %v2292_v35 = vpop.f32.mrb[70].mxu0  ;;  %v4045_v9 = vpop.f32.mrb[134].mxu1  ;;  %2955 = vmatprep.mubr.bf16.mxu0 %v2572_v37  ;;  %v5623_v11 = vpack.c.bf16 %v2540_v13, %v2537_v21 }
 0x5c3   :  { %v4162_v57 = vadd.f32 %v2292_v35, %v5563_v36  ;;  %v2294_v19 = vpop.f32.mrb[71].mxu0  ;;  %v4046_v22 = vpop.f32.mrb[135].mxu1  ;;  %2956 = vmatmul.mubr.bf16.gmra.mrb[96].mxu0 %v2571_v32  ;;  %v2541_v23 = vmax.f32 %v4160_v16, 0.0 }
 0x5c4   :  { %v2489_v20 = vadd.f32 %v4044_v18, %v2392_v49  ;;  %v4163_v34 = vadd.f32 %v2294_v19, %v5570_v17  ;;  %v4047_v6 = vadd.f32 %v4046_v22, %v4045_v9  ;;  %v2542_v54 = vmax.f32 %v4161_v14, 0.0 }
 0x5c5   :  { %v2544_v5 = vmax.f32 %v4162_v57, 0.0 }
 0x5c6   :  { %v2545_v26 = vmax.f32 %v4163_v34, 0.0  ;;  %v2492_v31 = vadd.f32 %v4047_v6, %v2395_v12  ;;  %v2543_v48 = vmax.f32 %v2489_v20, 0.0 }
 0x5c7   :  { %v2574_v51 = vpack.c.bf16 %v2544_v5, %v2541_v23  ;;  %v2411_v5 = vadd.f32 %v5560_v15, %v5567_v53  ;;  %v4597_v15 = vld [vmem:[#allocation14 + $0x78] sm:$0xff]  }
 0x5c8   :  { %v2575_v33 = vpack.c.bf16 %v2545_v26, %v2542_v54  ;;  %v2546_v25 = vmax.f32 %v2492_v31, 0.0  ;;  %v2298_v41 = vpop.f32.mrb[72].mxu0  ;;  %v4048_v52 = vpop.f32.mrb[136].mxu1  ;;  %v4598_v53 = vld [vmem:[#allocation14 + $0x38] sm:$0xff]   ;;  %4074 = vmatprep.subr.bf16.mxu1 %v4597_v15 }
 0x5c9   :  { %v4164_v62 = vadd.f32 %v2298_v41, %v5563_v36  ;;  %v2300_v39 = vpop.f32.mrb[73].mxu0  ;;  %v4049_v45 = vpop.f32.mrb[137].mxu1  ;;  %4075 = vmatpush3.bf16.msra.mxu1 %v4598_v53 }
 0x5ca   :  { %v4165_v55 = vadd.f32 %v2300_v39, %v5570_v17  ;;  %v4050_v50 = vadd.f32 %v4049_v45, %v4048_v52  ;;  %v2302_v56 = vpop.f32.mrb[74].mxu0  ;;  %v4051_v60 = vpop.f32.mrb[138].mxu1  ;;  %2965 = vmatprep.mubr.bf16.mxu0 %v2575_v33  ;;  %v2576_v2 = vpack.c.bf16 %v2546_v25, %v2543_v48 }
 0x5cb   :  { %v4166_v58 = vadd.f32 %v2302_v56, %v5563_v36  ;;  %v2304_v59 = vpop.f32.mrb[75].mxu0  ;;  %v4052_v40 = vpop.f32.mrb[139].mxu1  ;;  %2966 = vmatmul.mubr.bf16.gmra.mrb[100].mxu0 %v2574_v51  ;;  %v2547_v8 = vmax.f32 %v4164_v62, 0.0 }
 0x5cc   :  { %v2497_v61 = vadd.f32 %v4050_v50, %v2400_v38  ;;  %v4167_v30 = vadd.f32 %v2304_v59, %v5570_v17  ;;  %v4053_v32 = vadd.f32 %v4052_v40, %v4051_v60  ;;  %v2548_v37 = vmax.f32 %v4165_v55, 0.0 }
 0x5cd   :  { %v2550_v21 = vmax.f32 %v4166_v58, 0.0 }
 0x5ce   :  { %v2551_v13 = vmax.f32 %v4167_v30, 0.0  ;;  %v2500_v63 = vadd.f32 %v4053_v32, %v2403_v28  ;;  %v2549_v16 = vmax.f32 %v2497_v61, 0.0 }
 0x5cf   :  { %v2577_v29 = vpack.c.bf16 %v2550_v21, %v2547_v8 }
 0x5d0   :  { %v2578_v7 = vpack.c.bf16 %v2551_v13, %v2548_v37  ;;  %v2552_v27 = vmax.f32 %v2500_v63, 0.0  ;;  %v2308_v49 = vpop.f32.mrb[76].mxu0  ;;  %v4054_v14 = vpop.f32.mrb[140].mxu1 }
 0x5d1   :  { %v4168_v18 = vadd.f32 %v2308_v49, %v5563_v36  ;;  %v2310_v35 = vpop.f32.mrb[77].mxu0  ;;  %v4055_v9 = vpop.f32.mrb[141].mxu1 }
 0x5d2   :  { %v4169_v57 = vadd.f32 %v2310_v35, %v5570_v17  ;;  %v4056_v19 = vadd.f32 %v4055_v9, %v4054_v14  ;;  %v2312_v22 = vpop.f32.mrb[78].mxu0  ;;  %v4057_v12 = vpop.f32.mrb[142].mxu1  ;;  %2975 = vmatprep.mubr.bf16.mxu0 %v2578_v7  ;;  %v2579_v20 = vpack.c.bf16 %v2552_v27, %v2549_v16 }
 0x5d3   :  { %v4170_v34 = vadd.f32 %v2312_v22, %v5563_v36  ;;  %v2314_v6 = vpop.f32.mrb[79].mxu0  ;;  %v4058_v23 = vpop.f32.mrb[143].mxu1  ;;  %2976 = vmatmul.mubr.bf16.gmra.mrb[104].mxu0 %v2577_v29  ;;  %v2553_v0 = vmax.f32 %v4168_v18, 0.0 }
 0x5d4   :  { %v2505_v54 = vadd.f32 %v4056_v19, %v2408_v10  ;;  %v4171_v26 = vadd.f32 %v2314_v6, %v5570_v17  ;;  %v4059_v31 = vadd.f32 %v4058_v23, %v4057_v12  ;;  %v2554_v48 = vmax.f32 %v4169_v57, 0.0  ;;  %v2631_v17 = vld [vmem:[%s5820_s10] sm:$0x3] }
 0x5d5   :  { %v2556_v51 = vmax.f32 %v4170_v34, 0.0 }
 0x5d6   :  { %v2557_v33 = vmax.f32 %v4171_v26, 0.0  ;;  %v2508_v25 = vadd.f32 %v4059_v31, %v2411_v5  ;;  %v2555_v52 = vmax.f32 %v2505_v54, 0.0 }
 0x5d7   :  { %v2580_v41 = vpack.c.bf16 %v2556_v51, %v2553_v0 }
 0x5d8   :  { %v2581_v62 = vpack.c.bf16 %v2557_v33, %v2554_v48  ;;  %v2558_v39 = vmax.f32 %v2508_v25, 0.0 }
 0x5da   :  { %2985 = vmatprep.mubr.bf16.mxu0 %v2581_v62  ;;  %v2582_v36 = vpack.c.bf16 %v2558_v39, %v2555_v52 }
 0x5db   :  { %2986 = vmatmul.mubr.bf16.gmra.mrb[108].mxu0 %v2580_v41 }
 0x5dc   :  { %3028 = vmatprep.mubr.bf16.mxu0 %v4944_v1 }
 0x5e3   :  { %3029 = vmatmul.mubr.bf16.vlgmr.msra.gmra.mrb[80].mxu0 %v5582_v24  ;;  %v5662_v24 = vrot.slane %v2631_v17, %v5157_v44 }
 0x5e4   :  { %3038 = vmatprep.mubr.bf16.mxu0 %v4944_v1 }
 0x5eb   :  { %3039 = vmatmul.mubr.bf16.gmra.mrb[84].mxu0 %v5593_v4  ;;  %v5665_v4 = vrot.slane %v2631_v17, %v5163_v46 }
 0x5ec   :  { %3048 = vmatprep.mubr.bf16.mxu0 %v4944_v1 }
 0x5f3   :  { %3049 = vmatmul.mubr.bf16.gmra.mrb[88].mxu0 %v5603_v3 }
 0x5f4   :  { %3058 = vmatprep.mubr.bf16.mxu0 %v4944_v1 }
 0x5fb   :  { %3059 = vmatmul.mubr.bf16.gmra.mrb[92].mxu0 %v5613_v47 }
 0x5fc   :  { %3068 = vmatprep.mubr.bf16.mxu0 %v4944_v1 }
 0x603   :  { %3069 = vmatmul.mubr.bf16.gmra.mrb[96].mxu0 %v5623_v11 }
 0x604   :  { %3078 = vmatprep.mubr.bf16.mxu0 %v4944_v1 }
 0x60b   :  { %3079 = vmatmul.mubr.bf16.gmra.mrb[100].mxu0 %v2576_v2 }
 0x60c   :  { %3088 = vmatprep.mubr.bf16.mxu0 %v4944_v1 }
 0x613   :  { %3089 = vmatmul.mubr.bf16.gmra.mrb[104].mxu0 %v2579_v20 }
 0x614   :  { %3098 = vmatprep.mubr.bf16.mxu0 %v4944_v1 }
 0x61b   :  { %3099 = vmatmul.mubr.bf16.gmra.mrb[108].mxu0 %v2582_v36 }
 0x6b6   :  { %v3030_v3 = vpop.f32.mrb[80].mxu0 }
 0x6b7   :  { %v4172_v47 = vadd.f32 %v3030_v3, %v5662_v24  ;;  %v3032_v11 = vpop.f32.mrb[81].mxu0 }
 0x6b8   :  { %v4173_v1 = vadd.f32 %v3032_v11, %v5665_v4  ;;  %v3034_v45 = vpop.f32.mrb[82].mxu0 }
 0x6b9   :  { %v4174_v38 = vadd.f32 %v3034_v45, %v5662_v24  ;;  %v3036_v55 = vpop.f32.mrb[83].mxu0  ;;  %v3109_v56 = vmax.f32 %v4172_v47, 0.0 }
 0x6ba   :  { %v4175_v50 = vadd.f32 %v3036_v55, %v5665_v4  ;;  %v3110_v2 = vmax.f32 %v4173_v1, 0.0 }
 0x6bb   :  { %v3111_v60 = vmax.f32 %v4174_v38, 0.0 }
 0x6bc   :  { %v3112_v58 = vmax.f32 %v4175_v50, 0.0 }
 0x6bd   :  { %v3141_v59 = vpack.c.bf16 %v3111_v60, %v3109_v56 }
 0x6be   :  { %v3142_v40 = vpack.c.bf16 %v3112_v58, %v3110_v2  ;;  %v3040_v46 = vpop.f32.mrb[84].mxu0 }
 0x6bf   :  { %v4176_v28 = vadd.f32 %v3040_v46, %v5662_v24  ;;  %v3042_v61 = vpop.f32.mrb[85].mxu0 }
 0x6c0   :  { %v4177_v30 = vadd.f32 %v3042_v61, %v5665_v4  ;;  %v3044_v32 = vpop.f32.mrb[86].mxu0  ;;  %3324 = vmatprep.mubr.bf16.mxu1 %v3142_v40 }
 0x6c1   :  { %v4178_v8 = vadd.f32 %v3044_v32, %v5662_v24  ;;  %v3046_v21 = vpop.f32.mrb[87].mxu0  ;;  %3325 = vmatmul.mubr.bf16.vlgmr.msra.gmra.mrb[144].mxu1 %v3141_v59  ;;  %v3113_v13 = vmax.f32 %v4176_v28, 0.0 }
 0x6c2   :  { %v4179_v37 = vadd.f32 %v3046_v21, %v5665_v4  ;;  %v3114_v29 = vmax.f32 %v4177_v30, 0.0 }
 0x6c3   :  { %v3115_v63 = vmax.f32 %v4178_v8, 0.0 }
 0x6c4   :  { %v3116_v16 = vmax.f32 %v4179_v37, 0.0 }
 0x6c5   :  { %v3143_v7 = vpack.c.bf16 %v3115_v63, %v3113_v13 }
 0x6c6   :  { %v3144_v27 = vpack.c.bf16 %v3116_v16, %v3114_v29  ;;  %v3050_v49 = vpop.f32.mrb[88].mxu0 }
 0x6c7   :  { %v4180_v14 = vadd.f32 %v3050_v49, %v5662_v24  ;;  %v3052_v18 = vpop.f32.mrb[89].mxu0 }
 0x6c8   :  { %v4181_v35 = vadd.f32 %v3052_v18, %v5665_v4  ;;  %v3054_v9 = vpop.f32.mrb[90].mxu0  ;;  %3332 = vmatprep.mubr.bf16.mxu1 %v3144_v27 }
 0x6c9   :  { %v4182_v10 = vadd.f32 %v3054_v9, %v5662_v24  ;;  %v3056_v57 = vpop.f32.mrb[91].mxu0  ;;  %3333 = vmatmul.mubr.bf16.gmra.mrb[148].mxu1 %v3143_v7  ;;  %v3117_v22 = vmax.f32 %v4180_v14, 0.0 }
 0x6ca   :  { %v4183_v19 = vadd.f32 %v3056_v57, %v5665_v4  ;;  %v3118_v20 = vmax.f32 %v4181_v35, 0.0 }
 0x6cb   :  { %v3119_v12 = vmax.f32 %v4182_v10, 0.0 }
 0x6cc   :  { %v3120_v34 = vmax.f32 %v4183_v19, 0.0 }
 0x6cd   :  { %v3145_v6 = vpack.c.bf16 %v3119_v12, %v3117_v22 }
 0x6ce   :  { %v3146_v23 = vpack.c.bf16 %v3120_v34, %v3118_v20  ;;  %v3060_v5 = vpop.f32.mrb[92].mxu0 }
 0x6cf   :  { %v4184_v54 = vadd.f32 %v3060_v5, %v5662_v24  ;;  %v3062_v26 = vpop.f32.mrb[93].mxu0 }
 0x6d0   :  { %v4185_v31 = vadd.f32 %v3062_v26, %v5665_v4  ;;  %v3064_v0 = vpop.f32.mrb[94].mxu0  ;;  %3340 = vmatprep.mubr.bf16.mxu1 %v3146_v23 }
 0x6d1   :  { %v4186_v51 = vadd.f32 %v3064_v0, %v5662_v24  ;;  %v3066_v48 = vpop.f32.mrb[95].mxu0  ;;  %3341 = vmatmul.mubr.bf16.gmra.mrb[152].mxu1 %v3145_v6  ;;  %v3121_v25 = vmax.f32 %v4184_v54, 0.0 }
 0x6d2   :  { %v4187_v33 = vadd.f32 %v3066_v48, %v5665_v4  ;;  %v3122_v52 = vmax.f32 %v4185_v31, 0.0 }
 0x6d3   :  { %v3123_v41 = vmax.f32 %v4186_v51, 0.0 }
 0x6d4   :  { %v3124_v62 = vmax.f32 %v4187_v33, 0.0 }
 0x6d5   :  { %v3147_v39 = vpack.c.bf16 %v3123_v41, %v3121_v25 }
 0x6d6   :  { %v3148_v36 = vpack.c.bf16 %v3124_v62, %v3122_v52  ;;  %v3070_v15 = vpop.f32.mrb[96].mxu0 }
 0x6d7   :  { %v4188_v53 = vadd.f32 %v3070_v15, %v5662_v24  ;;  %v3072_v17 = vpop.f32.mrb[97].mxu0 }
 0x6d8   :  { %v4189_v3 = vadd.f32 %v3072_v17, %v5665_v4  ;;  %v3074_v47 = vpop.f32.mrb[98].mxu0  ;;  %3348 = vmatprep.mubr.bf16.mxu1 %v3148_v36 }
 0x6d9   :  { %v4190_v11 = vadd.f32 %v3074_v47, %v5662_v24  ;;  %v3076_v1 = vpop.f32.mrb[99].mxu0  ;;  %3349 = vmatmul.mubr.bf16.gmra.mrb[156].mxu1 %v3147_v39  ;;  %v3125_v38 = vmax.f32 %v4188_v53, 0.0  ;;  %v5702_v39 = vld [vmem:[%s5822_s12] ss:$0 sm:$0xff]  ;;  %s4945_s12 = smov [#allocation15]  }
 0x6da   :  { %v4191_v45 = vadd.f32 %v3076_v1, %v5665_v4  ;;  %v3126_v50 = vmax.f32 %v4189_v3, 0.0  ;;  %v5708_v3 = vld [vmem:[%s5823_s13] ss:$0 sm:$0xff]  ;;  %s3621_s13 = sshll.u32 %s4945_s12, 4  ;;  %s3622_s13 = int_to_ptr.vmem [resolvable:$true] %s3621_s13 }
 0x6db   :  { %v3127_v55 = vmax.f32 %v4190_v11, 0.0  ;;  %s4897_s14 = scalar_lea.vmem %s3622_s13, 16  ;;  %s4901_s16 = scalar_lea.vmem %s3622_s13, 32 }
 0x6dc   :  { %v3128_v56 = vmax.f32 %v4191_v45, 0.0  ;;  %p4898_p0 = scmp.ne.s32.totalorder %s3622_s13, %s4897_s14  ;;  %p4902_p1 = scmp.lt.s32.totalorder %s3622_s13, %s3622_s13 }
 0x6dd   :  { %v3149_v60 = vpack.c.bf16 %v3127_v55, %v3125_v38  ;;  %p4903_p2 = scmp.lt.s32.totalorder %s4901_s16, %s4897_s14 }
 0x6de   :  { %v3150_v2 = vpack.c.bf16 %v3128_v56, %v3126_v50  ;;  %v3080_v58 = vpop.f32.mrb[100].mxu0 }
 0x6df   :  { %v4192_v59 = vadd.f32 %v3080_v58, %v5662_v24  ;;  %v3082_v40 = vpop.f32.mrb[101].mxu0  ;;  %p4904_p3 = por %p4903_p2, %p4902_p1 }
 0x6e0   :  { %v4193_v46 = vadd.f32 %v3082_v40, %v5665_v4  ;;  %v3084_v28 = vpop.f32.mrb[102].mxu0  ;;  %3356 = vmatprep.mubr.bf16.mxu1 %v3150_v2 }
 0x6e1   :  { %v4194_v61 = vadd.f32 %v3084_v28, %v5662_v24  ;;  %v3086_v30 = vpop.f32.mrb[103].mxu0  ;;  %3357 = vmatmul.mubr.bf16.gmra.mrb[160].mxu1 %v3149_v60  ;;  %v3129_v8 = vmax.f32 %v4192_v59, 0.0  ;;  %p4905_p4 = pnand %p4904_p3, %p4898_p0 }
 0x6e2   :  { %v4195_v32 = vadd.f32 %v3086_v30, %v5665_v4  ;;  %v3130_v37 = vmax.f32 %v4193_v46, 0.0 }
 0x6e3   :  { %v3131_v21 = vmax.f32 %v4194_v61, 0.0 }
 0x6e4   :  { %v3132_v13 = vmax.f32 %v4195_v32, 0.0 }
 0x6e5   :  { %v3151_v63 = vpack.c.bf16 %v3131_v21, %v3129_v8 }
 0x6e6   :  { %v3152_v29 = vpack.c.bf16 %v3132_v13, %v3130_v37  ;;  %v3090_v16 = vpop.f32.mrb[104].mxu0 }
 0x6e7   :  { %v4196_v7 = vadd.f32 %v3090_v16, %v5662_v24  ;;  %v3092_v27 = vpop.f32.mrb[105].mxu0 }
 0x6e8   :  { %v4197_v49 = vadd.f32 %v3092_v27, %v5665_v4  ;;  %v3094_v14 = vpop.f32.mrb[106].mxu0  ;;  %3364 = vmatprep.mubr.bf16.mxu1 %v3152_v29 }
 0x6e9   :  { %v4198_v18 = vadd.f32 %v3094_v14, %v5662_v24  ;;  %v3096_v35 = vpop.f32.mrb[107].mxu0  ;;  %3365 = vmatmul.mubr.bf16.gmra.mrb[164].mxu1 %v3151_v63  ;;  %v3133_v10 = vmax.f32 %v4196_v7, 0.0 }
 0x6ea   :  { %v4199_v9 = vadd.f32 %v3096_v35, %v5665_v4  ;;  %v3134_v19 = vmax.f32 %v4197_v49, 0.0 }
 0x6eb   :  { %v3135_v57 = vmax.f32 %v4198_v18, 0.0 }
 0x6ec   :  { %v3136_v22 = vmax.f32 %v4199_v9, 0.0 }
 0x6ed   :  { %v3153_v12 = vpack.c.bf16 %v3135_v57, %v3133_v10 }
 0x6ee   :  { %v3154_v20 = vpack.c.bf16 %v3136_v22, %v3134_v19  ;;  %v3100_v34 = vpop.f32.mrb[108].mxu0 }
 0x6ef   :  { %v4200_v6 = vadd.f32 %v3100_v34, %v5662_v24  ;;  %v3102_v23 = vpop.f32.mrb[109].mxu0 }
 0x6f0   :  { %v4201_v5 = vadd.f32 %v3102_v23, %v5665_v4  ;;  %v3104_v54 = vpop.f32.mrb[110].mxu0  ;;  %3372 = vmatprep.mubr.bf16.mxu1 %v3154_v20 }
 0x6f1   :  { %v4202_v26 = vadd.f32 %v3104_v54, %v5662_v24  ;;  %v3106_v31 = vpop.f32.mrb[111].mxu0  ;;  %3373 = vmatmul.mubr.bf16.gmra.mrb[168].mxu1 %v3153_v12  ;;  %v3137_v51 = vmax.f32 %v4200_v6, 0.0 }
 0x6f2   :  { %v4203_v0 = vadd.f32 %v3106_v31, %v5665_v4  ;;  %v3138_v33 = vmax.f32 %v4201_v5, 0.0 }
 0x6f3   :  { %v3139_v48 = vmax.f32 %v4202_v26, 0.0 }
 0x6f4   :  { %v3140_v25 = vmax.f32 %v4203_v0, 0.0 }
 0x6f5   :  { %v3155_v41 = vpack.c.bf16 %v3139_v48, %v3137_v51 }
 0x6f6   :  { %v3156_v52 = vpack.c.bf16 %v3140_v25, %v3138_v33 }
 0x6f8   :  { %3380 = vmatprep.mubr.bf16.mxu1 %v3156_v52 }
 0x6f9   :  { %3381 = vmatmul.mubr.bf16.gmra.mrb[172].mxu1 %v3155_v41 }
 0x794   :  { %v4076_v62 = vpop.f32.mrb[144].mxu1 }
 0x795   :  { %v4077_v36 = vpop.f32.mrb[145].mxu1 }
 0x796   :  { %v4078_v24 = vadd.f32 %v4077_v36, %v4076_v62  ;;  %v4079_v15 = vpop.f32.mrb[146].mxu1 }
 0x797   :  { %v4080_v53 = vpop.f32.mrb[147].mxu1 }
 0x798   :  { %v3327_v4 = vadd.f32 %v4078_v24, %v5702_v39  ;;  %v4081_v17 = vadd.f32 %v4080_v53, %v4079_v15  ;;  %v3460_v53 = vld [vmem:[#allocation2] sm:$0x1] }
 0x79a   :  { %v3389_v47 = vmax.f32 %v3327_v4, 0.0  ;;  %v3330_v11 = vadd.f32 %v4081_v17, %v5702_v39 }
 0x79c   :  { %v3390_v1 = vmax.f32 %v3330_v11, 0.0  ;;  %v4082_v45 = vpop.f32.mrb[148].mxu1  ;;  %v3412_v38 = vmul.f32 %v5708_v3, %v3389_v47 }
 0x79d   :  { %v4083_v55 = vpop.f32.mrb[149].mxu1 }
 0x79e   :  { %v4084_v50 = vadd.f32 %v4083_v55, %v4082_v45  ;;  %v4085_v56 = vpop.f32.mrb[150].mxu1  ;;  %3428 = vadd.xlane.f32.xlu0 %v3412_v38  ;;  %v3413_v60 = vmul.f32 %v5708_v3, %v3390_v1 }
 0x79f   :  { %v4086_v2 = vpop.f32.mrb[151].mxu1 }
 0x7a0   :  { %v3335_v58 = vadd.f32 %v4084_v50, %v5702_v39  ;;  %v4087_v59 = vadd.f32 %v4086_v2, %v4085_v56  ;;  %3430 = vadd.xlane.f32.xlu1 %v3413_v60 }
 0x7a2   :  { %v3391_v40 = vmax.f32 %v3335_v58, 0.0  ;;  %v3338_v46 = vadd.f32 %v4087_v59, %v5702_v39 }
 0x7a4   :  { %v3392_v28 = vmax.f32 %v3338_v46, 0.0  ;;  %v4088_v61 = vpop.f32.mrb[152].mxu1  ;;  %v3414_v30 = vmul.f32 %v5708_v3, %v3391_v40 }
 0x7a5   :  { %v4089_v32 = vpop.f32.mrb[153].mxu1 }
 0x7a6   :  { %v4090_v8 = vadd.f32 %v4089_v32, %v4088_v61  ;;  %v4091_v21 = vpop.f32.mrb[154].mxu1  ;;  %3432 = vadd.xlane.f32.xlu0 %v3414_v30  ;;  %v3415_v37 = vmul.f32 %v5708_v3, %v3392_v28 }
 0x7a7   :  { %v4092_v13 = vpop.f32.mrb[155].mxu1 }
 0x7a8   :  { %v3343_v63 = vadd.f32 %v4090_v8, %v5702_v39  ;;  %v4093_v29 = vadd.f32 %v4092_v13, %v4091_v21  ;;  %3434 = vadd.xlane.f32.xlu1 %v3415_v37 }
 0x7aa   :  { %v3393_v16 = vmax.f32 %v3343_v63, 0.0  ;;  %v3346_v7 = vadd.f32 %v4093_v29, %v5702_v39 }
 0x7ac   :  { %v3394_v27 = vmax.f32 %v3346_v7, 0.0  ;;  %v4094_v49 = vpop.f32.mrb[156].mxu1  ;;  %v3416_v14 = vmul.f32 %v5708_v3, %v3393_v16 }
 0x7ad   :  { %v4095_v18 = vpop.f32.mrb[157].mxu1 }
 0x7ae   :  { %v4096_v35 = vadd.f32 %v4095_v18, %v4094_v49  ;;  %v4097_v9 = vpop.f32.mrb[158].mxu1  ;;  %3436 = vadd.xlane.f32.xlu0 %v3416_v14  ;;  %v3417_v10 = vmul.f32 %v5708_v3, %v3394_v27 }
 0x7af   :  { %v4098_v57 = vpop.f32.mrb[159].mxu1 }
 0x7b0   :  { %v3351_v19 = vadd.f32 %v4096_v35, %v5702_v39  ;;  %v4099_v22 = vadd.f32 %v4098_v57, %v4097_v9  ;;  %3438 = vadd.xlane.f32.xlu1 %v3417_v10 }
 0x7b2   :  { %v3395_v12 = vmax.f32 %v3351_v19, 0.0  ;;  %v3354_v20 = vadd.f32 %v4099_v22, %v5702_v39 }
 0x7b4   :  { %v3396_v34 = vmax.f32 %v3354_v20, 0.0  ;;  %v4100_v6 = vpop.f32.mrb[160].mxu1  ;;  %v3418_v23 = vmul.f32 %v5708_v3, %v3395_v12 }
 0x7b5   :  { %v4101_v5 = vpop.f32.mrb[161].mxu1 }
 0x7b6   :  { %v4102_v54 = vadd.f32 %v4101_v5, %v4100_v6  ;;  %v4103_v26 = vpop.f32.mrb[162].mxu1  ;;  %3440 = vadd.xlane.f32.xlu0 %v3418_v23  ;;  %v3419_v48 = vmul.f32 %v5708_v3, %v3396_v34  ;;  %v5742_v6 = vand.u32 127, %v183_v42 }
 0x7b7   :  { %v4104_v31 = vpop.f32.mrb[163].mxu1 }
 0x7b8   :  { %v3359_v0 = vadd.f32 %v4102_v54, %v5702_v39  ;;  %v4105_v51 = vadd.f32 %v4104_v31, %v4103_v26  ;;  %v3515_v54 = vadd.s32 4294967280, %v5742_v6 }
 0x7ba   :  { %v3397_v33 = vmax.f32 %v3359_v0, 0.0  ;;  %v3362_v25 = vadd.f32 %v4105_v51, %v5702_v39  ;;  %3442 = vadd.xlane.f32.xlu0 %v3419_v48  ;;  %v3506_v51 = vsub.s32 %v5742_v6, %v5154_v43 }
 0x7bc   :  { %v3398_v41 = vmax.f32 %v3362_v25, 0.0  ;;  %v4106_v52 = vpop.f32.mrb[164].mxu1  ;;  %v3420_v62 = vmul.f32 %v5708_v3, %v3397_v33  ;;  %v3518_v33 = vsub.s32 %v3515_v54, %v5154_v43 }
 0x7bd   :  { %v4107_v36 = vpop.f32.mrb[165].mxu1 }
 0x7be   :  { %v4108_v24 = vadd.f32 %v4107_v36, %v4106_v52  ;;  %v4109_v15 = vpop.f32.mrb[166].mxu1  ;;  %3444 = vadd.xlane.f32.xlu0 %v3420_v62  ;;  %v3421_v11 = vmul.f32 %v5708_v3, %v3398_v41  ;;  %v3522_v41 = vadd.s32 4294967272, %v5742_v6  ;;  %v3529_v36 = vadd.s32 4294967264, %v5742_v6 }
 0x7bf   :  { %v4110_v4 = vpop.f32.mrb[167].mxu1 }
 0x7c0   :  { %v3367_v17 = vadd.f32 %v4108_v24, %v5702_v39  ;;  %v4111_v47 = vadd.f32 %v4110_v4, %v4109_v15 }
 0x7c1   :  { %3463 = vperm.xlu1 %4285, %v3460_v53   ;;  %v3525_v53 = vsub.s32 %v3522_v41, %v5154_v43 }
 0x7c2   :  { %v3399_v1 = vmax.f32 %v3367_v17, 0.0  ;;  %v3370_v45 = vadd.f32 %v4111_v47, %v5702_v39  ;;  %3446 = vadd.xlane.f32.xlu0 %v3421_v11  ;;  %v3536_v17 = vadd.s32 4294967256, %v5742_v6 }
 0x7c4   :  { %v3400_v38 = vmax.f32 %v3370_v45, 0.0  ;;  %v4112_v55 = vpop.f32.mrb[168].mxu1  ;;  %v3422_v50 = vmul.f32 %v5708_v3, %v3399_v1  ;;  %v3532_v1 = vsub.s32 %v3529_v36, %v5154_v43 }
 0x7c5   :  { %v4113_v56 = vpop.f32.mrb[169].mxu1 }
 0x7c6   :  { %v4114_v60 = vadd.f32 %v4113_v56, %v4112_v55  ;;  %v4115_v2 = vpop.f32.mrb[170].mxu1  ;;  %3448 = vadd.xlane.f32.xlu0 %v3422_v50  ;;  %v3423_v58 = vmul.f32 %v5708_v3, %v3400_v38  ;;  %v3543_v38 = vadd.s32 4294967248, %v5742_v6  ;;  %v3539_v56 = vsub.s32 %v3536_v17, %v5154_v43 }
 0x7c7   :  { %v4116_v59 = vpop.f32.mrb[171].mxu1 }
 0x7c8   :  { %v3375_v40 = vadd.f32 %v4114_v60, %v5702_v39  ;;  %v4117_v46 = vadd.f32 %v4116_v59, %v4115_v2  ;;  %v3550_v59 = vadd.s32 4294967240, %v5742_v6 }
 0x7ca   :  { %v3401_v28 = vmax.f32 %v3375_v40, 0.0  ;;  %v3378_v61 = vadd.f32 %v4117_v46, %v5702_v39 }
 0x7cc   :  { %v3402_v30 = vmax.f32 %v3378_v61, 0.0  ;;  %v4118_v32 = vpop.f32.mrb[172].mxu1  ;;  %v3424_v8 = vmul.f32 %v5708_v3, %v3401_v28  ;;  %v3557_v28 = vadd.s32 4294967232, %v5742_v6 }
 0x7cd   :  { %v4119_v21 = vpop.f32.mrb[173].mxu1 }
 0x7ce   :  { %v4120_v37 = vadd.f32 %v4119_v21, %v4118_v32  ;;  %v4121_v13 = vpop.f32.mrb[174].mxu1  ;;  %3452 = vadd.xlane.f32.xlu0 %v3424_v8  ;;  %v3425_v7 = vmul.f32 %v5708_v3, %v3402_v30  ;;  %v3564_v30 = vadd.s32 4294967224, %v5742_v6  ;;  %v3571_v32 = vadd.s32 4294967216, %v5742_v6 }
 0x7cf   :  { %v4122_v63 = vpop.f32.mrb[175].mxu1  ;;  %v3553_v21 = vsub.s32 %v3550_v59, %v5154_v43 }
 0x7d0   :  { %v3383_v29 = vadd.f32 %v4120_v37, %v5702_v39  ;;  %v4123_v16 = vadd.f32 %v4122_v63, %v4121_v13  ;;  %v3560_v63 = vsub.s32 %v3557_v28, %v5154_v43 }
 0x7d2   :  { %v3403_v27 = vmax.f32 %v3383_v29, 0.0  ;;  %v3386_v49 = vadd.f32 %v4123_v16, %v5702_v39  ;;  %3454 = vadd.xlane.f32.xlu0 %v3425_v7  ;;  %v3567_v7 = vsub.s32 %v3564_v30, %v5154_v43 }
 0x7d4   :  { %v3404_v14 = vmax.f32 %v3386_v49, 0.0  ;;  %v3426_v18 = vmul.f32 %v5708_v3, %v3403_v27  ;;  %v3578_v49 = vadd.s32 4294967208, %v5742_v6 }
 0x7d6   :  { %3456 = vadd.xlane.f32.xlu0 %v3426_v18  ;;  %v3427_v35 = vmul.f32 %v5708_v3, %v3404_v14  ;;  %v3508_v3 = vadd.s32 4294967288, %v5742_v6  ;;  %v3574_v18 = vsub.s32 %v3571_v32, %v5154_v43 }
 0x7d8   :  { %v3511_v42 = vsub.s32 %v3508_v3, %v5154_v43 }
 0x7da   :  { %3458 = vadd.xlane.f32.xlu0 %v3427_v35 }
 0x7e5   :  { %3450 = vadd.xlane.f32.xlu1 %v3423_v58  ;;  %v3546_v58 = vsub.s32 %v3543_v38, %v5154_v43 }
 0x82b   :  { %v3429_v9 = vpop.xlane.xlu0 %3428 }
 0x82d   :  { %v3431_v19 = vpop.xlane.xlu1 %3430 }
 0x833   :  { %v3433_v10 = vpop.xlane.xlu0 %3432 }
 0x835   :  { %v3435_v12 = vpop.xlane.xlu1 %3434 }
 0x83b   :  { %v3437_v57 = vpop.xlane.xlu0 %3436 }
 0x83d   :  { %v3439_v20 = vpop.xlane.xlu1 %3438 }
 0x841   :  { %v3464_v39 = vpop.permute.xlu1 %3463 }
 0x842   :  { %v5745_v5 = vrot.slane %v3464_v39, %v5157_v44  ;;  %v3581_v39 = vsub.s32 %v3578_v49, %v5154_v43 }
 0x843   :  { %v3441_v22 = vpop.xlane.xlu0 %3440 }
 0x844   :  { %v3470_v31 = vadd.f32 %v5745_v5, %v3429_v9  ;;  %v3471_v0 = vadd.f32 %v5745_v5, %v3431_v19  ;;  %v3472_v48 = vadd.f32 %v5745_v5, %v3433_v10  ;;  %v3473_v24 = vadd.f32 %v5745_v5, %v3435_v12 }
 0x845   :  { %v3474_v47 = vadd.f32 %v5745_v5, %v3437_v57  ;;  %v3475_v55 = vadd.f32 %v5745_v5, %v3439_v20  ;;  %v3476_v46 = vadd.f32 %v5745_v5, %v3441_v22  ;;  %v3585_v9 = vadd.s32 4294967200, %v5742_v6 }
 0x846   :  { %v3507_v44 = vrot.slane %v3470_v31, %v3506_v51  ;;  %v3512_v25 = vrot.slane %v3471_v0, %v3511_v42  ;;  %v3519_v62 = vrot.slane %v3472_v48, %v3518_v33  ;;  %v3526_v45 = vrot.slane %v3473_v24, %v3525_v53 }
 0x847   :  { %v3443_v34 = vpop.xlane.xlu0 %3442  ;;  %v3533_v60 = vrot.slane %v3474_v47, %v3532_v1  ;;  %v3540_v61 = vrot.slane %v3475_v55, %v3539_v56  ;;  %v3547_v13 = vrot.slane %v3476_v46, %v3546_v58  ;;  %v3592_v57 = vadd.s32 4294967192, %v5742_v6 }
 0x848   :  { %v3514_v15 = vsel %vm3513_vm0, %v3512_v25, %v3507_v44  ;;  %v3477_v37 = vadd.f32 %v5745_v5, %v3443_v34  ;;  %v3599_v19 = vadd.s32 4294967184, %v5742_v6  ;;  %v3606_v12 = vadd.s32 4294967176, %v5742_v6 }
 0x849   :  { %v3521_v11 = vsel %vm3520_vm1, %v3519_v62, %v3514_v15  ;;  %v3588_v3 = vsub.s32 %v3585_v9, %v5154_v43  ;;  %v3595_v0 = vsub.s32 %v3592_v57, %v5154_v43 }
 0x84a   :  { %v3528_v50 = vsel %vm3527_vm2, %v3526_v45, %v3521_v11  ;;  %v3554_v10 = vrot.slane %v3477_v37, %v3553_v21  ;;  %v3602_v42 = vsub.s32 %v3599_v19, %v5154_v43  ;;  %v3609_v44 = vsub.s32 %v3606_v12, %v5154_v43 }
 0x84b   :  { %v3445_v23 = vpop.xlane.xlu0 %3444  ;;  %v3535_v40 = vsel %vm3534_vm3, %v3533_v60, %v3528_v50 }
 0x84c   :  { %v3542_v8 = vsel %vm3541_vm4, %v3540_v61, %v3535_v40  ;;  %v3478_v29 = vadd.f32 %v5745_v5, %v3445_v23 }
 0x84d   :  { %v3549_v14 = vsel %vm3548_vm5, %v3547_v13, %v3542_v8 }
 0x84e   :  { %v3561_v22 = vrot.slane %v3478_v29, %v3560_v63  ;;  %v3556_v20 = vsel %vm3555_vm6, %v3554_v10, %v3549_v14 }
 0x84f   :  { %v3447_v26 = vpop.xlane.xlu0 %3446 }
 0x850   :  { %v3479_v27 = vadd.f32 %v5745_v5, %v3447_v26  ;;  %v3563_v48 = vsel %vm3562_vm7, %v3561_v22, %v3556_v20 }
 0x852   :  { %v3568_v34 = vrot.slane %v3479_v27, %v3567_v7 }
 0x853   :  { %v3449_v52 = vpop.xlane.xlu0 %3448 }
 0x854   :  { %v3480_v35 = vadd.f32 %v5745_v5, %v3449_v52  ;;  %v3570_v25 = vsel %vm3569_vm8, %v3568_v34, %v3563_v48 }
 0x856   :  { %v3575_v23 = vrot.slane %v3480_v35, %v3574_v18 }
 0x858   :  { %v3577_v62 = vsel %vm3576_vm9, %v3575_v23, %v3570_v25 }
 0x85b   :  { %v3453_v4 = vpop.xlane.xlu0 %3452 }
 0x85c   :  { %v3482_v54 = vadd.f32 %v5745_v5, %v3453_v4 }
 0x85e   :  { %v3589_v36 = vrot.slane %v3482_v54, %v3588_v3 }
 0x85f   :  { %v3455_v2 = vpop.xlane.xlu0 %3454 }
 0x860   :  { %v3483_v51 = vadd.f32 %v5745_v5, %v3455_v2 }
 0x862   :  { %v3596_v24 = vrot.slane %v3483_v51, %v3595_v0 }
 0x863   :  { %v3457_v16 = vpop.xlane.xlu0 %3456 }
 0x864   :  { %v3484_v33 = vadd.f32 %v5745_v5, %v3457_v16 }
 0x866   :  { %v3603_v53 = vrot.slane %v3484_v33, %v3602_v42 }
 0x867   :  { %v3459_v26 = vpop.xlane.xlu0 %3458 }
 0x868   :  { %v3485_v41 = vadd.f32 %v5745_v5, %v3459_v26 }
 0x86a   :  { %v3610_v43 = vrot.slane %v3485_v41, %v3609_v44 }
 0x872   :  { %v3451_v31 = vpop.xlane.xlu1 %3450 }
 0x873   :  { %v3481_v6 = vadd.f32 %v5745_v5, %v3451_v31 }
 0x875   :  { %v3582_v52 = vrot.slane %v3481_v6, %v3581_v39 }
 0x877   :  { %v3584_v15 = vsel %vm3583_vm10, %v3582_v52, %v3577_v62 }
 0x878   :  { %v3591_v4 = vsel %vm3590_vm11, %v3589_v36, %v3584_v15 }
 0x879   :  { %v3598_v17 = vsel %vm3597_vm12, %v3596_v24, %v3591_v4 }
 0x87a   :  { %v3605_v47 = vsel %vm3604_vm13, %v3603_v53, %v3598_v17 }
 0x87b   :  { %v3612_v11 = vsel %vm3611_vm14, %v3610_v43, %v3605_v47 }
 0x87c   :  { %3614 = vst [vmem:[#allocation15] sm:$0x1] %v3612_v11 }
 0x87d   :  { %4908 = shalt.err (!%p4905_p4)
}
 0x87e   :  { %s4909_s20 = scalar_lea.hbm %s5825_s15, 16 }
 0x87f   :  { %p4910_p5 = scmp.ne.s32.totalorder %s5825_s15, %s4909_s20  ;;  %p4913_p6 = scmp.lt.u32.totalorder %s4909_s20, %s5825_s15 }
 0x881   :  { %p4915_p7 = pnand %p4913_p6, %p4910_p5 }
 0x883   :  { %4918 = shalt.err (!%p4915_p7)
}
 0x884   :  { %3624 = dma.vmem_to_hbm [thread:$0]  %s3622_s13, 16, %s5825_s15, [#allocation5]  }
 0x885   :  { %4927 = dma.done.wait [#allocation5], 16  }
 0x886   :  { %4928 = vsyncadd [#allocation5], 4294967280 }
 0x887   :  { %3628 = vsyncpa [#allocation4], 1 }
 0x888   :  { %3629 = vsyncpa [#allocation7], 1 }
 0x889   :  { %3630 = vsyncpa [#allocation10], 1 }
 0x88a   :  { %3631 = vsyncpa [#allocation13], 1 }
 0x88b   :  { %3632 = vsyncpa [#allocation5], 1 }

</bundles_post_ra>
